<compile_context>
chip_gen: v6e
topology: v6e:2x2x1
jax: 0.10.0
libtpu: 0.0.40
codegen_flags: <defaults>
</compile_context>

<pallas_src>
import math
import jax
import jax.numpy as jnp
from jax.experimental import pallas as pl
from jax.experimental.pallas import tpu as pltpu

# ----------------------------- model config (small) -------------------------
VOCAB_SIZE = 128                 # multiple of 128 -> lane-dense logits stores
MAX_LEN    = 16
N_LAYERS   = 2
D_MODEL    = 32
D_FF       = 64
N_HEADS    = 4
D_HEAD     = D_MODEL // N_HEADS
PAD_IDX    = 0
LN_EPS     = 1e-5
INV_SCALE  = 1.0 / math.sqrt(D_MODEL / N_HEADS)   # fold 1/scale into Q
# TODO(synk): dropout layers are treated as identity (inference / eval mode).


# ----------------------------- in-kernel helpers ----------------------------
def _add_layernorm(x, res, g, b):
    """LayerNorm(x + res) over the last dim. x,res:(S,D) g,b:(1,D)."""
    h = x + res
    mu = jnp.mean(h, axis=-1, keepdims=True)
    var = jnp.mean((h - mu) * (h - mu), axis=-1, keepdims=True)
    return (h - mu) * jax.lax.rsqrt(var + LN_EPS) * g + b


def _attention(q, k, v, wo, bo, mask):
    """Multi-head attention + fused output projection, all in VMEM.

    q:(Sq,D) k,v:(Skv,D) already projected; wo:(D,D) bo:(1,D);
    mask: bool, broadcastable to (Sq,Skv), True = masked.
    Heads are a static unrolled loop (head split/merge is static lane slicing,
    no HBM transposes); the concat + output projection is folded into a
    per-head accumulation oh @ wo[h*Dh:(h+1)*Dh, :].
    """
    Sq = q.shape[0]
    out = jnp.zeros((Sq, D_MODEL), jnp.float32)
    for h in range(N_HEADS):
        lo = h * D_HEAD
        qh = q[:, lo:lo + D_HEAD] * jnp.float32(INV_SCALE)
        kh = k[:, lo:lo + D_HEAD]
        vh = v[:, lo:lo + D_HEAD]
        s = jnp.dot(qh, kh.T, preferred_element_type=jnp.float32)      # (Sq,Skv)
        s = jnp.where(mask, jnp.float32(-1e10), s)
        s = s - jnp.max(s, axis=-1, keepdims=True)
        p = jnp.exp(s)
        p = p * pl.reciprocal(jnp.sum(p, axis=-1, keepdims=True), approx=True)
        oh = jnp.dot(p, vh, preferred_element_type=jnp.float32)        # (Sq,Dh)
        out = out + jnp.dot(oh, wo[lo:lo + D_HEAD, :],
                            preferred_element_type=jnp.float32)
    return out + bo


def _ffn(x, w1, b1, w2, b2):
    h = jnp.maximum(jnp.dot(x, w1, preferred_element_type=jnp.float32) + b1, 0.0)
    return jnp.dot(h, w2, preferred_element_type=jnp.float32) + b2


# ----------------------------- fully fused kernel ----------------------------
def transformer_kernel(xs_ref, xt_ref, srcpad_ref, trgpad_ref,
                       # encoder layer params (stacked over layers)
                       e_wqkv, e_bqkv, e_wo, e_bo, e_ln1g, e_ln1b,
                       e_w1, e_b1, e_w2, e_b2, e_ln2g, e_ln2b,
                       # decoder layer params
                       d_wqkv1, d_bqkv1, d_wo1, d_bo1, d_ln1g, d_ln1b,
                       d_wq2, d_bq2, d_wkv2, d_bkv2, d_wo2, d_bo2,
                       d_ln2g, d_ln2b,
                       d_w1, d_b1, d_w2, d_b2, d_ln3g, d_ln3b,
                       fcw, fcb,
                       logits_ref):
    xs = xs_ref[0]                               # (Ss, D)  encoder input emb
    xt = xt_ref[0]                               # (St, D)  decoder input emb
    St = xt.shape[0]

    # Masks built in-kernel from compact per-sequence pad flags + iota.
    enc_mask = srcpad_ref[0] > 0.5               # (1, Ss) True = masked column
    # TODO(synk): reference builds the future mask with leading dim = trg_len
    # (a broadcast bug that errors for batch != trg_len); we implement the
    # intended causal mask.
    row = jax.lax.broadcasted_iota(jnp.int32, (St, St), 0)
    col = jax.lax.broadcasted_iota(jnp.int32, (St, St), 1)
    dec_mask = jnp.logical_or(trgpad_ref[0] > 0.5, col > row)   # (St, St)
    ed_mask = enc_mask                                          # (1, Ss)

    # ----------------- encoder stack (stays in vregs/VMEM) ------------------
    x = xs
    for l in range(N_LAYERS):
        qkv = jnp.dot(x, e_wqkv[l], preferred_element_type=jnp.float32) + e_bqkv[l]
        attn = _attention(qkv[:, :D_MODEL], qkv[:, D_MODEL:2 * D_MODEL],
                          qkv[:, 2 * D_MODEL:], e_wo[l], e_bo[l], enc_mask)
        x = _add_layernorm(x, attn, e_ln1g[l], e_ln1b[l])
        ff = _ffn(x, e_w1[l], e_b1[l], e_w2[l], e_b2[l])
        x = _add_layernorm(x, ff, e_ln2g[l], e_ln2b[l])
    enc = x                                      # (Ss, D) never leaves VMEM

    # ----------------- decoder stack + final vocab projection ----------------
    y = xt
    for l in range(N_LAYERS):
        # masked self-attention
        qkv = jnp.dot(y, d_wqkv1[l], preferred_element_type=jnp.float32) + d_bqkv1[l]
        attn = _attention(qkv[:, :D_MODEL], qkv[:, D_MODEL:2 * D_MODEL],
                          qkv[:, 2 * D_MODEL:], d_wo1[l], d_bo1[l], dec_mask)
        y = _add_layernorm(y, attn, d_ln1g[l], d_ln1b[l])
        # encoder-decoder attention (KV projection fused into one matmul)
        q = jnp.dot(y, d_wq2[l], preferred_element_type=jnp.float32) + d_bq2[l]
        kv = jnp.dot(enc, d_wkv2[l], preferred_element_type=jnp.float32) + d_bkv2[l]
        attn = _attention(q, kv[:, :D_MODEL], kv[:, D_MODEL:],
                          d_wo2[l], d_bo2[l], ed_mask)
        y = _add_layernorm(y, attn, d_ln2g[l], d_ln2b[l])
        # feed-forward
        ff = _ffn(y, d_w1[l], d_b1[l], d_w2[l], d_b2[l])
        y = _add_layernorm(y, ff, d_ln3g[l], d_ln3b[l])

    # lane-dense (VOCAB_SIZE = 128) store — the only HBM write of the kernel
    logits_ref[0] = (jnp.dot(y, fcw[...], preferred_element_type=jnp.float32)
                     + fcb[...])


# ----------------------------- pallas_call wrapper ---------------------------
def _full_spec(a):
    n = a.ndim
    shape = a.shape

    def idx(b):
        return (0,) * n

    return pl.BlockSpec(shape, idx)


_ENC_PARAM_ORDER = ["wqkv", "bqkv", "wo", "bo", "ln1_g", "ln1_b",
                    "w1", "b1", "w2", "b2", "ln2_g", "ln2_b"]

_DEC_PARAM_ORDER = ["wqkv1", "bqkv1", "wo1", "bo1", "ln1_g", "ln1_b",
                    "wq2", "bq2", "wkv2", "bkv2", "wo2", "bo2", "ln2_g", "ln2_b",
                    "w1", "b1", "w2", "b2", "ln3_g", "ln3_b"]


def transformer_forward(src, trg, params):
    """Full Transformer forward. Returns logits (B, St, VOCAB_SIZE)."""
    B, Ss = src.shape
    St = trg.shape[1]
    # compact pad flags (B,1,S); full masks are expanded in-kernel, never in HBM
    src_pad = (src == PAD_IDX).astype(jnp.float32).reshape(B, 1, Ss)
    trg_pad = (trg == PAD_IDX).astype(jnp.float32).reshape(B, 1, St)

    # embedding gathers (plain-JAX glue)
    x_enc = (math.sqrt(D_MODEL) * params["tok_emb"][src]
             + params["enc_pos_emb"][:Ss][None])
    x_dec = params["tok_emb"][trg] + params["dec_pos_emb"][:St][None]

    p_args = ([params["enc"][k] for k in _ENC_PARAM_ORDER]
              + [params["dec"][k] for k in _DEC_PARAM_ORDER]
              + [params["fc_out_w"], params["fc_out_b"]])

    return pl.pallas_call(
        transformer_kernel,
        grid=(B,),
        in_specs=[pl.BlockSpec((1, Ss, D_MODEL), lambda b: (b, 0, 0)),
                  pl.BlockSpec((1, St, D_MODEL), lambda b: (b, 0, 0)),
                  pl.BlockSpec((1, 1, Ss), lambda b: (b, 0, 0)),
                  pl.BlockSpec((1, 1, St), lambda b: (b, 0, 0))]
                 + [_full_spec(a) for a in p_args],
        out_specs=pl.BlockSpec((1, St, VOCAB_SIZE), lambda b: (b, 0, 0)),
        out_shape=jax.ShapeDtypeStruct((B, St, VOCAB_SIZE), jnp.float32),
        compiler_params=pltpu.CompilerParams(
            dimension_semantics=("parallel",)),
    )(x_enc, x_dec, src_pad, trg_pad, *p_args)


# ----------------------------- parameter init -------------------------------
def xavier(key, shape):
    fan_in, fan_out = shape[0], shape[1]
    lim = math.sqrt(6.0 / (fan_in + fan_out))
    return jax.random.uniform(key, shape, jnp.float32, -lim, lim)


def init_encoder_params(key):
    layers = []
    for i in range(N_LAYERS):
        ks = jax.random.split(jax.random.fold_in(key, i), 6)
        wq, wk, wv, wo = (xavier(ks[j], (D_MODEL, D_MODEL)) for j in range(4))
        layers.append(dict(
            wqkv=jnp.concatenate([wq, wk, wv], axis=1),
            bqkv=jnp.zeros((1, 3 * D_MODEL), jnp.float32),
            wo=wo, bo=jnp.zeros((1, D_MODEL), jnp.float32),
            ln1_g=jnp.ones((1, D_MODEL), jnp.float32),
            ln1_b=jnp.zeros((1, D_MODEL), jnp.float32),
            w1=xavier(ks[4], (D_MODEL, D_FF)), b1=jnp.zeros((1, D_FF), jnp.float32),
            w2=xavier(ks[5], (D_FF, D_MODEL)), b2=jnp.zeros((1, D_MODEL), jnp.float32),
            ln2_g=jnp.ones((1, D_MODEL), jnp.float32),
            ln2_b=jnp.zeros((1, D_MODEL), jnp.float32),
        ))
    return {k: jnp.stack([lp[k] for lp in layers], axis=0) for k in layers[0]}


def init_decoder_params(key):
    layers = []
    for i in range(N_LAYERS):
        ks = jax.random.split(jax.random.fold_in(key, i), 10)
        wq1, wk1, wv1, wo1 = (xavier(ks[j], (D_MODEL, D_MODEL)) for j in range(4))
        wq2, wk2, wv2, wo2 = (xavier(ks[4 + j], (D_MODEL, D_MODEL)) for j in range(4))
        layers.append(dict(
            wqkv1=jnp.concatenate([wq1, wk1, wv1], axis=1),
            bqkv1=jnp.zeros((1, 3 * D_MODEL), jnp.float32),
            wo1=wo1, bo1=jnp.zeros((1, D_MODEL), jnp.float32),
            ln1_g=jnp.ones((1, D_MODEL), jnp.float32),
            ln1_b=jnp.zeros((1, D_MODEL), jnp.float32),
            wq2=wq2, bq2=jnp.zeros((1, D_MODEL), jnp.float32),
            wkv2=jnp.concatenate([wk2, wv2], axis=1),
            bkv2=jnp.zeros((1, 2 * D_MODEL), jnp.float32),
            wo2=wo2, bo2=jnp.zeros((1, D_MODEL), jnp.float32),
            ln2_g=jnp.ones((1, D_MODEL), jnp.float32),
            ln2_b=jnp.zeros((1, D_MODEL), jnp.float32),
            w1=xavier(ks[8], (D_MODEL, D_FF)), b1=jnp.zeros((1, D_FF), jnp.float32),
            w2=xavier(ks[9], (D_FF, D_MODEL)), b2=jnp.zeros((1, D_MODEL), jnp.float32),
            ln3_g=jnp.ones((1, D_MODEL), jnp.float32),
            ln3_b=jnp.zeros((1, D_MODEL), jnp.float32),
        ))
    return {k: jnp.stack([lp[k] for lp in layers], axis=0) for k in layers[0]}


def init_params(key):
    ks = jax.random.split(key, 6)
    return {
        "tok_emb": xavier(ks[0], (VOCAB_SIZE, D_MODEL)),
        "enc_pos_emb": xavier(ks[1], (MAX_LEN, D_MODEL)),
        "dec_pos_emb": xavier(ks[2], (MAX_LEN, D_MODEL)),
        "fc_out_w": xavier(ks[3], (D_MODEL, VOCAB_SIZE)),
        "fc_out_b": jnp.zeros((1, VOCAB_SIZE), jnp.float32),
        "enc": init_encoder_params(ks[4]),
        "dec": init_decoder_params(ks[5]),
    }


# ----------------------------- pure-JAX reference ----------------------------
def _ref_ln(x, g, b):
    mu = jnp.mean(x, -1, keepdims=True)
    var = jnp.mean((x - mu) ** 2, -1, keepdims=True)
    return (x - mu) / jnp.sqrt(var + LN_EPS) * g + b


def _ref_mha(q_in, k_in, v_in, wq, bq, wk, bk, wv, bv, wo, bo, mask):
    B, Sq, _ = q_in.shape
    Skv = k_in.shape[1]
    Q = (q_in @ wq + bq).reshape(B, Sq, N_HEADS, D_HEAD).transpose(0, 2, 1, 3)
    K = (k_in @ wk + bk).reshape(B, Skv, N_HEADS, D_HEAD).transpose(0, 2, 1, 3)
    V = (v_in @ wv + bv).reshape(B, Skv, N_HEADS, D_HEAD).transpose(0, 2, 1, 3)
    s = jnp.einsum("bhqd,bhkd->bhqk", Q, K) / math.sqrt(D_MODEL / N_HEADS)
    s = jnp.where(mask, -1e10, s)
    p = jax.nn.softmax(s, axis=-1)
    o = jnp.einsum("bhqk,bhkd->bhqd", p, V).transpose(0, 2, 1, 3).reshape(B, Sq, D_MODEL)
    return o @ wo + bo


def _ref_ffn(x, w1, b1, w2, b2):
    return jnp.maximum(x @ w1 + b1, 0.0) @ w2 + b2


def reference_forward(src, trg, params):
    B, Ss = src.shape
    St = trg.shape[1]
    ep, dp = params["enc"], params["dec"]
    D = D_MODEL
    enc_mask = (src == PAD_IDX)[:, None, None, :]
    ed_mask = enc_mask
    causal = jnp.triu(jnp.ones((St, St), dtype=bool), k=1)
    dec_mask = (trg == PAD_IDX)[:, None, None, :] | causal[None, None]

    x = math.sqrt(D) * params["tok_emb"][src] + params["enc_pos_emb"][:Ss][None]
    for l in range(N_LAYERS):
        w, b = ep["wqkv"][l], ep["bqkv"][l]
        a = _ref_mha(x, x, x, w[:, :D], b[:, :D], w[:, D:2 * D], b[:, D:2 * D],
                     w[:, 2 * D:], b[:, 2 * D:], ep["wo"][l], ep["bo"][l], enc_mask)
        x = _ref_ln(x + a, ep["ln1_g"][l], ep["ln1_b"][l])
        f = _ref_ffn(x, ep["w1"][l], ep["b1"][l], ep["w2"][l], ep["b2"][l])
        x = _ref_ln(x + f, ep["ln2_g"][l], ep["ln2_b"][l])
    enc_out = x

    y = params["tok_emb"][trg] + params["dec_pos_emb"][:St][None]
    for l in range(N_LAYERS):
        w, b = dp["wqkv1"][l], dp["bqkv1"][l]
        a = _ref_mha(y, y, y, w[:, :D], b[:, :D], w[:, D:2 * D], b[:, D:2 * D],
                     w[:, 2 * D:], b[:, 2 * D:], dp["wo1"][l], dp["bo1"][l], dec_mask)
        y = _ref_ln(y + a, dp["ln1_g"][l], dp["ln1_b"][l])
        w, b = dp["wkv2"][l], dp["bkv2"][l]
        a = _ref_mha(y, enc_out, enc_out, dp["wq2"][l], dp["bq2"][l],
                     w[:, :D], b[:, :D], w[:, D:], b[:, D:],
                     dp["wo2"][l], dp["bo2"][l], ed_mask)
        y = _ref_ln(y + a, dp["ln2_g"][l], dp["ln2_b"][l])
        f = _ref_ffn(y, dp["w1"][l], dp["b1"][l], dp["w2"][l], dp["b2"][l])
        y = _ref_ln(y + f, dp["ln3_g"][l], dp["ln3_b"][l])
    return y @ params["fc_out_w"] + params["fc_out_b"]


# ----------------------------- main ------------------------------------------
if __name__ == "__main__":
    key = jax.random.PRNGKey(0)
    kp, ks, kt = jax.random.split(key, 3)

    params = init_params(kp)

    B, S_SRC, S_TRG = 2, 8, 8
    src = jax.random.randint(ks, (B, S_SRC), 1, VOCAB_SIZE, dtype=jnp.int32)
    trg = jax.random.randint(kt, (B, S_TRG), 1, VOCAB_SIZE, dtype=jnp.int32)
    # add some padding tokens at the tail of each sequence
    src = src.at[0, 6:].set(PAD_IDX).at[1, 7:].set(PAD_IDX)
    trg = trg.at[0, 7:].set(PAD_IDX)

    fwd = jax.jit(transformer_forward)
    logits = jax.block_until_ready(fwd(src, trg, params))

    with jax.default_matmul_precision("highest"):
        ref = jax.block_until_ready(reference_forward(src, trg, params))

    err = float(jnp.max(jnp.abs(logits - ref)))
    assert logits.shape == (B, S_TRG, VOCAB_SIZE)
    assert bool(jnp.all(jnp.isfinite(logits)))
    assert err < 5e-2, f"kernel vs reference mismatch: max abs err = {err}"
    print("KERNEL_OK")
</pallas_src>

<mosaic_0001>
module attributes {stable_mosaic.version = 11 : i64} {
  func.func @transformer_kernel(%arg0: i32, %arg1: memref<1x8x32xf32, #tpu.memory_space<vmem>>, %arg2: memref<1x8x32xf32, #tpu.memory_space<vmem>>, %arg3: memref<1x1x8xf32, #tpu.memory_space<vmem>>, %arg4: memref<1x1x8xf32, #tpu.memory_space<vmem>>, %arg5: memref<2x32x96xf32, #tpu.memory_space<vmem>>, %arg6: memref<2x1x96xf32, #tpu.memory_space<vmem>>, %arg7: memref<2x32x32xf32, #tpu.memory_space<vmem>>, %arg8: memref<2x1x32xf32, #tpu.memory_space<vmem>>, %arg9: memref<2x1x32xf32, #tpu.memory_space<vmem>>, %arg10: memref<2x1x32xf32, #tpu.memory_space<vmem>>, %arg11: memref<2x32x64xf32, #tpu.memory_space<vmem>>, %arg12: memref<2x1x64xf32, #tpu.memory_space<vmem>>, %arg13: memref<2x64x32xf32, #tpu.memory_space<vmem>>, %arg14: memref<2x1x32xf32, #tpu.memory_space<vmem>>, %arg15: memref<2x1x32xf32, #tpu.memory_space<vmem>>, %arg16: memref<2x1x32xf32, #tpu.memory_space<vmem>>, %arg17: memref<2x32x96xf32, #tpu.memory_space<vmem>>, %arg18: memref<2x1x96xf32, #tpu.memory_space<vmem>>, %arg19: memref<2x32x32xf32, #tpu.memory_space<vmem>>, %arg20: memref<2x1x32xf32, #tpu.memory_space<vmem>>, %arg21: memref<2x1x32xf32, #tpu.memory_space<vmem>>, %arg22: memref<2x1x32xf32, #tpu.memory_space<vmem>>, %arg23: memref<2x32x32xf32, #tpu.memory_space<vmem>>, %arg24: memref<2x1x32xf32, #tpu.memory_space<vmem>>, %arg25: memref<2x32x64xf32, #tpu.memory_space<vmem>>, %arg26: memref<2x1x64xf32, #tpu.memory_space<vmem>>, %arg27: memref<2x32x32xf32, #tpu.memory_space<vmem>>, %arg28: memref<2x1x32xf32, #tpu.memory_space<vmem>>, %arg29: memref<2x1x32xf32, #tpu.memory_space<vmem>>, %arg30: memref<2x1x32xf32, #tpu.memory_space<vmem>>, %arg31: memref<2x32x64xf32, #tpu.memory_space<vmem>>, %arg32: memref<2x1x64xf32, #tpu.memory_space<vmem>>, %arg33: memref<2x64x32xf32, #tpu.memory_space<vmem>>, %arg34: memref<2x1x32xf32, #tpu.memory_space<vmem>>, %arg35: memref<2x1x32xf32, #tpu.memory_space<vmem>>, %arg36: memref<2x1x32xf32, #tpu.memory_space<vmem>>, %arg37: memref<32x128xf32, #tpu.memory_space<vmem>>, %arg38: memref<1x128xf32, #tpu.memory_space<vmem>>, %arg39: memref<1x8x128xf32, #tpu.memory_space<vmem>>) attributes {dimension_semantics = [#tpu.dimension_semantics<parallel>], iteration_bounds = array<i64: 2>, scalar_prefetch = 0 : i64, scratch_operands = 0 : i64, tpu.core_type = #tpu.core_type<tc>, window_params = [{transform_indices = @transform_0, window_bounds = array<i64: 1, 8, 32>}, {transform_indices = @transform_1, window_bounds = array<i64: 1, 8, 32>}, {transform_indices = @transform_2, window_bounds = array<i64: 1, 1, 8>}, {transform_indices = @transform_3, window_bounds = array<i64: 1, 1, 8>}, {pipeline_mode = #tpu.pipeline_mode<synchronous>, transform_indices = @transform_4, window_bounds = array<i64: 2, 32, 96>}, {pipeline_mode = #tpu.pipeline_mode<synchronous>, transform_indices = @transform_5, window_bounds = array<i64: 2, 1, 96>}, {pipeline_mode = #tpu.pipeline_mode<synchronous>, transform_indices = @transform_6, window_bounds = array<i64: 2, 32, 32>}, {pipeline_mode = #tpu.pipeline_mode<synchronous>, transform_indices = @transform_7, window_bounds = array<i64: 2, 1, 32>}, {pipeline_mode = #tpu.pipeline_mode<synchronous>, transform_indices = @transform_8, window_bounds = array<i64: 2, 1, 32>}, {pipeline_mode = #tpu.pipeline_mode<synchronous>, transform_indices = @transform_9, window_bounds = array<i64: 2, 1, 32>}, {pipeline_mode = #tpu.pipeline_mode<synchronous>, transform_indices = @transform_10, window_bounds = array<i64: 2, 32, 64>}, {pipeline_mode = #tpu.pipeline_mode<synchronous>, transform_indices = @transform_11, window_bounds = array<i64: 2, 1, 64>}, {pipeline_mode = #tpu.pipeline_mode<synchronous>, transform_indices = @transform_12, window_bounds = array<i64: 2, 64, 32>}, {pipeline_mode = #tpu.pipeline_mode<synchronous>, transform_indices = @transform_13, window_bounds = array<i64: 2, 1, 32>}, {pipeline_mode = #tpu.pipeline_mode<synchronous>, transform_indices = @transform_14, window_bounds = array<i64: 2, 1, 32>}, {pipeline_mode = #tpu.pipeline_mode<synchronous>, transform_indices = @transform_15, window_bounds = array<i64: 2, 1, 32>}, {pipeline_mode = #tpu.pipeline_mode<synchronous>, transform_indices = @transform_16, window_bounds = array<i64: 2, 32, 96>}, {pipeline_mode = #tpu.pipeline_mode<synchronous>, transform_indices = @transform_17, window_bounds = array<i64: 2, 1, 96>}, {pipeline_mode = #tpu.pipeline_mode<synchronous>, transform_indices = @transform_18, window_bounds = array<i64: 2, 32, 32>}, {pipeline_mode = #tpu.pipeline_mode<synchronous>, transform_indices = @transform_19, window_bounds = array<i64: 2, 1, 32>}, {pipeline_mode = #tpu.pipeline_mode<synchronous>, transform_indices = @transform_20, window_bounds = array<i64: 2, 1, 32>}, {pipeline_mode = #tpu.pipeline_mode<synchronous>, transform_indices = @transform_21, window_bounds = array<i64: 2, 1, 32>}, {pipeline_mode = #tpu.pipeline_mode<synchronous>, transform_indices = @transform_22, window_bounds = array<i64: 2, 32, 32>}, {pipeline_mode = #tpu.pipeline_mode<synchronous>, transform_indices = @transform_23, window_bounds = array<i64: 2, 1, 32>}, {pipeline_mode = #tpu.pipeline_mode<synchronous>, transform_indices = @transform_24, window_bounds = array<i64: 2, 32, 64>}, {pipeline_mode = #tpu.pipeline_mode<synchronous>, transform_indices = @transform_25, window_bounds = array<i64: 2, 1, 64>}, {pipeline_mode = #tpu.pipeline_mode<synchronous>, transform_indices = @transform_26, window_bounds = array<i64: 2, 32, 32>}, {pipeline_mode = #tpu.pipeline_mode<synchronous>, transform_indices = @transform_27, window_bounds = array<i64: 2, 1, 32>}, {pipeline_mode = #tpu.pipeline_mode<synchronous>, transform_indices = @transform_28, window_bounds = array<i64: 2, 1, 32>}, {pipeline_mode = #tpu.pipeline_mode<synchronous>, transform_indices = @transform_29, window_bounds = array<i64: 2, 1, 32>}, {pipeline_mode = #tpu.pipeline_mode<synchronous>, transform_indices = @transform_30, window_bounds = array<i64: 2, 32, 64>}, {pipeline_mode = #tpu.pipeline_mode<synchronous>, transform_indices = @transform_31, window_bounds = array<i64: 2, 1, 64>}, {pipeline_mode = #tpu.pipeline_mode<synchronous>, transform_indices = @transform_32, window_bounds = array<i64: 2, 64, 32>}, {pipeline_mode = #tpu.pipeline_mode<synchronous>, transform_indices = @transform_33, window_bounds = array<i64: 2, 1, 32>}, {pipeline_mode = #tpu.pipeline_mode<synchronous>, transform_indices = @transform_34, window_bounds = array<i64: 2, 1, 32>}, {pipeline_mode = #tpu.pipeline_mode<synchronous>, transform_indices = @transform_35, window_bounds = array<i64: 2, 1, 32>}, {pipeline_mode = #tpu.pipeline_mode<synchronous>, transform_indices = @transform_36, window_bounds = array<i64: 32, 128>}, {pipeline_mode = #tpu.pipeline_mode<synchronous>, transform_indices = @transform_37, window_bounds = array<i64: 1, 128>}, {transform_indices = @transform_38, window_bounds = array<i64: 1, 8, 128>}]} {
    %c0 = arith.constant 0 : index
    %c0_0 = arith.constant 0 : index
    %c0_1 = arith.constant 0 : index
    %0 = vector.load %arg1[%c0, %c0_0, %c0_1] : memref<1x8x32xf32, #tpu.memory_space<vmem>>, vector<1x8x32xf32>
    %1 = vector.shape_cast %0 : vector<1x8x32xf32> to vector<8x32xf32>
    %c0_2 = arith.constant 0 : index
    %c0_3 = arith.constant 0 : index
    %c0_4 = arith.constant 0 : index
    %2 = vector.load %arg2[%c0_2, %c0_3, %c0_4] : memref<1x8x32xf32, #tpu.memory_space<vmem>>, vector<1x8x32xf32>
    %3 = vector.shape_cast %2 : vector<1x8x32xf32> to vector<8x32xf32>
    %c0_5 = arith.constant 0 : index
    %c0_6 = arith.constant 0 : index
    %c0_7 = arith.constant 0 : index
    %4 = vector.load %arg3[%c0_5, %c0_6, %c0_7] : memref<1x1x8xf32, #tpu.memory_space<vmem>>, vector<1x1x8xf32>
    %5 = vector.shape_cast %4 : vector<1x1x8xf32> to vector<1x8xf32>
    %cst = arith.constant 5.000000e-01 : f32
    %6 = vector.broadcast %cst : f32 to vector<1x8xf32>
    %7 = arith.cmpf ogt, %5, %6 : vector<1x8xf32>
    %8 = tpu.iota {dimensions = array<i32: 0>} : vector<8x8xi32>
    %9 = tpu.iota {dimensions = array<i32: 1>} : vector<8x8xi32>
    %c0_8 = arith.constant 0 : index
    %c0_9 = arith.constant 0 : index
    %c0_10 = arith.constant 0 : index
    %10 = vector.load %arg4[%c0_8, %c0_9, %c0_10] : memref<1x1x8xf32, #tpu.memory_space<vmem>>, vector<1x1x8xf32>
    %11 = vector.shape_cast %10 : vector<1x1x8xf32> to vector<1x8xf32>
    %cst_11 = arith.constant 5.000000e-01 : f32
    %12 = vector.broadcast %cst_11 : f32 to vector<1x8xf32>
    %13 = arith.cmpf ogt, %11, %12 : vector<1x8xf32>
    %14 = arith.cmpi sgt, %9, %8 : vector<8x8xi32>
    %15 = vector.broadcast %13 : vector<1x8xi1> to vector<8x8xi1>
    %16 = arith.ori %15, %14 : vector<8x8xi1>
    %c0_12 = arith.constant 0 : index
    %c0_13 = arith.constant 0 : index
    %c0_14 = arith.constant 0 : index
    %17 = vector.load %arg5[%c0_12, %c0_13, %c0_14] : memref<2x32x96xf32, #tpu.memory_space<vmem>>, vector<1x32x96xf32>
    %18 = vector.shape_cast %17 : vector<1x32x96xf32> to vector<32x96xf32>
    %cst_15 = arith.constant dense<0.000000e+00> : vector<8x96xf32>
    %19 = tpu.matmul %1, %18, %cst_15 {dimension_numbers = #tpu.dot_dimension_numbers<[1], [0], [0], [1], [0, 0, 1, 1], [], []>} : vector<8x32xf32>, vector<32x96xf32>, vector<8x96xf32> -> vector<8x96xf32>
    %c0_16 = arith.constant 0 : index
    %c0_17 = arith.constant 0 : index
    %c0_18 = arith.constant 0 : index
    %20 = vector.load %arg6[%c0_16, %c0_17, %c0_18] : memref<2x1x96xf32, #tpu.memory_space<vmem>>, vector<1x1x96xf32>
    %21 = vector.shape_cast %20 : vector<1x1x96xf32> to vector<1x96xf32>
    %22 = vector.broadcast %21 : vector<1x96xf32> to vector<8x96xf32>
    %23 = arith.addf %19, %22 : vector<8x96xf32>
    %24 = vector.extract_strided_slice %23 {offsets = [0, 0], sizes = [8, 32], strides = [1, 1]} : vector<8x96xf32> to vector<8x32xf32>
    %25 = vector.extract_strided_slice %23 {offsets = [0, 32], sizes = [8, 32], strides = [1, 1]} : vector<8x96xf32> to vector<8x32xf32>
    %26 = vector.extract_strided_slice %23 {offsets = [0, 64], sizes = [8, 32], strides = [1, 1]} : vector<8x96xf32> to vector<8x32xf32>
    %c0_19 = arith.constant 0 : index
    %c0_20 = arith.constant 0 : index
    %c0_21 = arith.constant 0 : index
    %27 = vector.load %arg7[%c0_19, %c0_20, %c0_21] : memref<2x32x32xf32, #tpu.memory_space<vmem>>, vector<1x32x32xf32>
    %28 = vector.shape_cast %27 : vector<1x32x32xf32> to vector<32x32xf32>
    %c0_22 = arith.constant 0 : index
    %c0_23 = arith.constant 0 : index
    %c0_24 = arith.constant 0 : index
    %29 = vector.load %arg8[%c0_22, %c0_23, %c0_24] : memref<2x1x32xf32, #tpu.memory_space<vmem>>, vector<1x1x32xf32>
    %30 = vector.shape_cast %29 : vector<1x1x32xf32> to vector<1x32xf32>
    %cst_25 = arith.constant 0.000000e+00 : f32
    %31 = vector.broadcast %cst_25 : f32 to vector<8x32xf32>
    %32 = vector.extract_strided_slice %24 {offsets = [0, 0], sizes = [8, 8], strides = [1, 1]} : vector<8x32xf32> to vector<8x8xf32>
    %cst_26 = arith.constant 0.353553385 : f32
    %33 = vector.broadcast %cst_26 : f32 to vector<8x8xf32>
    %34 = arith.mulf %32, %33 : vector<8x8xf32>
    %35 = vector.extract_strided_slice %25 {offsets = [0, 0], sizes = [8, 8], strides = [1, 1]} : vector<8x32xf32> to vector<8x8xf32>
    %36 = vector.extract_strided_slice %26 {offsets = [0, 0], sizes = [8, 8], strides = [1, 1]} : vector<8x32xf32> to vector<8x8xf32>
    %37 = tpu.transpose %35, [1, 0] : vector<8x8xf32> -> vector<8x8xf32>
    %cst_27 = arith.constant dense<0.000000e+00> : vector<8x8xf32>
    %38 = tpu.matmul %34, %37, %cst_27 {dimension_numbers = #tpu.dot_dimension_numbers<[1], [0], [0], [1], [0, 0, 1, 1], [], []>} : vector<8x8xf32>, vector<8x8xf32>, vector<8x8xf32> -> vector<8x8xf32>
    %cst_28 = arith.constant -1.000000e+10 : f32
    %39 = vector.shape_cast %7 : vector<1x8xi1> to vector<1x8xi1>
    %40 = vector.broadcast %39 : vector<1x8xi1> to vector<8x8xi1>
    %41 = vector.broadcast %cst_28 : f32 to vector<8x8xf32>
    %42 = arith.select %40, %41, %38 : vector<8x8xi1>, vector<8x8xf32>
    %cst_29 = arith.constant dense<0xFF800000> : vector<8xf32>
    %43 = vector.multi_reduction <maximumf>, %42, %cst_29 [1] : vector<8x8xf32> to vector<8xf32>
    %44 = vector.shape_cast %43 : vector<8xf32> to vector<8x1xf32>
    %45 = vector.broadcast %44 : vector<8x1xf32> to vector<8x8xf32>
    %46 = arith.subf %42, %45 : vector<8x8xf32>
    %47 = math.exp %46 : vector<8x8xf32>
    %cst_30 = arith.constant dense<0.000000e+00> : vector<8xf32>
    %48 = vector.multi_reduction <add>, %47, %cst_30 [1] : vector<8x8xf32> to vector<8xf32>
    %49 = vector.shape_cast %48 : vector<8xf32> to vector<8x1xf32>
    %50 = tpu.reciprocal %49 {approx = true} : vector<8x1xf32> -> vector<8x1xf32>
    %51 = vector.broadcast %50 : vector<8x1xf32> to vector<8x8xf32>
    %52 = arith.mulf %47, %51 : vector<8x8xf32>
    %cst_31 = arith.constant dense<0.000000e+00> : vector<8x8xf32>
    %53 = tpu.matmul %52, %36, %cst_31 {dimension_numbers = #tpu.dot_dimension_numbers<[1], [0], [0], [1], [0, 0, 1, 1], [], []>} : vector<8x8xf32>, vector<8x8xf32>, vector<8x8xf32> -> vector<8x8xf32>
    %54 = vector.extract_strided_slice %28 {offsets = [0, 0], sizes = [8, 32], strides = [1, 1]} : vector<32x32xf32> to vector<8x32xf32>
    %cst_32 = arith.constant dense<0.000000e+00> : vector<8x32xf32>
    %55 = tpu.matmul %53, %54, %cst_32 {dimension_numbers = #tpu.dot_dimension_numbers<[1], [0], [0], [1], [0, 0, 1, 1], [], []>} : vector<8x8xf32>, vector<8x32xf32>, vector<8x32xf32> -> vector<8x32xf32>
    %56 = arith.addf %31, %55 : vector<8x32xf32>
    %57 = vector.extract_strided_slice %24 {offsets = [0, 8], sizes = [8, 8], strides = [1, 1]} : vector<8x32xf32> to vector<8x8xf32>
    %cst_33 = arith.constant 0.353553385 : f32
    %58 = vector.broadcast %cst_33 : f32 to vector<8x8xf32>
    %59 = arith.mulf %57, %58 : vector<8x8xf32>
    %60 = vector.extract_strided_slice %25 {offsets = [0, 8], sizes = [8, 8], strides = [1, 1]} : vector<8x32xf32> to vector<8x8xf32>
    %61 = vector.extract_strided_slice %26 {offsets = [0, 8], sizes = [8, 8], strides = [1, 1]} : vector<8x32xf32> to vector<8x8xf32>
    %62 = tpu.transpose %60, [1, 0] : vector<8x8xf32> -> vector<8x8xf32>
    %cst_34 = arith.constant dense<0.000000e+00> : vector<8x8xf32>
    %63 = tpu.matmul %59, %62, %cst_34 {dimension_numbers = #tpu.dot_dimension_numbers<[1], [0], [0], [1], [0, 0, 1, 1], [], []>} : vector<8x8xf32>, vector<8x8xf32>, vector<8x8xf32> -> vector<8x8xf32>
    %cst_35 = arith.constant -1.000000e+10 : f32
    %64 = vector.shape_cast %7 : vector<1x8xi1> to vector<1x8xi1>
    %65 = vector.broadcast %64 : vector<1x8xi1> to vector<8x8xi1>
    %66 = vector.broadcast %cst_35 : f32 to vector<8x8xf32>
    %67 = arith.select %65, %66, %63 : vector<8x8xi1>, vector<8x8xf32>
    %cst_36 = arith.constant dense<0xFF800000> : vector<8xf32>
    %68 = vector.multi_reduction <maximumf>, %67, %cst_36 [1] : vector<8x8xf32> to vector<8xf32>
    %69 = vector.shape_cast %68 : vector<8xf32> to vector<8x1xf32>
    %70 = vector.broadcast %69 : vector<8x1xf32> to vector<8x8xf32>
    %71 = arith.subf %67, %70 : vector<8x8xf32>
    %72 = math.exp %71 : vector<8x8xf32>
    %cst_37 = arith.constant dense<0.000000e+00> : vector<8xf32>
    %73 = vector.multi_reduction <add>, %72, %cst_37 [1] : vector<8x8xf32> to vector<8xf32>
    %74 = vector.shape_cast %73 : vector<8xf32> to vector<8x1xf32>
    %75 = tpu.reciprocal %74 {approx = true} : vector<8x1xf32> -> vector<8x1xf32>
    %76 = vector.broadcast %75 : vector<8x1xf32> to vector<8x8xf32>
    %77 = arith.mulf %72, %76 : vector<8x8xf32>
    %cst_38 = arith.constant dense<0.000000e+00> : vector<8x8xf32>
    %78 = tpu.matmul %77, %61, %cst_38 {dimension_numbers = #tpu.dot_dimension_numbers<[1], [0], [0], [1], [0, 0, 1, 1], [], []>} : vector<8x8xf32>, vector<8x8xf32>, vector<8x8xf32> -> vector<8x8xf32>
    %79 = vector.extract_strided_slice %28 {offsets = [8, 0], sizes = [8, 32], strides = [1, 1]} : vector<32x32xf32> to vector<8x32xf32>
    %cst_39 = arith.constant dense<0.000000e+00> : vector<8x32xf32>
    %80 = tpu.matmul %78, %79, %cst_39 {dimension_numbers = #tpu.dot_dimension_numbers<[1], [0], [0], [1], [0, 0, 1, 1], [], []>} : vector<8x8xf32>, vector<8x32xf32>, vector<8x32xf32> -> vector<8x32xf32>
    %81 = arith.addf %56, %80 : vector<8x32xf32>
    %82 = vector.extract_strided_slice %24 {offsets = [0, 16], sizes = [8, 8], strides = [1, 1]} : vector<8x32xf32> to vector<8x8xf32>
    %cst_40 = arith.constant 0.353553385 : f32
    %83 = vector.broadcast %cst_40 : f32 to vector<8x8xf32>
    %84 = arith.mulf %82, %83 : vector<8x8xf32>
    %85 = vector.extract_strided_slice %25 {offsets = [0, 16], sizes = [8, 8], strides = [1, 1]} : vector<8x32xf32> to vector<8x8xf32>
    %86 = vector.extract_strided_slice %26 {offsets = [0, 16], sizes = [8, 8], strides = [1, 1]} : vector<8x32xf32> to vector<8x8xf32>
    %87 = tpu.transpose %85, [1, 0] : vector<8x8xf32> -> vector<8x8xf32>
    %cst_41 = arith.constant dense<0.000000e+00> : vector<8x8xf32>
    %88 = tpu.matmul %84, %87, %cst_41 {dimension_numbers = #tpu.dot_dimension_numbers<[1], [0], [0], [1], [0, 0, 1, 1], [], []>} : vector<8x8xf32>, vector<8x8xf32>, vector<8x8xf32> -> vector<8x8xf32>
    %cst_42 = arith.constant -1.000000e+10 : f32
    %89 = vector.shape_cast %7 : vector<1x8xi1> to vector<1x8xi1>
    %90 = vector.broadcast %89 : vector<1x8xi1> to vector<8x8xi1>
    %91 = vector.broadcast %cst_42 : f32 to vector<8x8xf32>
    %92 = arith.select %90, %91, %88 : vector<8x8xi1>, vector<8x8xf32>
    %cst_43 = arith.constant dense<0xFF800000> : vector<8xf32>
    %93 = vector.multi_reduction <maximumf>, %92, %cst_43 [1] : vector<8x8xf32> to vector<8xf32>
    %94 = vector.shape_cast %93 : vector<8xf32> to vector<8x1xf32>
    %95 = vector.broadcast %94 : vector<8x1xf32> to vector<8x8xf32>
    %96 = arith.subf %92, %95 : vector<8x8xf32>
    %97 = math.exp %96 : vector<8x8xf32>
    %cst_44 = arith.constant dense<0.000000e+00> : vector<8xf32>
    %98 = vector.multi_reduction <add>, %97, %cst_44 [1] : vector<8x8xf32> to vector<8xf32>
    %99 = vector.shape_cast %98 : vector<8xf32> to vector<8x1xf32>
    %100 = tpu.reciprocal %99 {approx = true} : vector<8x1xf32> -> vector<8x1xf32>
    %101 = vector.broadcast %100 : vector<8x1xf32> to vector<8x8xf32>
    %102 = arith.mulf %97, %101 : vector<8x8xf32>
    %cst_45 = arith.constant dense<0.000000e+00> : vector<8x8xf32>
    %103 = tpu.matmul %102, %86, %cst_45 {dimension_numbers = #tpu.dot_dimension_numbers<[1], [0], [0], [1], [0, 0, 1, 1], [], []>} : vector<8x8xf32>, vector<8x8xf32>, vector<8x8xf32> -> vector<8x8xf32>
    %104 = vector.extract_strided_slice %28 {offsets = [16, 0], sizes = [8, 32], strides = [1, 1]} : vector<32x32xf32> to vector<8x32xf32>
    %cst_46 = arith.constant dense<0.000000e+00> : vector<8x32xf32>
    %105 = tpu.matmul %103, %104, %cst_46 {dimension_numbers = #tpu.dot_dimension_numbers<[1], [0], [0], [1], [0, 0, 1, 1], [], []>} : vector<8x8xf32>, vector<8x32xf32>, vector<8x32xf32> -> vector<8x32xf32>
    %106 = arith.addf %81, %105 : vector<8x32xf32>
    %107 = vector.extract_strided_slice %24 {offsets = [0, 24], sizes = [8, 8], strides = [1, 1]} : vector<8x32xf32> to vector<8x8xf32>
    %cst_47 = arith.constant 0.353553385 : f32
    %108 = vector.broadcast %cst_47 : f32 to vector<8x8xf32>
    %109 = arith.mulf %107, %108 : vector<8x8xf32>
    %110 = vector.extract_strided_slice %25 {offsets = [0, 24], sizes = [8, 8], strides = [1, 1]} : vector<8x32xf32> to vector<8x8xf32>
    %111 = vector.extract_strided_slice %26 {offsets = [0, 24], sizes = [8, 8], strides = [1, 1]} : vector<8x32xf32> to vector<8x8xf32>
    %112 = tpu.transpose %110, [1, 0] : vector<8x8xf32> -> vector<8x8xf32>
    %cst_48 = arith.constant dense<0.000000e+00> : vector<8x8xf32>
    %113 = tpu.matmul %109, %112, %cst_48 {dimension_numbers = #tpu.dot_dimension_numbers<[1], [0], [0], [1], [0, 0, 1, 1], [], []>} : vector<8x8xf32>, vector<8x8xf32>, vector<8x8xf32> -> vector<8x8xf32>
    %cst_49 = arith.constant -1.000000e+10 : f32
    %114 = vector.shape_cast %7 : vector<1x8xi1> to vector<1x8xi1>
    %115 = vector.broadcast %114 : vector<1x8xi1> to vector<8x8xi1>
    %116 = vector.broadcast %cst_49 : f32 to vector<8x8xf32>
    %117 = arith.select %115, %116, %113 : vector<8x8xi1>, vector<8x8xf32>
    %cst_50 = arith.constant dense<0xFF800000> : vector<8xf32>
    %118 = vector.multi_reduction <maximumf>, %117, %cst_50 [1] : vector<8x8xf32> to vector<8xf32>
    %119 = vector.shape_cast %118 : vector<8xf32> to vector<8x1xf32>
    %120 = vector.broadcast %119 : vector<8x1xf32> to vector<8x8xf32>
    %121 = arith.subf %117, %120 : vector<8x8xf32>
    %122 = math.exp %121 : vector<8x8xf32>
    %cst_51 = arith.constant dense<0.000000e+00> : vector<8xf32>
    %123 = vector.multi_reduction <add>, %122, %cst_51 [1] : vector<8x8xf32> to vector<8xf32>
    %124 = vector.shape_cast %123 : vector<8xf32> to vector<8x1xf32>
    %125 = tpu.reciprocal %124 {approx = true} : vector<8x1xf32> -> vector<8x1xf32>
    %126 = vector.broadcast %125 : vector<8x1xf32> to vector<8x8xf32>
    %127 = arith.mulf %122, %126 : vector<8x8xf32>
    %cst_52 = arith.constant dense<0.000000e+00> : vector<8x8xf32>
    %128 = tpu.matmul %127, %111, %cst_52 {dimension_numbers = #tpu.dot_dimension_numbers<[1], [0], [0], [1], [0, 0, 1, 1], [], []>} : vector<8x8xf32>, vector<8x8xf32>, vector<8x8xf32> -> vector<8x8xf32>
    %129 = vector.extract_strided_slice %28 {offsets = [24, 0], sizes = [8, 32], strides = [1, 1]} : vector<32x32xf32> to vector<8x32xf32>
    %cst_53 = arith.constant dense<0.000000e+00> : vector<8x32xf32>
    %130 = tpu.matmul %128, %129, %cst_53 {dimension_numbers = #tpu.dot_dimension_numbers<[1], [0], [0], [1], [0, 0, 1, 1], [], []>} : vector<8x8xf32>, vector<8x32xf32>, vector<8x32xf32> -> vector<8x32xf32>
    %131 = arith.addf %106, %130 : vector<8x32xf32>
    %132 = vector.broadcast %30 : vector<1x32xf32> to vector<8x32xf32>
    %133 = arith.addf %131, %132 : vector<8x32xf32>
    %c0_54 = arith.constant 0 : index
    %c0_55 = arith.constant 0 : index
    %c0_56 = arith.constant 0 : index
    %134 = vector.load %arg9[%c0_54, %c0_55, %c0_56] : memref<2x1x32xf32, #tpu.memory_space<vmem>>, vector<1x1x32xf32>
    %135 = vector.shape_cast %134 : vector<1x1x32xf32> to vector<1x32xf32>
    %c0_57 = arith.constant 0 : index
    %c0_58 = arith.constant 0 : index
    %c0_59 = arith.constant 0 : index
    %136 = vector.load %arg10[%c0_57, %c0_58, %c0_59] : memref<2x1x32xf32, #tpu.memory_space<vmem>>, vector<1x1x32xf32>
    %137 = vector.shape_cast %136 : vector<1x1x32xf32> to vector<1x32xf32>
    %138 = arith.addf %1, %133 : vector<8x32xf32>
    %cst_60 = arith.constant dense<0.000000e+00> : vector<8xf32>
    %139 = vector.multi_reduction <add>, %138, %cst_60 [1] : vector<8x32xf32> to vector<8xf32>
    %140 = vector.shape_cast %139 : vector<8xf32> to vector<8x1xf32>
    %cst_61 = arith.constant 3.200000e+01 : f32
    %141 = vector.broadcast %cst_61 : f32 to vector<8x1xf32>
    %142 = arith.divf %140, %141 : vector<8x1xf32>
    %143 = vector.broadcast %142 : vector<8x1xf32> to vector<8x32xf32>
    %144 = arith.subf %138, %143 : vector<8x32xf32>
    %145 = vector.broadcast %142 : vector<8x1xf32> to vector<8x32xf32>
    %146 = arith.subf %138, %145 : vector<8x32xf32>
    %147 = arith.mulf %144, %146 : vector<8x32xf32>
    %cst_62 = arith.constant dense<0.000000e+00> : vector<8xf32>
    %148 = vector.multi_reduction <add>, %147, %cst_62 [1] : vector<8x32xf32> to vector<8xf32>
    %149 = vector.shape_cast %148 : vector<8xf32> to vector<8x1xf32>
    %cst_63 = arith.constant 3.200000e+01 : f32
    %150 = vector.broadcast %cst_63 : f32 to vector<8x1xf32>
    %151 = arith.divf %149, %150 : vector<8x1xf32>
    %152 = vector.broadcast %142 : vector<8x1xf32> to vector<8x32xf32>
    %153 = arith.subf %138, %152 : vector<8x32xf32>
    %cst_64 = arith.constant 9.99999974E-6 : f32
    %154 = vector.broadcast %cst_64 : f32 to vector<8x1xf32>
    %155 = arith.addf %151, %154 : vector<8x1xf32>
    %156 = math.rsqrt %155 : vector<8x1xf32>
    %157 = vector.broadcast %156 : vector<8x1xf32> to vector<8x32xf32>
    %158 = arith.mulf %153, %157 : vector<8x32xf32>
    %159 = vector.broadcast %135 : vector<1x32xf32> to vector<8x32xf32>
    %160 = arith.mulf %158, %159 : vector<8x32xf32>
    %161 = vector.broadcast %137 : vector<1x32xf32> to vector<8x32xf32>
    %162 = arith.addf %160, %161 : vector<8x32xf32>
    %c0_65 = arith.constant 0 : index
    %c0_66 = arith.constant 0 : index
    %c0_67 = arith.constant 0 : index
    %163 = vector.load %arg11[%c0_65, %c0_66, %c0_67] : memref<2x32x64xf32, #tpu.memory_space<vmem>>, vector<1x32x64xf32>
    %164 = vector.shape_cast %163 : vector<1x32x64xf32> to vector<32x64xf32>
    %c0_68 = arith.constant 0 : index
    %c0_69 = arith.constant 0 : index
    %c0_70 = arith.constant 0 : index
    %165 = vector.load %arg12[%c0_68, %c0_69, %c0_70] : memref<2x1x64xf32, #tpu.memory_space<vmem>>, vector<1x1x64xf32>
    %166 = vector.shape_cast %165 : vector<1x1x64xf32> to vector<1x64xf32>
    %c0_71 = arith.constant 0 : index
    %c0_72 = arith.constant 0 : index
    %c0_73 = arith.constant 0 : index
    %167 = vector.load %arg13[%c0_71, %c0_72, %c0_73] : memref<2x64x32xf32, #tpu.memory_space<vmem>>, vector<1x64x32xf32>
    %168 = vector.shape_cast %167 : vector<1x64x32xf32> to vector<64x32xf32>
    %c0_74 = arith.constant 0 : index
    %c0_75 = arith.constant 0 : index
    %c0_76 = arith.constant 0 : index
    %169 = vector.load %arg14[%c0_74, %c0_75, %c0_76] : memref<2x1x32xf32, #tpu.memory_space<vmem>>, vector<1x1x32xf32>
    %170 = vector.shape_cast %169 : vector<1x1x32xf32> to vector<1x32xf32>
    %cst_77 = arith.constant dense<0.000000e+00> : vector<8x64xf32>
    %171 = tpu.matmul %162, %164, %cst_77 {dimension_numbers = #tpu.dot_dimension_numbers<[1], [0], [0], [1], [0, 0, 1, 1], [], []>} : vector<8x32xf32>, vector<32x64xf32>, vector<8x64xf32> -> vector<8x64xf32>
    %172 = vector.broadcast %166 : vector<1x64xf32> to vector<8x64xf32>
    %173 = arith.addf %171, %172 : vector<8x64xf32>
    %cst_78 = arith.constant 0.000000e+00 : f32
    %174 = vector.broadcast %cst_78 : f32 to vector<8x64xf32>
    %175 = arith.maximumf %173, %174 : vector<8x64xf32>
    %cst_79 = arith.constant dense<0.000000e+00> : vector<8x32xf32>
    %176 = tpu.matmul %175, %168, %cst_79 {dimension_numbers = #tpu.dot_dimension_numbers<[1], [0], [0], [1], [0, 0, 1, 1], [], []>} : vector<8x64xf32>, vector<64x32xf32>, vector<8x32xf32> -> vector<8x32xf32>
    %177 = vector.broadcast %170 : vector<1x32xf32> to vector<8x32xf32>
    %178 = arith.addf %176, %177 : vector<8x32xf32>
    %c0_80 = arith.constant 0 : index
    %c0_81 = arith.constant 0 : index
    %c0_82 = arith.constant 0 : index
    %179 = vector.load %arg15[%c0_80, %c0_81, %c0_82] : memref<2x1x32xf32, #tpu.memory_space<vmem>>, vector<1x1x32xf32>
    %180 = vector.shape_cast %179 : vector<1x1x32xf32> to vector<1x32xf32>
    %c0_83 = arith.constant 0 : index
    %c0_84 = arith.constant 0 : index
    %c0_85 = arith.constant 0 : index
    %181 = vector.load %arg16[%c0_83, %c0_84, %c0_85] : memref<2x1x32xf32, #tpu.memory_space<vmem>>, vector<1x1x32xf32>
    %182 = vector.shape_cast %181 : vector<1x1x32xf32> to vector<1x32xf32>
    %183 = arith.addf %162, %178 : vector<8x32xf32>
    %cst_86 = arith.constant dense<0.000000e+00> : vector<8xf32>
    %184 = vector.multi_reduction <add>, %183, %cst_86 [1] : vector<8x32xf32> to vector<8xf32>
    %185 = vector.shape_cast %184 : vector<8xf32> to vector<8x1xf32>
    %cst_87 = arith.constant 3.200000e+01 : f32
    %186 = vector.broadcast %cst_87 : f32 to vector<8x1xf32>
    %187 = arith.divf %185, %186 : vector<8x1xf32>
    %188 = vector.broadcast %187 : vector<8x1xf32> to vector<8x32xf32>
    %189 = arith.subf %183, %188 : vector<8x32xf32>
    %190 = vector.broadcast %187 : vector<8x1xf32> to vector<8x32xf32>
    %191 = arith.subf %183, %190 : vector<8x32xf32>
    %192 = arith.mulf %189, %191 : vector<8x32xf32>
    %cst_88 = arith.constant dense<0.000000e+00> : vector<8xf32>
    %193 = vector.multi_reduction <add>, %192, %cst_88 [1] : vector<8x32xf32> to vector<8xf32>
    %194 = vector.shape_cast %193 : vector<8xf32> to vector<8x1xf32>
    %cst_89 = arith.constant 3.200000e+01 : f32
    %195 = vector.broadcast %cst_89 : f32 to vector<8x1xf32>
    %196 = arith.divf %194, %195 : vector<8x1xf32>
    %197 = vector.broadcast %187 : vector<8x1xf32> to vector<8x32xf32>
    %198 = arith.subf %183, %197 : vector<8x32xf32>
    %cst_90 = arith.constant 9.99999974E-6 : f32
    %199 = vector.broadcast %cst_90 : f32 to vector<8x1xf32>
    %200 = arith.addf %196, %199 : vector<8x1xf32>
    %201 = math.rsqrt %200 : vector<8x1xf32>
    %202 = vector.broadcast %201 : vector<8x1xf32> to vector<8x32xf32>
    %203 = arith.mulf %198, %202 : vector<8x32xf32>
    %204 = vector.broadcast %180 : vector<1x32xf32> to vector<8x32xf32>
    %205 = arith.mulf %203, %204 : vector<8x32xf32>
    %206 = vector.broadcast %182 : vector<1x32xf32> to vector<8x32xf32>
    %207 = arith.addf %205, %206 : vector<8x32xf32>
    %c1 = arith.constant 1 : index
    %c0_91 = arith.constant 0 : index
    %c0_92 = arith.constant 0 : index
    %208 = vector.load %arg5[%c1, %c0_91, %c0_92] : memref<2x32x96xf32, #tpu.memory_space<vmem>>, vector<1x32x96xf32>
    %209 = vector.shape_cast %208 : vector<1x32x96xf32> to vector<32x96xf32>
    %cst_93 = arith.constant dense<0.000000e+00> : vector<8x96xf32>
    %210 = tpu.matmul %207, %209, %cst_93 {dimension_numbers = #tpu.dot_dimension_numbers<[1], [0], [0], [1], [0, 0, 1, 1], [], []>} : vector<8x32xf32>, vector<32x96xf32>, vector<8x96xf32> -> vector<8x96xf32>
    %c1_94 = arith.constant 1 : index
    %c0_95 = arith.constant 0 : index
    %c0_96 = arith.constant 0 : index
    %211 = vector.load %arg6[%c1_94, %c0_95, %c0_96] : memref<2x1x96xf32, #tpu.memory_space<vmem>>, vector<1x1x96xf32>
    %212 = vector.shape_cast %211 : vector<1x1x96xf32> to vector<1x96xf32>
    %213 = vector.broadcast %212 : vector<1x96xf32> to vector<8x96xf32>
    %214 = arith.addf %210, %213 : vector<8x96xf32>
    %215 = vector.extract_strided_slice %214 {offsets = [0, 0], sizes = [8, 32], strides = [1, 1]} : vector<8x96xf32> to vector<8x32xf32>
    %216 = vector.extract_strided_slice %214 {offsets = [0, 32], sizes = [8, 32], strides = [1, 1]} : vector<8x96xf32> to vector<8x32xf32>
    %217 = vector.extract_strided_slice %214 {offsets = [0, 64], sizes = [8, 32], strides = [1, 1]} : vector<8x96xf32> to vector<8x32xf32>
    %c1_97 = arith.constant 1 : index
    %c0_98 = arith.constant 0 : index
    %c0_99 = arith.constant 0 : index
    %218 = vector.load %arg7[%c1_97, %c0_98, %c0_99] : memref<2x32x32xf32, #tpu.memory_space<vmem>>, vector<1x32x32xf32>
    %219 = vector.shape_cast %218 : vector<1x32x32xf32> to vector<32x32xf32>
    %c1_100 = arith.constant 1 : index
    %c0_101 = arith.constant 0 : index
    %c0_102 = arith.constant 0 : index
    %220 = vector.load %arg8[%c1_100, %c0_101, %c0_102] : memref<2x1x32xf32, #tpu.memory_space<vmem>>, vector<1x1x32xf32>
    %221 = vector.shape_cast %220 : vector<1x1x32xf32> to vector<1x32xf32>
    %cst_103 = arith.constant 0.000000e+00 : f32
    %222 = vector.broadcast %cst_103 : f32 to vector<8x32xf32>
    %223 = vector.extract_strided_slice %215 {offsets = [0, 0], sizes = [8, 8], strides = [1, 1]} : vector<8x32xf32> to vector<8x8xf32>
    %cst_104 = arith.constant 0.353553385 : f32
    %224 = vector.broadcast %cst_104 : f32 to vector<8x8xf32>
    %225 = arith.mulf %223, %224 : vector<8x8xf32>
    %226 = vector.extract_strided_slice %216 {offsets = [0, 0], sizes = [8, 8], strides = [1, 1]} : vector<8x32xf32> to vector<8x8xf32>
    %227 = vector.extract_strided_slice %217 {offsets = [0, 0], sizes = [8, 8], strides = [1, 1]} : vector<8x32xf32> to vector<8x8xf32>
    %228 = tpu.transpose %226, [1, 0] : vector<8x8xf32> -> vector<8x8xf32>
    %cst_105 = arith.constant dense<0.000000e+00> : vector<8x8xf32>
    %229 = tpu.matmul %225, %228, %cst_105 {dimension_numbers = #tpu.dot_dimension_numbers<[1], [0], [0], [1], [0, 0, 1, 1], [], []>} : vector<8x8xf32>, vector<8x8xf32>, vector<8x8xf32> -> vector<8x8xf32>
    %cst_106 = arith.constant -1.000000e+10 : f32
    %230 = vector.shape_cast %7 : vector<1x8xi1> to vector<1x8xi1>
    %231 = vector.broadcast %230 : vector<1x8xi1> to vector<8x8xi1>
    %232 = vector.broadcast %cst_106 : f32 to vector<8x8xf32>
    %233 = arith.select %231, %232, %229 : vector<8x8xi1>, vector<8x8xf32>
    %cst_107 = arith.constant dense<0xFF800000> : vector<8xf32>
    %234 = vector.multi_reduction <maximumf>, %233, %cst_107 [1] : vector<8x8xf32> to vector<8xf32>
    %235 = vector.shape_cast %234 : vector<8xf32> to vector<8x1xf32>
    %236 = vector.broadcast %235 : vector<8x1xf32> to vector<8x8xf32>
    %237 = arith.subf %233, %236 : vector<8x8xf32>
    %238 = math.exp %237 : vector<8x8xf32>
    %cst_108 = arith.constant dense<0.000000e+00> : vector<8xf32>
    %239 = vector.multi_reduction <add>, %238, %cst_108 [1] : vector<8x8xf32> to vector<8xf32>
    %240 = vector.shape_cast %239 : vector<8xf32> to vector<8x1xf32>
    %241 = tpu.reciprocal %240 {approx = true} : vector<8x1xf32> -> vector<8x1xf32>
    %242 = vector.broadcast %241 : vector<8x1xf32> to vector<8x8xf32>
    %243 = arith.mulf %238, %242 : vector<8x8xf32>
    %cst_109 = arith.constant dense<0.000000e+00> : vector<8x8xf32>
    %244 = tpu.matmul %243, %227, %cst_109 {dimension_numbers = #tpu.dot_dimension_numbers<[1], [0], [0], [1], [0, 0, 1, 1], [], []>} : vector<8x8xf32>, vector<8x8xf32>, vector<8x8xf32> -> vector<8x8xf32>
    %245 = vector.extract_strided_slice %219 {offsets = [0, 0], sizes = [8, 32], strides = [1, 1]} : vector<32x32xf32> to vector<8x32xf32>
    %cst_110 = arith.constant dense<0.000000e+00> : vector<8x32xf32>
    %246 = tpu.matmul %244, %245, %cst_110 {dimension_numbers = #tpu.dot_dimension_numbers<[1], [0], [0], [1], [0, 0, 1, 1], [], []>} : vector<8x8xf32>, vector<8x32xf32>, vector<8x32xf32> -> vector<8x32xf32>
    %247 = arith.addf %222, %246 : vector<8x32xf32>
    %248 = vector.extract_strided_slice %215 {offsets = [0, 8], sizes = [8, 8], strides = [1, 1]} : vector<8x32xf32> to vector<8x8xf32>
    %cst_111 = arith.constant 0.353553385 : f32
    %249 = vector.broadcast %cst_111 : f32 to vector<8x8xf32>
    %250 = arith.mulf %248, %249 : vector<8x8xf32>
    %251 = vector.extract_strided_slice %216 {offsets = [0, 8], sizes = [8, 8], strides = [1, 1]} : vector<8x32xf32> to vector<8x8xf32>
    %252 = vector.extract_strided_slice %217 {offsets = [0, 8], sizes = [8, 8], strides = [1, 1]} : vector<8x32xf32> to vector<8x8xf32>
    %253 = tpu.transpose %251, [1, 0] : vector<8x8xf32> -> vector<8x8xf32>
    %cst_112 = arith.constant dense<0.000000e+00> : vector<8x8xf32>
    %254 = tpu.matmul %250, %253, %cst_112 {dimension_numbers = #tpu.dot_dimension_numbers<[1], [0], [0], [1], [0, 0, 1, 1], [], []>} : vector<8x8xf32>, vector<8x8xf32>, vector<8x8xf32> -> vector<8x8xf32>
    %cst_113 = arith.constant -1.000000e+10 : f32
    %255 = vector.shape_cast %7 : vector<1x8xi1> to vector<1x8xi1>
    %256 = vector.broadcast %255 : vector<1x8xi1> to vector<8x8xi1>
    %257 = vector.broadcast %cst_113 : f32 to vector<8x8xf32>
    %258 = arith.select %256, %257, %254 : vector<8x8xi1>, vector<8x8xf32>
    %cst_114 = arith.constant dense<0xFF800000> : vector<8xf32>
    %259 = vector.multi_reduction <maximumf>, %258, %cst_114 [1] : vector<8x8xf32> to vector<8xf32>
    %260 = vector.shape_cast %259 : vector<8xf32> to vector<8x1xf32>
    %261 = vector.broadcast %260 : vector<8x1xf32> to vector<8x8xf32>
    %262 = arith.subf %258, %261 : vector<8x8xf32>
    %263 = math.exp %262 : vector<8x8xf32>
    %cst_115 = arith.constant dense<0.000000e+00> : vector<8xf32>
    %264 = vector.multi_reduction <add>, %263, %cst_115 [1] : vector<8x8xf32> to vector<8xf32>
    %265 = vector.shape_cast %264 : vector<8xf32> to vector<8x1xf32>
    %266 = tpu.reciprocal %265 {approx = true} : vector<8x1xf32> -> vector<8x1xf32>
    %267 = vector.broadcast %266 : vector<8x1xf32> to vector<8x8xf32>
    %268 = arith.mulf %263, %267 : vector<8x8xf32>
    %cst_116 = arith.constant dense<0.000000e+00> : vector<8x8xf32>
    %269 = tpu.matmul %268, %252, %cst_116 {dimension_numbers = #tpu.dot_dimension_numbers<[1], [0], [0], [1], [0, 0, 1, 1], [], []>} : vector<8x8xf32>, vector<8x8xf32>, vector<8x8xf32> -> vector<8x8xf32>
    %270 = vector.extract_strided_slice %219 {offsets = [8, 0], sizes = [8, 32], strides = [1, 1]} : vector<32x32xf32> to vector<8x32xf32>
    %cst_117 = arith.constant dense<0.000000e+00> : vector<8x32xf32>
    %271 = tpu.matmul %269, %270, %cst_117 {dimension_numbers = #tpu.dot_dimension_numbers<[1], [0], [0], [1], [0, 0, 1, 1], [], []>} : vector<8x8xf32>, vector<8x32xf32>, vector<8x32xf32> -> vector<8x32xf32>
    %272 = arith.addf %247, %271 : vector<8x32xf32>
    %273 = vector.extract_strided_slice %215 {offsets = [0, 16], sizes = [8, 8], strides = [1, 1]} : vector<8x32xf32> to vector<8x8xf32>
    %cst_118 = arith.constant 0.353553385 : f32
    %274 = vector.broadcast %cst_118 : f32 to vector<8x8xf32>
    %275 = arith.mulf %273, %274 : vector<8x8xf32>
    %276 = vector.extract_strided_slice %216 {offsets = [0, 16], sizes = [8, 8], strides = [1, 1]} : vector<8x32xf32> to vector<8x8xf32>
    %277 = vector.extract_strided_slice %217 {offsets = [0, 16], sizes = [8, 8], strides = [1, 1]} : vector<8x32xf32> to vector<8x8xf32>
    %278 = tpu.transpose %276, [1, 0] : vector<8x8xf32> -> vector<8x8xf32>
    %cst_119 = arith.constant dense<0.000000e+00> : vector<8x8xf32>
    %279 = tpu.matmul %275, %278, %cst_119 {dimension_numbers = #tpu.dot_dimension_numbers<[1], [0], [0], [1], [0, 0, 1, 1], [], []>} : vector<8x8xf32>, vector<8x8xf32>, vector<8x8xf32> -> vector<8x8xf32>
    %cst_120 = arith.constant -1.000000e+10 : f32
    %280 = vector.shape_cast %7 : vector<1x8xi1> to vector<1x8xi1>
    %281 = vector.broadcast %280 : vector<1x8xi1> to vector<8x8xi1>
    %282 = vector.broadcast %cst_120 : f32 to vector<8x8xf32>
    %283 = arith.select %281, %282, %279 : vector<8x8xi1>, vector<8x8xf32>
    %cst_121 = arith.constant dense<0xFF800000> : vector<8xf32>
    %284 = vector.multi_reduction <maximumf>, %283, %cst_121 [1] : vector<8x8xf32> to vector<8xf32>
    %285 = vector.shape_cast %284 : vector<8xf32> to vector<8x1xf32>
    %286 = vector.broadcast %285 : vector<8x1xf32> to vector<8x8xf32>
    %287 = arith.subf %283, %286 : vector<8x8xf32>
    %288 = math.exp %287 : vector<8x8xf32>
    %cst_122 = arith.constant dense<0.000000e+00> : vector<8xf32>
    %289 = vector.multi_reduction <add>, %288, %cst_122 [1] : vector<8x8xf32> to vector<8xf32>
    %290 = vector.shape_cast %289 : vector<8xf32> to vector<8x1xf32>
    %291 = tpu.reciprocal %290 {approx = true} : vector<8x1xf32> -> vector<8x1xf32>
    %292 = vector.broadcast %291 : vector<8x1xf32> to vector<8x8xf32>
    %293 = arith.mulf %288, %292 : vector<8x8xf32>
    %cst_123 = arith.constant dense<0.000000e+00> : vector<8x8xf32>
    %294 = tpu.matmul %293, %277, %cst_123 {dimension_numbers = #tpu.dot_dimension_numbers<[1], [0], [0], [1], [0, 0, 1, 1], [], []>} : vector<8x8xf32>, vector<8x8xf32>, vector<8x8xf32> -> vector<8x8xf32>
    %295 = vector.extract_strided_slice %219 {offsets = [16, 0], sizes = [8, 32], strides = [1, 1]} : vector<32x32xf32> to vector<8x32xf32>
    %cst_124 = arith.constant dense<0.000000e+00> : vector<8x32xf32>
    %296 = tpu.matmul %294, %295, %cst_124 {dimension_numbers = #tpu.dot_dimension_numbers<[1], [0], [0], [1], [0, 0, 1, 1], [], []>} : vector<8x8xf32>, vector<8x32xf32>, vector<8x32xf32> -> vector<8x32xf32>
    %297 = arith.addf %272, %296 : vector<8x32xf32>
    %298 = vector.extract_strided_slice %215 {offsets = [0, 24], sizes = [8, 8], strides = [1, 1]} : vector<8x32xf32> to vector<8x8xf32>
    %cst_125 = arith.constant 0.353553385 : f32
    %299 = vector.broadcast %cst_125 : f32 to vector<8x8xf32>
    %300 = arith.mulf %298, %299 : vector<8x8xf32>
    %301 = vector.extract_strided_slice %216 {offsets = [0, 24], sizes = [8, 8], strides = [1, 1]} : vector<8x32xf32> to vector<8x8xf32>
    %302 = vector.extract_strided_slice %217 {offsets = [0, 24], sizes = [8, 8], strides = [1, 1]} : vector<8x32xf32> to vector<8x8xf32>
    %303 = tpu.transpose %301, [1, 0] : vector<8x8xf32> -> vector<8x8xf32>
    %cst_126 = arith.constant dense<0.000000e+00> : vector<8x8xf32>
    %304 = tpu.matmul %300, %303, %cst_126 {dimension_numbers = #tpu.dot_dimension_numbers<[1], [0], [0], [1], [0, 0, 1, 1], [], []>} : vector<8x8xf32>, vector<8x8xf32>, vector<8x8xf32> -> vector<8x8xf32>
    %cst_127 = arith.constant -1.000000e+10 : f32
    %305 = vector.shape_cast %7 : vector<1x8xi1> to vector<1x8xi1>
    %306 = vector.broadcast %305 : vector<1x8xi1> to vector<8x8xi1>
    %307 = vector.broadcast %cst_127 : f32 to vector<8x8xf32>
    %308 = arith.select %306, %307, %304 : vector<8x8xi1>, vector<8x8xf32>
    %cst_128 = arith.constant dense<0xFF800000> : vector<8xf32>
    %309 = vector.multi_reduction <maximumf>, %308, %cst_128 [1] : vector<8x8xf32> to vector<8xf32>
    %310 = vector.shape_cast %309 : vector<8xf32> to vector<8x1xf32>
    %311 = vector.broadcast %310 : vector<8x1xf32> to vector<8x8xf32>
    %312 = arith.subf %308, %311 : vector<8x8xf32>
    %313 = math.exp %312 : vector<8x8xf32>
    %cst_129 = arith.constant dense<0.000000e+00> : vector<8xf32>
    %314 = vector.multi_reduction <add>, %313, %cst_129 [1] : vector<8x8xf32> to vector<8xf32>
    %315 = vector.shape_cast %314 : vector<8xf32> to vector<8x1xf32>
    %316 = tpu.reciprocal %315 {approx = true} : vector<8x1xf32> -> vector<8x1xf32>
    %317 = vector.broadcast %316 : vector<8x1xf32> to vector<8x8xf32>
    %318 = arith.mulf %313, %317 : vector<8x8xf32>
    %cst_130 = arith.constant dense<0.000000e+00> : vector<8x8xf32>
    %319 = tpu.matmul %318, %302, %cst_130 {dimension_numbers = #tpu.dot_dimension_numbers<[1], [0], [0], [1], [0, 0, 1, 1], [], []>} : vector<8x8xf32>, vector<8x8xf32>, vector<8x8xf32> -> vector<8x8xf32>
    %320 = vector.extract_strided_slice %219 {offsets = [24, 0], sizes = [8, 32], strides = [1, 1]} : vector<32x32xf32> to vector<8x32xf32>
    %cst_131 = arith.constant dense<0.000000e+00> : vector<8x32xf32>
    %321 = tpu.matmul %319, %320, %cst_131 {dimension_numbers = #tpu.dot_dimension_numbers<[1], [0], [0], [1], [0, 0, 1, 1], [], []>} : vector<8x8xf32>, vector<8x32xf32>, vector<8x32xf32> -> vector<8x32xf32>
    %322 = arith.addf %297, %321 : vector<8x32xf32>
    %323 = vector.broadcast %221 : vector<1x32xf32> to vector<8x32xf32>
    %324 = arith.addf %322, %323 : vector<8x32xf32>
    %c1_132 = arith.constant 1 : index
    %c0_133 = arith.constant 0 : index
    %c0_134 = arith.constant 0 : index
    %325 = vector.load %arg9[%c1_132, %c0_133, %c0_134] : memref<2x1x32xf32, #tpu.memory_space<vmem>>, vector<1x1x32xf32>
    %326 = vector.shape_cast %325 : vector<1x1x32xf32> to vector<1x32xf32>
    %c1_135 = arith.constant 1 : index
    %c0_136 = arith.constant 0 : index
    %c0_137 = arith.constant 0 : index
    %327 = vector.load %arg10[%c1_135, %c0_136, %c0_137] : memref<2x1x32xf32, #tpu.memory_space<vmem>>, vector<1x1x32xf32>
    %328 = vector.shape_cast %327 : vector<1x1x32xf32> to vector<1x32xf32>
    %329 = arith.addf %207, %324 : vector<8x32xf32>
    %cst_138 = arith.constant dense<0.000000e+00> : vector<8xf32>
    %330 = vector.multi_reduction <add>, %329, %cst_138 [1] : vector<8x32xf32> to vector<8xf32>
    %331 = vector.shape_cast %330 : vector<8xf32> to vector<8x1xf32>
    %cst_139 = arith.constant 3.200000e+01 : f32
    %332 = vector.broadcast %cst_139 : f32 to vector<8x1xf32>
    %333 = arith.divf %331, %332 : vector<8x1xf32>
    %334 = vector.broadcast %333 : vector<8x1xf32> to vector<8x32xf32>
    %335 = arith.subf %329, %334 : vector<8x32xf32>
    %336 = vector.broadcast %333 : vector<8x1xf32> to vector<8x32xf32>
    %337 = arith.subf %329, %336 : vector<8x32xf32>
    %338 = arith.mulf %335, %337 : vector<8x32xf32>
    %cst_140 = arith.constant dense<0.000000e+00> : vector<8xf32>
    %339 = vector.multi_reduction <add>, %338, %cst_140 [1] : vector<8x32xf32> to vector<8xf32>
    %340 = vector.shape_cast %339 : vector<8xf32> to vector<8x1xf32>
    %cst_141 = arith.constant 3.200000e+01 : f32
    %341 = vector.broadcast %cst_141 : f32 to vector<8x1xf32>
    %342 = arith.divf %340, %341 : vector<8x1xf32>
    %343 = vector.broadcast %333 : vector<8x1xf32> to vector<8x32xf32>
    %344 = arith.subf %329, %343 : vector<8x32xf32>
    %cst_142 = arith.constant 9.99999974E-6 : f32
    %345 = vector.broadcast %cst_142 : f32 to vector<8x1xf32>
    %346 = arith.addf %342, %345 : vector<8x1xf32>
    %347 = math.rsqrt %346 : vector<8x1xf32>
    %348 = vector.broadcast %347 : vector<8x1xf32> to vector<8x32xf32>
    %349 = arith.mulf %344, %348 : vector<8x32xf32>
    %350 = vector.broadcast %326 : vector<1x32xf32> to vector<8x32xf32>
    %351 = arith.mulf %349, %350 : vector<8x32xf32>
    %352 = vector.broadcast %328 : vector<1x32xf32> to vector<8x32xf32>
    %353 = arith.addf %351, %352 : vector<8x32xf32>
    %c1_143 = arith.constant 1 : index
    %c0_144 = arith.constant 0 : index
    %c0_145 = arith.constant 0 : index
    %354 = vector.load %arg11[%c1_143, %c0_144, %c0_145] : memref<2x32x64xf32, #tpu.memory_space<vmem>>, vector<1x32x64xf32>
    %355 = vector.shape_cast %354 : vector<1x32x64xf32> to vector<32x64xf32>
    %c1_146 = arith.constant 1 : index
    %c0_147 = arith.constant 0 : index
    %c0_148 = arith.constant 0 : index
    %356 = vector.load %arg12[%c1_146, %c0_147, %c0_148] : memref<2x1x64xf32, #tpu.memory_space<vmem>>, vector<1x1x64xf32>
    %357 = vector.shape_cast %356 : vector<1x1x64xf32> to vector<1x64xf32>
    %c1_149 = arith.constant 1 : index
    %c0_150 = arith.constant 0 : index
    %c0_151 = arith.constant 0 : index
    %358 = vector.load %arg13[%c1_149, %c0_150, %c0_151] : memref<2x64x32xf32, #tpu.memory_space<vmem>>, vector<1x64x32xf32>
    %359 = vector.shape_cast %358 : vector<1x64x32xf32> to vector<64x32xf32>
    %c1_152 = arith.constant 1 : index
    %c0_153 = arith.constant 0 : index
    %c0_154 = arith.constant 0 : index
    %360 = vector.load %arg14[%c1_152, %c0_153, %c0_154] : memref<2x1x32xf32, #tpu.memory_space<vmem>>, vector<1x1x32xf32>
    %361 = vector.shape_cast %360 : vector<1x1x32xf32> to vector<1x32xf32>
    %cst_155 = arith.constant dense<0.000000e+00> : vector<8x64xf32>
    %362 = tpu.matmul %353, %355, %cst_155 {dimension_numbers = #tpu.dot_dimension_numbers<[1], [0], [0], [1], [0, 0, 1, 1], [], []>} : vector<8x32xf32>, vector<32x64xf32>, vector<8x64xf32> -> vector<8x64xf32>
    %363 = vector.broadcast %357 : vector<1x64xf32> to vector<8x64xf32>
    %364 = arith.addf %362, %363 : vector<8x64xf32>
    %cst_156 = arith.constant 0.000000e+00 : f32
    %365 = vector.broadcast %cst_156 : f32 to vector<8x64xf32>
    %366 = arith.maximumf %364, %365 : vector<8x64xf32>
    %cst_157 = arith.constant dense<0.000000e+00> : vector<8x32xf32>
    %367 = tpu.matmul %366, %359, %cst_157 {dimension_numbers = #tpu.dot_dimension_numbers<[1], [0], [0], [1], [0, 0, 1, 1], [], []>} : vector<8x64xf32>, vector<64x32xf32>, vector<8x32xf32> -> vector<8x32xf32>
    %368 = vector.broadcast %361 : vector<1x32xf32> to vector<8x32xf32>
    %369 = arith.addf %367, %368 : vector<8x32xf32>
    %c1_158 = arith.constant 1 : index
    %c0_159 = arith.constant 0 : index
    %c0_160 = arith.constant 0 : index
    %370 = vector.load %arg15[%c1_158, %c0_159, %c0_160] : memref<2x1x32xf32, #tpu.memory_space<vmem>>, vector<1x1x32xf32>
    %371 = vector.shape_cast %370 : vector<1x1x32xf32> to vector<1x32xf32>
    %c1_161 = arith.constant 1 : index
    %c0_162 = arith.constant 0 : index
    %c0_163 = arith.constant 0 : index
    %372 = vector.load %arg16[%c1_161, %c0_162, %c0_163] : memref<2x1x32xf32, #tpu.memory_space<vmem>>, vector<1x1x32xf32>
    %373 = vector.shape_cast %372 : vector<1x1x32xf32> to vector<1x32xf32>
    %374 = arith.addf %353, %369 : vector<8x32xf32>
    %cst_164 = arith.constant dense<0.000000e+00> : vector<8xf32>
    %375 = vector.multi_reduction <add>, %374, %cst_164 [1] : vector<8x32xf32> to vector<8xf32>
    %376 = vector.shape_cast %375 : vector<8xf32> to vector<8x1xf32>
    %cst_165 = arith.constant 3.200000e+01 : f32
    %377 = vector.broadcast %cst_165 : f32 to vector<8x1xf32>
    %378 = arith.divf %376, %377 : vector<8x1xf32>
    %379 = vector.broadcast %378 : vector<8x1xf32> to vector<8x32xf32>
    %380 = arith.subf %374, %379 : vector<8x32xf32>
    %381 = vector.broadcast %378 : vector<8x1xf32> to vector<8x32xf32>
    %382 = arith.subf %374, %381 : vector<8x32xf32>
    %383 = arith.mulf %380, %382 : vector<8x32xf32>
    %cst_166 = arith.constant dense<0.000000e+00> : vector<8xf32>
    %384 = vector.multi_reduction <add>, %383, %cst_166 [1] : vector<8x32xf32> to vector<8xf32>
    %385 = vector.shape_cast %384 : vector<8xf32> to vector<8x1xf32>
    %cst_167 = arith.constant 3.200000e+01 : f32
    %386 = vector.broadcast %cst_167 : f32 to vector<8x1xf32>
    %387 = arith.divf %385, %386 : vector<8x1xf32>
    %388 = vector.broadcast %378 : vector<8x1xf32> to vector<8x32xf32>
    %389 = arith.subf %374, %388 : vector<8x32xf32>
    %cst_168 = arith.constant 9.99999974E-6 : f32
    %390 = vector.broadcast %cst_168 : f32 to vector<8x1xf32>
    %391 = arith.addf %387, %390 : vector<8x1xf32>
    %392 = math.rsqrt %391 : vector<8x1xf32>
    %393 = vector.broadcast %392 : vector<8x1xf32> to vector<8x32xf32>
    %394 = arith.mulf %389, %393 : vector<8x32xf32>
    %395 = vector.broadcast %371 : vector<1x32xf32> to vector<8x32xf32>
    %396 = arith.mulf %394, %395 : vector<8x32xf32>
    %397 = vector.broadcast %373 : vector<1x32xf32> to vector<8x32xf32>
    %398 = arith.addf %396, %397 : vector<8x32xf32>
    %c0_169 = arith.constant 0 : index
    %c0_170 = arith.constant 0 : index
    %c0_171 = arith.constant 0 : index
    %399 = vector.load %arg17[%c0_169, %c0_170, %c0_171] : memref<2x32x96xf32, #tpu.memory_space<vmem>>, vector<1x32x96xf32>
    %400 = vector.shape_cast %399 : vector<1x32x96xf32> to vector<32x96xf32>
    %cst_172 = arith.constant dense<0.000000e+00> : vector<8x96xf32>
    %401 = tpu.matmul %3, %400, %cst_172 {dimension_numbers = #tpu.dot_dimension_numbers<[1], [0], [0], [1], [0, 0, 1, 1], [], []>} : vector<8x32xf32>, vector<32x96xf32>, vector<8x96xf32> -> vector<8x96xf32>
    %c0_173 = arith.constant 0 : index
    %c0_174 = arith.constant 0 : index
    %c0_175 = arith.constant 0 : index
    %402 = vector.load %arg18[%c0_173, %c0_174, %c0_175] : memref<2x1x96xf32, #tpu.memory_space<vmem>>, vector<1x1x96xf32>
    %403 = vector.shape_cast %402 : vector<1x1x96xf32> to vector<1x96xf32>
    %404 = vector.broadcast %403 : vector<1x96xf32> to vector<8x96xf32>
    %405 = arith.addf %401, %404 : vector<8x96xf32>
    %406 = vector.extract_strided_slice %405 {offsets = [0, 0], sizes = [8, 32], strides = [1, 1]} : vector<8x96xf32> to vector<8x32xf32>
    %407 = vector.extract_strided_slice %405 {offsets = [0, 32], sizes = [8, 32], strides = [1, 1]} : vector<8x96xf32> to vector<8x32xf32>
    %408 = vector.extract_strided_slice %405 {offsets = [0, 64], sizes = [8, 32], strides = [1, 1]} : vector<8x96xf32> to vector<8x32xf32>
    %c0_176 = arith.constant 0 : index
    %c0_177 = arith.constant 0 : index
    %c0_178 = arith.constant 0 : index
    %409 = vector.load %arg19[%c0_176, %c0_177, %c0_178] : memref<2x32x32xf32, #tpu.memory_space<vmem>>, vector<1x32x32xf32>
    %410 = vector.shape_cast %409 : vector<1x32x32xf32> to vector<32x32xf32>
    %c0_179 = arith.constant 0 : index
    %c0_180 = arith.constant 0 : index
    %c0_181 = arith.constant 0 : index
    %411 = vector.load %arg20[%c0_179, %c0_180, %c0_181] : memref<2x1x32xf32, #tpu.memory_space<vmem>>, vector<1x1x32xf32>
    %412 = vector.shape_cast %411 : vector<1x1x32xf32> to vector<1x32xf32>
    %cst_182 = arith.constant 0.000000e+00 : f32
    %413 = vector.broadcast %cst_182 : f32 to vector<8x32xf32>
    %414 = vector.extract_strided_slice %406 {offsets = [0, 0], sizes = [8, 8], strides = [1, 1]} : vector<8x32xf32> to vector<8x8xf32>
    %cst_183 = arith.constant 0.353553385 : f32
    %415 = vector.broadcast %cst_183 : f32 to vector<8x8xf32>
    %416 = arith.mulf %414, %415 : vector<8x8xf32>
    %417 = vector.extract_strided_slice %407 {offsets = [0, 0], sizes = [8, 8], strides = [1, 1]} : vector<8x32xf32> to vector<8x8xf32>
    %418 = vector.extract_strided_slice %408 {offsets = [0, 0], sizes = [8, 8], strides = [1, 1]} : vector<8x32xf32> to vector<8x8xf32>
    %419 = tpu.transpose %417, [1, 0] : vector<8x8xf32> -> vector<8x8xf32>
    %cst_184 = arith.constant dense<0.000000e+00> : vector<8x8xf32>
    %420 = tpu.matmul %416, %419, %cst_184 {dimension_numbers = #tpu.dot_dimension_numbers<[1], [0], [0], [1], [0, 0, 1, 1], [], []>} : vector<8x8xf32>, vector<8x8xf32>, vector<8x8xf32> -> vector<8x8xf32>
    %cst_185 = arith.constant -1.000000e+10 : f32
    %421 = vector.broadcast %cst_185 : f32 to vector<8x8xf32>
    %422 = arith.select %16, %421, %420 : vector<8x8xi1>, vector<8x8xf32>
    %cst_186 = arith.constant dense<0xFF800000> : vector<8xf32>
    %423 = vector.multi_reduction <maximumf>, %422, %cst_186 [1] : vector<8x8xf32> to vector<8xf32>
    %424 = vector.shape_cast %423 : vector<8xf32> to vector<8x1xf32>
    %425 = vector.broadcast %424 : vector<8x1xf32> to vector<8x8xf32>
    %426 = arith.subf %422, %425 : vector<8x8xf32>
    %427 = math.exp %426 : vector<8x8xf32>
    %cst_187 = arith.constant dense<0.000000e+00> : vector<8xf32>
    %428 = vector.multi_reduction <add>, %427, %cst_187 [1] : vector<8x8xf32> to vector<8xf32>
    %429 = vector.shape_cast %428 : vector<8xf32> to vector<8x1xf32>
    %430 = tpu.reciprocal %429 {approx = true} : vector<8x1xf32> -> vector<8x1xf32>
    %431 = vector.broadcast %430 : vector<8x1xf32> to vector<8x8xf32>
    %432 = arith.mulf %427, %431 : vector<8x8xf32>
    %cst_188 = arith.constant dense<0.000000e+00> : vector<8x8xf32>
    %433 = tpu.matmul %432, %418, %cst_188 {dimension_numbers = #tpu.dot_dimension_numbers<[1], [0], [0], [1], [0, 0, 1, 1], [], []>} : vector<8x8xf32>, vector<8x8xf32>, vector<8x8xf32> -> vector<8x8xf32>
    %434 = vector.extract_strided_slice %410 {offsets = [0, 0], sizes = [8, 32], strides = [1, 1]} : vector<32x32xf32> to vector<8x32xf32>
    %cst_189 = arith.constant dense<0.000000e+00> : vector<8x32xf32>
    %435 = tpu.matmul %433, %434, %cst_189 {dimension_numbers = #tpu.dot_dimension_numbers<[1], [0], [0], [1], [0, 0, 1, 1], [], []>} : vector<8x8xf32>, vector<8x32xf32>, vector<8x32xf32> -> vector<8x32xf32>
    %436 = arith.addf %413, %435 : vector<8x32xf32>
    %437 = vector.extract_strided_slice %406 {offsets = [0, 8], sizes = [8, 8], strides = [1, 1]} : vector<8x32xf32> to vector<8x8xf32>
    %cst_190 = arith.constant 0.353553385 : f32
    %438 = vector.broadcast %cst_190 : f32 to vector<8x8xf32>
    %439 = arith.mulf %437, %438 : vector<8x8xf32>
    %440 = vector.extract_strided_slice %407 {offsets = [0, 8], sizes = [8, 8], strides = [1, 1]} : vector<8x32xf32> to vector<8x8xf32>
    %441 = vector.extract_strided_slice %408 {offsets = [0, 8], sizes = [8, 8], strides = [1, 1]} : vector<8x32xf32> to vector<8x8xf32>
    %442 = tpu.transpose %440, [1, 0] : vector<8x8xf32> -> vector<8x8xf32>
    %cst_191 = arith.constant dense<0.000000e+00> : vector<8x8xf32>
    %443 = tpu.matmul %439, %442, %cst_191 {dimension_numbers = #tpu.dot_dimension_numbers<[1], [0], [0], [1], [0, 0, 1, 1], [], []>} : vector<8x8xf32>, vector<8x8xf32>, vector<8x8xf32> -> vector<8x8xf32>
    %cst_192 = arith.constant -1.000000e+10 : f32
    %444 = vector.broadcast %cst_192 : f32 to vector<8x8xf32>
    %445 = arith.select %16, %444, %443 : vector<8x8xi1>, vector<8x8xf32>
    %cst_193 = arith.constant dense<0xFF800000> : vector<8xf32>
    %446 = vector.multi_reduction <maximumf>, %445, %cst_193 [1] : vector<8x8xf32> to vector<8xf32>
    %447 = vector.shape_cast %446 : vector<8xf32> to vector<8x1xf32>
    %448 = vector.broadcast %447 : vector<8x1xf32> to vector<8x8xf32>
    %449 = arith.subf %445, %448 : vector<8x8xf32>
    %450 = math.exp %449 : vector<8x8xf32>
    %cst_194 = arith.constant dense<0.000000e+00> : vector<8xf32>
    %451 = vector.multi_reduction <add>, %450, %cst_194 [1] : vector<8x8xf32> to vector<8xf32>
    %452 = vector.shape_cast %451 : vector<8xf32> to vector<8x1xf32>
    %453 = tpu.reciprocal %452 {approx = true} : vector<8x1xf32> -> vector<8x1xf32>
    %454 = vector.broadcast %453 : vector<8x1xf32> to vector<8x8xf32>
    %455 = arith.mulf %450, %454 : vector<8x8xf32>
    %cst_195 = arith.constant dense<0.000000e+00> : vector<8x8xf32>
    %456 = tpu.matmul %455, %441, %cst_195 {dimension_numbers = #tpu.dot_dimension_numbers<[1], [0], [0], [1], [0, 0, 1, 1], [], []>} : vector<8x8xf32>, vector<8x8xf32>, vector<8x8xf32> -> vector<8x8xf32>
    %457 = vector.extract_strided_slice %410 {offsets = [8, 0], sizes = [8, 32], strides = [1, 1]} : vector<32x32xf32> to vector<8x32xf32>
    %cst_196 = arith.constant dense<0.000000e+00> : vector<8x32xf32>
    %458 = tpu.matmul %456, %457, %cst_196 {dimension_numbers = #tpu.dot_dimension_numbers<[1], [0], [0], [1], [0, 0, 1, 1], [], []>} : vector<8x8xf32>, vector<8x32xf32>, vector<8x32xf32> -> vector<8x32xf32>
    %459 = arith.addf %436, %458 : vector<8x32xf32>
    %460 = vector.extract_strided_slice %406 {offsets = [0, 16], sizes = [8, 8], strides = [1, 1]} : vector<8x32xf32> to vector<8x8xf32>
    %cst_197 = arith.constant 0.353553385 : f32
    %461 = vector.broadcast %cst_197 : f32 to vector<8x8xf32>
    %462 = arith.mulf %460, %461 : vector<8x8xf32>
    %463 = vector.extract_strided_slice %407 {offsets = [0, 16], sizes = [8, 8], strides = [1, 1]} : vector<8x32xf32> to vector<8x8xf32>
    %464 = vector.extract_strided_slice %408 {offsets = [0, 16], sizes = [8, 8], strides = [1, 1]} : vector<8x32xf32> to vector<8x8xf32>
    %465 = tpu.transpose %463, [1, 0] : vector<8x8xf32> -> vector<8x8xf32>
    %cst_198 = arith.constant dense<0.000000e+00> : vector<8x8xf32>
    %466 = tpu.matmul %462, %465, %cst_198 {dimension_numbers = #tpu.dot_dimension_numbers<[1], [0], [0], [1], [0, 0, 1, 1], [], []>} : vector<8x8xf32>, vector<8x8xf32>, vector<8x8xf32> -> vector<8x8xf32>
    %cst_199 = arith.constant -1.000000e+10 : f32
    %467 = vector.broadcast %cst_199 : f32 to vector<8x8xf32>
    %468 = arith.select %16, %467, %466 : vector<8x8xi1>, vector<8x8xf32>
    %cst_200 = arith.constant dense<0xFF800000> : vector<8xf32>
    %469 = vector.multi_reduction <maximumf>, %468, %cst_200 [1] : vector<8x8xf32> to vector<8xf32>
    %470 = vector.shape_cast %469 : vector<8xf32> to vector<8x1xf32>
    %471 = vector.broadcast %470 : vector<8x1xf32> to vector<8x8xf32>
    %472 = arith.subf %468, %471 : vector<8x8xf32>
    %473 = math.exp %472 : vector<8x8xf32>
    %cst_201 = arith.constant dense<0.000000e+00> : vector<8xf32>
    %474 = vector.multi_reduction <add>, %473, %cst_201 [1] : vector<8x8xf32> to vector<8xf32>
    %475 = vector.shape_cast %474 : vector<8xf32> to vector<8x1xf32>
    %476 = tpu.reciprocal %475 {approx = true} : vector<8x1xf32> -> vector<8x1xf32>
    %477 = vector.broadcast %476 : vector<8x1xf32> to vector<8x8xf32>
    %478 = arith.mulf %473, %477 : vector<8x8xf32>
    %cst_202 = arith.constant dense<0.000000e+00> : vector<8x8xf32>
    %479 = tpu.matmul %478, %464, %cst_202 {dimension_numbers = #tpu.dot_dimension_numbers<[1], [0], [0], [1], [0, 0, 1, 1], [], []>} : vector<8x8xf32>, vector<8x8xf32>, vector<8x8xf32> -> vector<8x8xf32>
    %480 = vector.extract_strided_slice %410 {offsets = [16, 0], sizes = [8, 32], strides = [1, 1]} : vector<32x32xf32> to vector<8x32xf32>
    %cst_203 = arith.constant dense<0.000000e+00> : vector<8x32xf32>
    %481 = tpu.matmul %479, %480, %cst_203 {dimension_numbers = #tpu.dot_dimension_numbers<[1], [0], [0], [1], [0, 0, 1, 1], [], []>} : vector<8x8xf32>, vector<8x32xf32>, vector<8x32xf32> -> vector<8x32xf32>
    %482 = arith.addf %459, %481 : vector<8x32xf32>
    %483 = vector.extract_strided_slice %406 {offsets = [0, 24], sizes = [8, 8], strides = [1, 1]} : vector<8x32xf32> to vector<8x8xf32>
    %cst_204 = arith.constant 0.353553385 : f32
    %484 = vector.broadcast %cst_204 : f32 to vector<8x8xf32>
    %485 = arith.mulf %483, %484 : vector<8x8xf32>
    %486 = vector.extract_strided_slice %407 {offsets = [0, 24], sizes = [8, 8], strides = [1, 1]} : vector<8x32xf32> to vector<8x8xf32>
    %487 = vector.extract_strided_slice %408 {offsets = [0, 24], sizes = [8, 8], strides = [1, 1]} : vector<8x32xf32> to vector<8x8xf32>
    %488 = tpu.transpose %486, [1, 0] : vector<8x8xf32> -> vector<8x8xf32>
    %cst_205 = arith.constant dense<0.000000e+00> : vector<8x8xf32>
    %489 = tpu.matmul %485, %488, %cst_205 {dimension_numbers = #tpu.dot_dimension_numbers<[1], [0], [0], [1], [0, 0, 1, 1], [], []>} : vector<8x8xf32>, vector<8x8xf32>, vector<8x8xf32> -> vector<8x8xf32>
    %cst_206 = arith.constant -1.000000e+10 : f32
    %490 = vector.broadcast %cst_206 : f32 to vector<8x8xf32>
    %491 = arith.select %16, %490, %489 : vector<8x8xi1>, vector<8x8xf32>
    %cst_207 = arith.constant dense<0xFF800000> : vector<8xf32>
    %492 = vector.multi_reduction <maximumf>, %491, %cst_207 [1] : vector<8x8xf32> to vector<8xf32>
    %493 = vector.shape_cast %492 : vector<8xf32> to vector<8x1xf32>
    %494 = vector.broadcast %493 : vector<8x1xf32> to vector<8x8xf32>
    %495 = arith.subf %491, %494 : vector<8x8xf32>
    %496 = math.exp %495 : vector<8x8xf32>
    %cst_208 = arith.constant dense<0.000000e+00> : vector<8xf32>
    %497 = vector.multi_reduction <add>, %496, %cst_208 [1] : vector<8x8xf32> to vector<8xf32>
    %498 = vector.shape_cast %497 : vector<8xf32> to vector<8x1xf32>
    %499 = tpu.reciprocal %498 {approx = true} : vector<8x1xf32> -> vector<8x1xf32>
    %500 = vector.broadcast %499 : vector<8x1xf32> to vector<8x8xf32>
    %501 = arith.mulf %496, %500 : vector<8x8xf32>
    %cst_209 = arith.constant dense<0.000000e+00> : vector<8x8xf32>
    %502 = tpu.matmul %501, %487, %cst_209 {dimension_numbers = #tpu.dot_dimension_numbers<[1], [0], [0], [1], [0, 0, 1, 1], [], []>} : vector<8x8xf32>, vector<8x8xf32>, vector<8x8xf32> -> vector<8x8xf32>
    %503 = vector.extract_strided_slice %410 {offsets = [24, 0], sizes = [8, 32], strides = [1, 1]} : vector<32x32xf32> to vector<8x32xf32>
    %cst_210 = arith.constant dense<0.000000e+00> : vector<8x32xf32>
    %504 = tpu.matmul %502, %503, %cst_210 {dimension_numbers = #tpu.dot_dimension_numbers<[1], [0], [0], [1], [0, 0, 1, 1], [], []>} : vector<8x8xf32>, vector<8x32xf32>, vector<8x32xf32> -> vector<8x32xf32>
    %505 = arith.addf %482, %504 : vector<8x32xf32>
    %506 = vector.broadcast %412 : vector<1x32xf32> to vector<8x32xf32>
    %507 = arith.addf %505, %506 : vector<8x32xf32>
    %c0_211 = arith.constant 0 : index
    %c0_212 = arith.constant 0 : index
    %c0_213 = arith.constant 0 : index
    %508 = vector.load %arg21[%c0_211, %c0_212, %c0_213] : memref<2x1x32xf32, #tpu.memory_space<vmem>>, vector<1x1x32xf32>
    %509 = vector.shape_cast %508 : vector<1x1x32xf32> to vector<1x32xf32>
    %c0_214 = arith.constant 0 : index
    %c0_215 = arith.constant 0 : index
    %c0_216 = arith.constant 0 : index
    %510 = vector.load %arg22[%c0_214, %c0_215, %c0_216] : memref<2x1x32xf32, #tpu.memory_space<vmem>>, vector<1x1x32xf32>
    %511 = vector.shape_cast %510 : vector<1x1x32xf32> to vector<1x32xf32>
    %512 = arith.addf %3, %507 : vector<8x32xf32>
    %cst_217 = arith.constant dense<0.000000e+00> : vector<8xf32>
    %513 = vector.multi_reduction <add>, %512, %cst_217 [1] : vector<8x32xf32> to vector<8xf32>
    %514 = vector.shape_cast %513 : vector<8xf32> to vector<8x1xf32>
    %cst_218 = arith.constant 3.200000e+01 : f32
    %515 = vector.broadcast %cst_218 : f32 to vector<8x1xf32>
    %516 = arith.divf %514, %515 : vector<8x1xf32>
    %517 = vector.broadcast %516 : vector<8x1xf32> to vector<8x32xf32>
    %518 = arith.subf %512, %517 : vector<8x32xf32>
    %519 = vector.broadcast %516 : vector<8x1xf32> to vector<8x32xf32>
    %520 = arith.subf %512, %519 : vector<8x32xf32>
    %521 = arith.mulf %518, %520 : vector<8x32xf32>
    %cst_219 = arith.constant dense<0.000000e+00> : vector<8xf32>
    %522 = vector.multi_reduction <add>, %521, %cst_219 [1] : vector<8x32xf32> to vector<8xf32>
    %523 = vector.shape_cast %522 : vector<8xf32> to vector<8x1xf32>
    %cst_220 = arith.constant 3.200000e+01 : f32
    %524 = vector.broadcast %cst_220 : f32 to vector<8x1xf32>
    %525 = arith.divf %523, %524 : vector<8x1xf32>
    %526 = vector.broadcast %516 : vector<8x1xf32> to vector<8x32xf32>
    %527 = arith.subf %512, %526 : vector<8x32xf32>
    %cst_221 = arith.constant 9.99999974E-6 : f32
    %528 = vector.broadcast %cst_221 : f32 to vector<8x1xf32>
    %529 = arith.addf %525, %528 : vector<8x1xf32>
    %530 = math.rsqrt %529 : vector<8x1xf32>
    %531 = vector.broadcast %530 : vector<8x1xf32> to vector<8x32xf32>
    %532 = arith.mulf %527, %531 : vector<8x32xf32>
    %533 = vector.broadcast %509 : vector<1x32xf32> to vector<8x32xf32>
    %534 = arith.mulf %532, %533 : vector<8x32xf32>
    %535 = vector.broadcast %511 : vector<1x32xf32> to vector<8x32xf32>
    %536 = arith.addf %534, %535 : vector<8x32xf32>
    %c0_222 = arith.constant 0 : index
    %c0_223 = arith.constant 0 : index
    %c0_224 = arith.constant 0 : index
    %537 = vector.load %arg23[%c0_222, %c0_223, %c0_224] : memref<2x32x32xf32, #tpu.memory_space<vmem>>, vector<1x32x32xf32>
    %538 = vector.shape_cast %537 : vector<1x32x32xf32> to vector<32x32xf32>
    %cst_225 = arith.constant dense<0.000000e+00> : vector<8x32xf32>
    %539 = tpu.matmul %536, %538, %cst_225 {dimension_numbers = #tpu.dot_dimension_numbers<[1], [0], [0], [1], [0, 0, 1, 1], [], []>} : vector<8x32xf32>, vector<32x32xf32>, vector<8x32xf32> -> vector<8x32xf32>
    %c0_226 = arith.constant 0 : index
    %c0_227 = arith.constant 0 : index
    %c0_228 = arith.constant 0 : index
    %540 = vector.load %arg24[%c0_226, %c0_227, %c0_228] : memref<2x1x32xf32, #tpu.memory_space<vmem>>, vector<1x1x32xf32>
    %541 = vector.shape_cast %540 : vector<1x1x32xf32> to vector<1x32xf32>
    %542 = vector.broadcast %541 : vector<1x32xf32> to vector<8x32xf32>
    %543 = arith.addf %539, %542 : vector<8x32xf32>
    %c0_229 = arith.constant 0 : index
    %c0_230 = arith.constant 0 : index
    %c0_231 = arith.constant 0 : index
    %544 = vector.load %arg25[%c0_229, %c0_230, %c0_231] : memref<2x32x64xf32, #tpu.memory_space<vmem>>, vector<1x32x64xf32>
    %545 = vector.shape_cast %544 : vector<1x32x64xf32> to vector<32x64xf32>
    %cst_232 = arith.constant dense<0.000000e+00> : vector<8x64xf32>
    %546 = tpu.matmul %398, %545, %cst_232 {dimension_numbers = #tpu.dot_dimension_numbers<[1], [0], [0], [1], [0, 0, 1, 1], [], []>} : vector<8x32xf32>, vector<32x64xf32>, vector<8x64xf32> -> vector<8x64xf32>
    %c0_233 = arith.constant 0 : index
    %c0_234 = arith.constant 0 : index
    %c0_235 = arith.constant 0 : index
    %547 = vector.load %arg26[%c0_233, %c0_234, %c0_235] : memref<2x1x64xf32, #tpu.memory_space<vmem>>, vector<1x1x64xf32>
    %548 = vector.shape_cast %547 : vector<1x1x64xf32> to vector<1x64xf32>
    %549 = vector.broadcast %548 : vector<1x64xf32> to vector<8x64xf32>
    %550 = arith.addf %546, %549 : vector<8x64xf32>
    %551 = vector.extract_strided_slice %550 {offsets = [0, 0], sizes = [8, 32], strides = [1, 1]} : vector<8x64xf32> to vector<8x32xf32>
    %552 = vector.extract_strided_slice %550 {offsets = [0, 32], sizes = [8, 32], strides = [1, 1]} : vector<8x64xf32> to vector<8x32xf32>
    %c0_236 = arith.constant 0 : index
    %c0_237 = arith.constant 0 : index
    %c0_238 = arith.constant 0 : index
    %553 = vector.load %arg27[%c0_236, %c0_237, %c0_238] : memref<2x32x32xf32, #tpu.memory_space<vmem>>, vector<1x32x32xf32>
    %554 = vector.shape_cast %553 : vector<1x32x32xf32> to vector<32x32xf32>
    %c0_239 = arith.constant 0 : index
    %c0_240 = arith.constant 0 : index
    %c0_241 = arith.constant 0 : index
    %555 = vector.load %arg28[%c0_239, %c0_240, %c0_241] : memref<2x1x32xf32, #tpu.memory_space<vmem>>, vector<1x1x32xf32>
    %556 = vector.shape_cast %555 : vector<1x1x32xf32> to vector<1x32xf32>
    %cst_242 = arith.constant 0.000000e+00 : f32
    %557 = vector.broadcast %cst_242 : f32 to vector<8x32xf32>
    %558 = vector.extract_strided_slice %543 {offsets = [0, 0], sizes = [8, 8], strides = [1, 1]} : vector<8x32xf32> to vector<8x8xf32>
    %cst_243 = arith.constant 0.353553385 : f32
    %559 = vector.broadcast %cst_243 : f32 to vector<8x8xf32>
    %560 = arith.mulf %558, %559 : vector<8x8xf32>
    %561 = vector.extract_strided_slice %551 {offsets = [0, 0], sizes = [8, 8], strides = [1, 1]} : vector<8x32xf32> to vector<8x8xf32>
    %562 = vector.extract_strided_slice %552 {offsets = [0, 0], sizes = [8, 8], strides = [1, 1]} : vector<8x32xf32> to vector<8x8xf32>
    %563 = tpu.transpose %561, [1, 0] : vector<8x8xf32> -> vector<8x8xf32>
    %cst_244 = arith.constant dense<0.000000e+00> : vector<8x8xf32>
    %564 = tpu.matmul %560, %563, %cst_244 {dimension_numbers = #tpu.dot_dimension_numbers<[1], [0], [0], [1], [0, 0, 1, 1], [], []>} : vector<8x8xf32>, vector<8x8xf32>, vector<8x8xf32> -> vector<8x8xf32>
    %cst_245 = arith.constant -1.000000e+10 : f32
    %565 = vector.shape_cast %7 : vector<1x8xi1> to vector<1x8xi1>
    %566 = vector.broadcast %565 : vector<1x8xi1> to vector<8x8xi1>
    %567 = vector.broadcast %cst_245 : f32 to vector<8x8xf32>
    %568 = arith.select %566, %567, %564 : vector<8x8xi1>, vector<8x8xf32>
    %cst_246 = arith.constant dense<0xFF800000> : vector<8xf32>
    %569 = vector.multi_reduction <maximumf>, %568, %cst_246 [1] : vector<8x8xf32> to vector<8xf32>
    %570 = vector.shape_cast %569 : vector<8xf32> to vector<8x1xf32>
    %571 = vector.broadcast %570 : vector<8x1xf32> to vector<8x8xf32>
    %572 = arith.subf %568, %571 : vector<8x8xf32>
    %573 = math.exp %572 : vector<8x8xf32>
    %cst_247 = arith.constant dense<0.000000e+00> : vector<8xf32>
    %574 = vector.multi_reduction <add>, %573, %cst_247 [1] : vector<8x8xf32> to vector<8xf32>
    %575 = vector.shape_cast %574 : vector<8xf32> to vector<8x1xf32>
    %576 = tpu.reciprocal %575 {approx = true} : vector<8x1xf32> -> vector<8x1xf32>
    %577 = vector.broadcast %576 : vector<8x1xf32> to vector<8x8xf32>
    %578 = arith.mulf %573, %577 : vector<8x8xf32>
    %cst_248 = arith.constant dense<0.000000e+00> : vector<8x8xf32>
    %579 = tpu.matmul %578, %562, %cst_248 {dimension_numbers = #tpu.dot_dimension_numbers<[1], [0], [0], [1], [0, 0, 1, 1], [], []>} : vector<8x8xf32>, vector<8x8xf32>, vector<8x8xf32> -> vector<8x8xf32>
    %580 = vector.extract_strided_slice %554 {offsets = [0, 0], sizes = [8, 32], strides = [1, 1]} : vector<32x32xf32> to vector<8x32xf32>
    %cst_249 = arith.constant dense<0.000000e+00> : vector<8x32xf32>
    %581 = tpu.matmul %579, %580, %cst_249 {dimension_numbers = #tpu.dot_dimension_numbers<[1], [0], [0], [1], [0, 0, 1, 1], [], []>} : vector<8x8xf32>, vector<8x32xf32>, vector<8x32xf32> -> vector<8x32xf32>
    %582 = arith.addf %557, %581 : vector<8x32xf32>
    %583 = vector.extract_strided_slice %543 {offsets = [0, 8], sizes = [8, 8], strides = [1, 1]} : vector<8x32xf32> to vector<8x8xf32>
    %cst_250 = arith.constant 0.353553385 : f32
    %584 = vector.broadcast %cst_250 : f32 to vector<8x8xf32>
    %585 = arith.mulf %583, %584 : vector<8x8xf32>
    %586 = vector.extract_strided_slice %551 {offsets = [0, 8], sizes = [8, 8], strides = [1, 1]} : vector<8x32xf32> to vector<8x8xf32>
    %587 = vector.extract_strided_slice %552 {offsets = [0, 8], sizes = [8, 8], strides = [1, 1]} : vector<8x32xf32> to vector<8x8xf32>
    %588 = tpu.transpose %586, [1, 0] : vector<8x8xf32> -> vector<8x8xf32>
    %cst_251 = arith.constant dense<0.000000e+00> : vector<8x8xf32>
    %589 = tpu.matmul %585, %588, %cst_251 {dimension_numbers = #tpu.dot_dimension_numbers<[1], [0], [0], [1], [0, 0, 1, 1], [], []>} : vector<8x8xf32>, vector<8x8xf32>, vector<8x8xf32> -> vector<8x8xf32>
    %cst_252 = arith.constant -1.000000e+10 : f32
    %590 = vector.shape_cast %7 : vector<1x8xi1> to vector<1x8xi1>
    %591 = vector.broadcast %590 : vector<1x8xi1> to vector<8x8xi1>
    %592 = vector.broadcast %cst_252 : f32 to vector<8x8xf32>
    %593 = arith.select %591, %592, %589 : vector<8x8xi1>, vector<8x8xf32>
    %cst_253 = arith.constant dense<0xFF800000> : vector<8xf32>
    %594 = vector.multi_reduction <maximumf>, %593, %cst_253 [1] : vector<8x8xf32> to vector<8xf32>
    %595 = vector.shape_cast %594 : vector<8xf32> to vector<8x1xf32>
    %596 = vector.broadcast %595 : vector<8x1xf32> to vector<8x8xf32>
    %597 = arith.subf %593, %596 : vector<8x8xf32>
    %598 = math.exp %597 : vector<8x8xf32>
    %cst_254 = arith.constant dense<0.000000e+00> : vector<8xf32>
    %599 = vector.multi_reduction <add>, %598, %cst_254 [1] : vector<8x8xf32> to vector<8xf32>
    %600 = vector.shape_cast %599 : vector<8xf32> to vector<8x1xf32>
    %601 = tpu.reciprocal %600 {approx = true} : vector<8x1xf32> -> vector<8x1xf32>
    %602 = vector.broadcast %601 : vector<8x1xf32> to vector<8x8xf32>
    %603 = arith.mulf %598, %602 : vector<8x8xf32>
    %cst_255 = arith.constant dense<0.000000e+00> : vector<8x8xf32>
    %604 = tpu.matmul %603, %587, %cst_255 {dimension_numbers = #tpu.dot_dimension_numbers<[1], [0], [0], [1], [0, 0, 1, 1], [], []>} : vector<8x8xf32>, vector<8x8xf32>, vector<8x8xf32> -> vector<8x8xf32>
    %605 = vector.extract_strided_slice %554 {offsets = [8, 0], sizes = [8, 32], strides = [1, 1]} : vector<32x32xf32> to vector<8x32xf32>
    %cst_256 = arith.constant dense<0.000000e+00> : vector<8x32xf32>
    %606 = tpu.matmul %604, %605, %cst_256 {dimension_numbers = #tpu.dot_dimension_numbers<[1], [0], [0], [1], [0, 0, 1, 1], [], []>} : vector<8x8xf32>, vector<8x32xf32>, vector<8x32xf32> -> vector<8x32xf32>
    %607 = arith.addf %582, %606 : vector<8x32xf32>
    %608 = vector.extract_strided_slice %543 {offsets = [0, 16], sizes = [8, 8], strides = [1, 1]} : vector<8x32xf32> to vector<8x8xf32>
    %cst_257 = arith.constant 0.353553385 : f32
    %609 = vector.broadcast %cst_257 : f32 to vector<8x8xf32>
    %610 = arith.mulf %608, %609 : vector<8x8xf32>
    %611 = vector.extract_strided_slice %551 {offsets = [0, 16], sizes = [8, 8], strides = [1, 1]} : vector<8x32xf32> to vector<8x8xf32>
    %612 = vector.extract_strided_slice %552 {offsets = [0, 16], sizes = [8, 8], strides = [1, 1]} : vector<8x32xf32> to vector<8x8xf32>
    %613 = tpu.transpose %611, [1, 0] : vector<8x8xf32> -> vector<8x8xf32>
    %cst_258 = arith.constant dense<0.000000e+00> : vector<8x8xf32>
    %614 = tpu.matmul %610, %613, %cst_258 {dimension_numbers = #tpu.dot_dimension_numbers<[1], [0], [0], [1], [0, 0, 1, 1], [], []>} : vector<8x8xf32>, vector<8x8xf32>, vector<8x8xf32> -> vector<8x8xf32>
    %cst_259 = arith.constant -1.000000e+10 : f32
    %615 = vector.shape_cast %7 : vector<1x8xi1> to vector<1x8xi1>
    %616 = vector.broadcast %615 : vector<1x8xi1> to vector<8x8xi1>
    %617 = vector.broadcast %cst_259 : f32 to vector<8x8xf32>
    %618 = arith.select %616, %617, %614 : vector<8x8xi1>, vector<8x8xf32>
    %cst_260 = arith.constant dense<0xFF800000> : vector<8xf32>
    %619 = vector.multi_reduction <maximumf>, %618, %cst_260 [1] : vector<8x8xf32> to vector<8xf32>
    %620 = vector.shape_cast %619 : vector<8xf32> to vector<8x1xf32>
    %621 = vector.broadcast %620 : vector<8x1xf32> to vector<8x8xf32>
    %622 = arith.subf %618, %621 : vector<8x8xf32>
    %623 = math.exp %622 : vector<8x8xf32>
    %cst_261 = arith.constant dense<0.000000e+00> : vector<8xf32>
    %624 = vector.multi_reduction <add>, %623, %cst_261 [1] : vector<8x8xf32> to vector<8xf32>
    %625 = vector.shape_cast %624 : vector<8xf32> to vector<8x1xf32>
    %626 = tpu.reciprocal %625 {approx = true} : vector<8x1xf32> -> vector<8x1xf32>
    %627 = vector.broadcast %626 : vector<8x1xf32> to vector<8x8xf32>
    %628 = arith.mulf %623, %627 : vector<8x8xf32>
    %cst_262 = arith.constant dense<0.000000e+00> : vector<8x8xf32>
    %629 = tpu.matmul %628, %612, %cst_262 {dimension_numbers = #tpu.dot_dimension_numbers<[1], [0], [0], [1], [0, 0, 1, 1], [], []>} : vector<8x8xf32>, vector<8x8xf32>, vector<8x8xf32> -> vector<8x8xf32>
    %630 = vector.extract_strided_slice %554 {offsets = [16, 0], sizes = [8, 32], strides = [1, 1]} : vector<32x32xf32> to vector<8x32xf32>
    %cst_263 = arith.constant dense<0.000000e+00> : vector<8x32xf32>
    %631 = tpu.matmul %629, %630, %cst_263 {dimension_numbers = #tpu.dot_dimension_numbers<[1], [0], [0], [1], [0, 0, 1, 1], [], []>} : vector<8x8xf32>, vector<8x32xf32>, vector<8x32xf32> -> vector<8x32xf32>
    %632 = arith.addf %607, %631 : vector<8x32xf32>
    %633 = vector.extract_strided_slice %543 {offsets = [0, 24], sizes = [8, 8], strides = [1, 1]} : vector<8x32xf32> to vector<8x8xf32>
    %cst_264 = arith.constant 0.353553385 : f32
    %634 = vector.broadcast %cst_264 : f32 to vector<8x8xf32>
    %635 = arith.mulf %633, %634 : vector<8x8xf32>
    %636 = vector.extract_strided_slice %551 {offsets = [0, 24], sizes = [8, 8], strides = [1, 1]} : vector<8x32xf32> to vector<8x8xf32>
    %637 = vector.extract_strided_slice %552 {offsets = [0, 24], sizes = [8, 8], strides = [1, 1]} : vector<8x32xf32> to vector<8x8xf32>
    %638 = tpu.transpose %636, [1, 0] : vector<8x8xf32> -> vector<8x8xf32>
    %cst_265 = arith.constant dense<0.000000e+00> : vector<8x8xf32>
    %639 = tpu.matmul %635, %638, %cst_265 {dimension_numbers = #tpu.dot_dimension_numbers<[1], [0], [0], [1], [0, 0, 1, 1], [], []>} : vector<8x8xf32>, vector<8x8xf32>, vector<8x8xf32> -> vector<8x8xf32>
    %cst_266 = arith.constant -1.000000e+10 : f32
    %640 = vector.shape_cast %7 : vector<1x8xi1> to vector<1x8xi1>
    %641 = vector.broadcast %640 : vector<1x8xi1> to vector<8x8xi1>
    %642 = vector.broadcast %cst_266 : f32 to vector<8x8xf32>
    %643 = arith.select %641, %642, %639 : vector<8x8xi1>, vector<8x8xf32>
    %cst_267 = arith.constant dense<0xFF800000> : vector<8xf32>
    %644 = vector.multi_reduction <maximumf>, %643, %cst_267 [1] : vector<8x8xf32> to vector<8xf32>
    %645 = vector.shape_cast %644 : vector<8xf32> to vector<8x1xf32>
    %646 = vector.broadcast %645 : vector<8x1xf32> to vector<8x8xf32>
    %647 = arith.subf %643, %646 : vector<8x8xf32>
    %648 = math.exp %647 : vector<8x8xf32>
    %cst_268 = arith.constant dense<0.000000e+00> : vector<8xf32>
    %649 = vector.multi_reduction <add>, %648, %cst_268 [1] : vector<8x8xf32> to vector<8xf32>
    %650 = vector.shape_cast %649 : vector<8xf32> to vector<8x1xf32>
    %651 = tpu.reciprocal %650 {approx = true} : vector<8x1xf32> -> vector<8x1xf32>
    %652 = vector.broadcast %651 : vector<8x1xf32> to vector<8x8xf32>
    %653 = arith.mulf %648, %652 : vector<8x8xf32>
    %cst_269 = arith.constant dense<0.000000e+00> : vector<8x8xf32>
    %654 = tpu.matmul %653, %637, %cst_269 {dimension_numbers = #tpu.dot_dimension_numbers<[1], [0], [0], [1], [0, 0, 1, 1], [], []>} : vector<8x8xf32>, vector<8x8xf32>, vector<8x8xf32> -> vector<8x8xf32>
    %655 = vector.extract_strided_slice %554 {offsets = [24, 0], sizes = [8, 32], strides = [1, 1]} : vector<32x32xf32> to vector<8x32xf32>
    %cst_270 = arith.constant dense<0.000000e+00> : vector<8x32xf32>
    %656 = tpu.matmul %654, %655, %cst_270 {dimension_numbers = #tpu.dot_dimension_numbers<[1], [0], [0], [1], [0, 0, 1, 1], [], []>} : vector<8x8xf32>, vector<8x32xf32>, vector<8x32xf32> -> vector<8x32xf32>
    %657 = arith.addf %632, %656 : vector<8x32xf32>
    %658 = vector.broadcast %556 : vector<1x32xf32> to vector<8x32xf32>
    %659 = arith.addf %657, %658 : vector<8x32xf32>
    %c0_271 = arith.constant 0 : index
    %c0_272 = arith.constant 0 : index
    %c0_273 = arith.constant 0 : index
    %660 = vector.load %arg29[%c0_271, %c0_272, %c0_273] : memref<2x1x32xf32, #tpu.memory_space<vmem>>, vector<1x1x32xf32>
    %661 = vector.shape_cast %660 : vector<1x1x32xf32> to vector<1x32xf32>
    %c0_274 = arith.constant 0 : index
    %c0_275 = arith.constant 0 : index
    %c0_276 = arith.constant 0 : index
    %662 = vector.load %arg30[%c0_274, %c0_275, %c0_276] : memref<2x1x32xf32, #tpu.memory_space<vmem>>, vector<1x1x32xf32>
    %663 = vector.shape_cast %662 : vector<1x1x32xf32> to vector<1x32xf32>
    %664 = arith.addf %536, %659 : vector<8x32xf32>
    %cst_277 = arith.constant dense<0.000000e+00> : vector<8xf32>
    %665 = vector.multi_reduction <add>, %664, %cst_277 [1] : vector<8x32xf32> to vector<8xf32>
    %666 = vector.shape_cast %665 : vector<8xf32> to vector<8x1xf32>
    %cst_278 = arith.constant 3.200000e+01 : f32
    %667 = vector.broadcast %cst_278 : f32 to vector<8x1xf32>
    %668 = arith.divf %666, %667 : vector<8x1xf32>
    %669 = vector.broadcast %668 : vector<8x1xf32> to vector<8x32xf32>
    %670 = arith.subf %664, %669 : vector<8x32xf32>
    %671 = vector.broadcast %668 : vector<8x1xf32> to vector<8x32xf32>
    %672 = arith.subf %664, %671 : vector<8x32xf32>
    %673 = arith.mulf %670, %672 : vector<8x32xf32>
    %cst_279 = arith.constant dense<0.000000e+00> : vector<8xf32>
    %674 = vector.multi_reduction <add>, %673, %cst_279 [1] : vector<8x32xf32> to vector<8xf32>
    %675 = vector.shape_cast %674 : vector<8xf32> to vector<8x1xf32>
    %cst_280 = arith.constant 3.200000e+01 : f32
    %676 = vector.broadcast %cst_280 : f32 to vector<8x1xf32>
    %677 = arith.divf %675, %676 : vector<8x1xf32>
    %678 = vector.broadcast %668 : vector<8x1xf32> to vector<8x32xf32>
    %679 = arith.subf %664, %678 : vector<8x32xf32>
    %cst_281 = arith.constant 9.99999974E-6 : f32
    %680 = vector.broadcast %cst_281 : f32 to vector<8x1xf32>
    %681 = arith.addf %677, %680 : vector<8x1xf32>
    %682 = math.rsqrt %681 : vector<8x1xf32>
    %683 = vector.broadcast %682 : vector<8x1xf32> to vector<8x32xf32>
    %684 = arith.mulf %679, %683 : vector<8x32xf32>
    %685 = vector.broadcast %661 : vector<1x32xf32> to vector<8x32xf32>
    %686 = arith.mulf %684, %685 : vector<8x32xf32>
    %687 = vector.broadcast %663 : vector<1x32xf32> to vector<8x32xf32>
    %688 = arith.addf %686, %687 : vector<8x32xf32>
    %c0_282 = arith.constant 0 : index
    %c0_283 = arith.constant 0 : index
    %c0_284 = arith.constant 0 : index
    %689 = vector.load %arg31[%c0_282, %c0_283, %c0_284] : memref<2x32x64xf32, #tpu.memory_space<vmem>>, vector<1x32x64xf32>
    %690 = vector.shape_cast %689 : vector<1x32x64xf32> to vector<32x64xf32>
    %c0_285 = arith.constant 0 : index
    %c0_286 = arith.constant 0 : index
    %c0_287 = arith.constant 0 : index
    %691 = vector.load %arg32[%c0_285, %c0_286, %c0_287] : memref<2x1x64xf32, #tpu.memory_space<vmem>>, vector<1x1x64xf32>
    %692 = vector.shape_cast %691 : vector<1x1x64xf32> to vector<1x64xf32>
    %c0_288 = arith.constant 0 : index
    %c0_289 = arith.constant 0 : index
    %c0_290 = arith.constant 0 : index
    %693 = vector.load %arg33[%c0_288, %c0_289, %c0_290] : memref<2x64x32xf32, #tpu.memory_space<vmem>>, vector<1x64x32xf32>
    %694 = vector.shape_cast %693 : vector<1x64x32xf32> to vector<64x32xf32>
    %c0_291 = arith.constant 0 : index
    %c0_292 = arith.constant 0 : index
    %c0_293 = arith.constant 0 : index
    %695 = vector.load %arg34[%c0_291, %c0_292, %c0_293] : memref<2x1x32xf32, #tpu.memory_space<vmem>>, vector<1x1x32xf32>
    %696 = vector.shape_cast %695 : vector<1x1x32xf32> to vector<1x32xf32>
    %cst_294 = arith.constant dense<0.000000e+00> : vector<8x64xf32>
    %697 = tpu.matmul %688, %690, %cst_294 {dimension_numbers = #tpu.dot_dimension_numbers<[1], [0], [0], [1], [0, 0, 1, 1], [], []>} : vector<8x32xf32>, vector<32x64xf32>, vector<8x64xf32> -> vector<8x64xf32>
    %698 = vector.broadcast %692 : vector<1x64xf32> to vector<8x64xf32>
    %699 = arith.addf %697, %698 : vector<8x64xf32>
    %cst_295 = arith.constant 0.000000e+00 : f32
    %700 = vector.broadcast %cst_295 : f32 to vector<8x64xf32>
    %701 = arith.maximumf %699, %700 : vector<8x64xf32>
    %cst_296 = arith.constant dense<0.000000e+00> : vector<8x32xf32>
    %702 = tpu.matmul %701, %694, %cst_296 {dimension_numbers = #tpu.dot_dimension_numbers<[1], [0], [0], [1], [0, 0, 1, 1], [], []>} : vector<8x64xf32>, vector<64x32xf32>, vector<8x32xf32> -> vector<8x32xf32>
    %703 = vector.broadcast %696 : vector<1x32xf32> to vector<8x32xf32>
    %704 = arith.addf %702, %703 : vector<8x32xf32>
    %c0_297 = arith.constant 0 : index
    %c0_298 = arith.constant 0 : index
    %c0_299 = arith.constant 0 : index
    %705 = vector.load %arg35[%c0_297, %c0_298, %c0_299] : memref<2x1x32xf32, #tpu.memory_space<vmem>>, vector<1x1x32xf32>
    %706 = vector.shape_cast %705 : vector<1x1x32xf32> to vector<1x32xf32>
    %c0_300 = arith.constant 0 : index
    %c0_301 = arith.constant 0 : index
    %c0_302 = arith.constant 0 : index
    %707 = vector.load %arg36[%c0_300, %c0_301, %c0_302] : memref<2x1x32xf32, #tpu.memory_space<vmem>>, vector<1x1x32xf32>
    %708 = vector.shape_cast %707 : vector<1x1x32xf32> to vector<1x32xf32>
    %709 = arith.addf %688, %704 : vector<8x32xf32>
    %cst_303 = arith.constant dense<0.000000e+00> : vector<8xf32>
    %710 = vector.multi_reduction <add>, %709, %cst_303 [1] : vector<8x32xf32> to vector<8xf32>
    %711 = vector.shape_cast %710 : vector<8xf32> to vector<8x1xf32>
    %cst_304 = arith.constant 3.200000e+01 : f32
    %712 = vector.broadcast %cst_304 : f32 to vector<8x1xf32>
    %713 = arith.divf %711, %712 : vector<8x1xf32>
    %714 = vector.broadcast %713 : vector<8x1xf32> to vector<8x32xf32>
    %715 = arith.subf %709, %714 : vector<8x32xf32>
    %716 = vector.broadcast %713 : vector<8x1xf32> to vector<8x32xf32>
    %717 = arith.subf %709, %716 : vector<8x32xf32>
    %718 = arith.mulf %715, %717 : vector<8x32xf32>
    %cst_305 = arith.constant dense<0.000000e+00> : vector<8xf32>
    %719 = vector.multi_reduction <add>, %718, %cst_305 [1] : vector<8x32xf32> to vector<8xf32>
    %720 = vector.shape_cast %719 : vector<8xf32> to vector<8x1xf32>
    %cst_306 = arith.constant 3.200000e+01 : f32
    %721 = vector.broadcast %cst_306 : f32 to vector<8x1xf32>
    %722 = arith.divf %720, %721 : vector<8x1xf32>
    %723 = vector.broadcast %713 : vector<8x1xf32> to vector<8x32xf32>
    %724 = arith.subf %709, %723 : vector<8x32xf32>
    %cst_307 = arith.constant 9.99999974E-6 : f32
    %725 = vector.broadcast %cst_307 : f32 to vector<8x1xf32>
    %726 = arith.addf %722, %725 : vector<8x1xf32>
    %727 = math.rsqrt %726 : vector<8x1xf32>
    %728 = vector.broadcast %727 : vector<8x1xf32> to vector<8x32xf32>
    %729 = arith.mulf %724, %728 : vector<8x32xf32>
    %730 = vector.broadcast %706 : vector<1x32xf32> to vector<8x32xf32>
    %731 = arith.mulf %729, %730 : vector<8x32xf32>
    %732 = vector.broadcast %708 : vector<1x32xf32> to vector<8x32xf32>
    %733 = arith.addf %731, %732 : vector<8x32xf32>
    %c1_308 = arith.constant 1 : index
    %c0_309 = arith.constant 0 : index
    %c0_310 = arith.constant 0 : index
    %734 = vector.load %arg17[%c1_308, %c0_309, %c0_310] : memref<2x32x96xf32, #tpu.memory_space<vmem>>, vector<1x32x96xf32>
    %735 = vector.shape_cast %734 : vector<1x32x96xf32> to vector<32x96xf32>
    %cst_311 = arith.constant dense<0.000000e+00> : vector<8x96xf32>
    %736 = tpu.matmul %733, %735, %cst_311 {dimension_numbers = #tpu.dot_dimension_numbers<[1], [0], [0], [1], [0, 0, 1, 1], [], []>} : vector<8x32xf32>, vector<32x96xf32>, vector<8x96xf32> -> vector<8x96xf32>
    %c1_312 = arith.constant 1 : index
    %c0_313 = arith.constant 0 : index
    %c0_314 = arith.constant 0 : index
    %737 = vector.load %arg18[%c1_312, %c0_313, %c0_314] : memref<2x1x96xf32, #tpu.memory_space<vmem>>, vector<1x1x96xf32>
    %738 = vector.shape_cast %737 : vector<1x1x96xf32> to vector<1x96xf32>
    %739 = vector.broadcast %738 : vector<1x96xf32> to vector<8x96xf32>
    %740 = arith.addf %736, %739 : vector<8x96xf32>
    %741 = vector.extract_strided_slice %740 {offsets = [0, 0], sizes = [8, 32], strides = [1, 1]} : vector<8x96xf32> to vector<8x32xf32>
    %742 = vector.extract_strided_slice %740 {offsets = [0, 32], sizes = [8, 32], strides = [1, 1]} : vector<8x96xf32> to vector<8x32xf32>
    %743 = vector.extract_strided_slice %740 {offsets = [0, 64], sizes = [8, 32], strides = [1, 1]} : vector<8x96xf32> to vector<8x32xf32>
    %c1_315 = arith.constant 1 : index
    %c0_316 = arith.constant 0 : index
    %c0_317 = arith.constant 0 : index
    %744 = vector.load %arg19[%c1_315, %c0_316, %c0_317] : memref<2x32x32xf32, #tpu.memory_space<vmem>>, vector<1x32x32xf32>
    %745 = vector.shape_cast %744 : vector<1x32x32xf32> to vector<32x32xf32>
    %c1_318 = arith.constant 1 : index
    %c0_319 = arith.constant 0 : index
    %c0_320 = arith.constant 0 : index
    %746 = vector.load %arg20[%c1_318, %c0_319, %c0_320] : memref<2x1x32xf32, #tpu.memory_space<vmem>>, vector<1x1x32xf32>
    %747 = vector.shape_cast %746 : vector<1x1x32xf32> to vector<1x32xf32>
    %cst_321 = arith.constant 0.000000e+00 : f32
    %748 = vector.broadcast %cst_321 : f32 to vector<8x32xf32>
    %749 = vector.extract_strided_slice %741 {offsets = [0, 0], sizes = [8, 8], strides = [1, 1]} : vector<8x32xf32> to vector<8x8xf32>
    %cst_322 = arith.constant 0.353553385 : f32
    %750 = vector.broadcast %cst_322 : f32 to vector<8x8xf32>
    %751 = arith.mulf %749, %750 : vector<8x8xf32>
    %752 = vector.extract_strided_slice %742 {offsets = [0, 0], sizes = [8, 8], strides = [1, 1]} : vector<8x32xf32> to vector<8x8xf32>
    %753 = vector.extract_strided_slice %743 {offsets = [0, 0], sizes = [8, 8], strides = [1, 1]} : vector<8x32xf32> to vector<8x8xf32>
    %754 = tpu.transpose %752, [1, 0] : vector<8x8xf32> -> vector<8x8xf32>
    %cst_323 = arith.constant dense<0.000000e+00> : vector<8x8xf32>
    %755 = tpu.matmul %751, %754, %cst_323 {dimension_numbers = #tpu.dot_dimension_numbers<[1], [0], [0], [1], [0, 0, 1, 1], [], []>} : vector<8x8xf32>, vector<8x8xf32>, vector<8x8xf32> -> vector<8x8xf32>
    %cst_324 = arith.constant -1.000000e+10 : f32
    %756 = vector.broadcast %cst_324 : f32 to vector<8x8xf32>
    %757 = arith.select %16, %756, %755 : vector<8x8xi1>, vector<8x8xf32>
    %cst_325 = arith.constant dense<0xFF800000> : vector<8xf32>
    %758 = vector.multi_reduction <maximumf>, %757, %cst_325 [1] : vector<8x8xf32> to vector<8xf32>
    %759 = vector.shape_cast %758 : vector<8xf32> to vector<8x1xf32>
    %760 = vector.broadcast %759 : vector<8x1xf32> to vector<8x8xf32>
    %761 = arith.subf %757, %760 : vector<8x8xf32>
    %762 = math.exp %761 : vector<8x8xf32>
    %cst_326 = arith.constant dense<0.000000e+00> : vector<8xf32>
    %763 = vector.multi_reduction <add>, %762, %cst_326 [1] : vector<8x8xf32> to vector<8xf32>
    %764 = vector.shape_cast %763 : vector<8xf32> to vector<8x1xf32>
    %765 = tpu.reciprocal %764 {approx = true} : vector<8x1xf32> -> vector<8x1xf32>
    %766 = vector.broadcast %765 : vector<8x1xf32> to vector<8x8xf32>
    %767 = arith.mulf %762, %766 : vector<8x8xf32>
    %cst_327 = arith.constant dense<0.000000e+00> : vector<8x8xf32>
    %768 = tpu.matmul %767, %753, %cst_327 {dimension_numbers = #tpu.dot_dimension_numbers<[1], [0], [0], [1], [0, 0, 1, 1], [], []>} : vector<8x8xf32>, vector<8x8xf32>, vector<8x8xf32> -> vector<8x8xf32>
    %769 = vector.extract_strided_slice %745 {offsets = [0, 0], sizes = [8, 32], strides = [1, 1]} : vector<32x32xf32> to vector<8x32xf32>
    %cst_328 = arith.constant dense<0.000000e+00> : vector<8x32xf32>
    %770 = tpu.matmul %768, %769, %cst_328 {dimension_numbers = #tpu.dot_dimension_numbers<[1], [0], [0], [1], [0, 0, 1, 1], [], []>} : vector<8x8xf32>, vector<8x32xf32>, vector<8x32xf32> -> vector<8x32xf32>
    %771 = arith.addf %748, %770 : vector<8x32xf32>
    %772 = vector.extract_strided_slice %741 {offsets = [0, 8], sizes = [8, 8], strides = [1, 1]} : vector<8x32xf32> to vector<8x8xf32>
    %cst_329 = arith.constant 0.353553385 : f32
    %773 = vector.broadcast %cst_329 : f32 to vector<8x8xf32>
    %774 = arith.mulf %772, %773 : vector<8x8xf32>
    %775 = vector.extract_strided_slice %742 {offsets = [0, 8], sizes = [8, 8], strides = [1, 1]} : vector<8x32xf32> to vector<8x8xf32>
    %776 = vector.extract_strided_slice %743 {offsets = [0, 8], sizes = [8, 8], strides = [1, 1]} : vector<8x32xf32> to vector<8x8xf32>
    %777 = tpu.transpose %775, [1, 0] : vector<8x8xf32> -> vector<8x8xf32>
    %cst_330 = arith.constant dense<0.000000e+00> : vector<8x8xf32>
    %778 = tpu.matmul %774, %777, %cst_330 {dimension_numbers = #tpu.dot_dimension_numbers<[1], [0], [0], [1], [0, 0, 1, 1], [], []>} : vector<8x8xf32>, vector<8x8xf32>, vector<8x8xf32> -> vector<8x8xf32>
    %cst_331 = arith.constant -1.000000e+10 : f32
    %779 = vector.broadcast %cst_331 : f32 to vector<8x8xf32>
    %780 = arith.select %16, %779, %778 : vector<8x8xi1>, vector<8x8xf32>
    %cst_332 = arith.constant dense<0xFF800000> : vector<8xf32>
    %781 = vector.multi_reduction <maximumf>, %780, %cst_332 [1] : vector<8x8xf32> to vector<8xf32>
    %782 = vector.shape_cast %781 : vector<8xf32> to vector<8x1xf32>
    %783 = vector.broadcast %782 : vector<8x1xf32> to vector<8x8xf32>
    %784 = arith.subf %780, %783 : vector<8x8xf32>
    %785 = math.exp %784 : vector<8x8xf32>
    %cst_333 = arith.constant dense<0.000000e+00> : vector<8xf32>
    %786 = vector.multi_reduction <add>, %785, %cst_333 [1] : vector<8x8xf32> to vector<8xf32>
    %787 = vector.shape_cast %786 : vector<8xf32> to vector<8x1xf32>
    %788 = tpu.reciprocal %787 {approx = true} : vector<8x1xf32> -> vector<8x1xf32>
    %789 = vector.broadcast %788 : vector<8x1xf32> to vector<8x8xf32>
    %790 = arith.mulf %785, %789 : vector<8x8xf32>
    %cst_334 = arith.constant dense<0.000000e+00> : vector<8x8xf32>
    %791 = tpu.matmul %790, %776, %cst_334 {dimension_numbers = #tpu.dot_dimension_numbers<[1], [0], [0], [1], [0, 0, 1, 1], [], []>} : vector<8x8xf32>, vector<8x8xf32>, vector<8x8xf32> -> vector<8x8xf32>
    %792 = vector.extract_strided_slice %745 {offsets = [8, 0], sizes = [8, 32], strides = [1, 1]} : vector<32x32xf32> to vector<8x32xf32>
    %cst_335 = arith.constant dense<0.000000e+00> : vector<8x32xf32>
    %793 = tpu.matmul %791, %792, %cst_335 {dimension_numbers = #tpu.dot_dimension_numbers<[1], [0], [0], [1], [0, 0, 1, 1], [], []>} : vector<8x8xf32>, vector<8x32xf32>, vector<8x32xf32> -> vector<8x32xf32>
    %794 = arith.addf %771, %793 : vector<8x32xf32>
    %795 = vector.extract_strided_slice %741 {offsets = [0, 16], sizes = [8, 8], strides = [1, 1]} : vector<8x32xf32> to vector<8x8xf32>
    %cst_336 = arith.constant 0.353553385 : f32
    %796 = vector.broadcast %cst_336 : f32 to vector<8x8xf32>
    %797 = arith.mulf %795, %796 : vector<8x8xf32>
    %798 = vector.extract_strided_slice %742 {offsets = [0, 16], sizes = [8, 8], strides = [1, 1]} : vector<8x32xf32> to vector<8x8xf32>
    %799 = vector.extract_strided_slice %743 {offsets = [0, 16], sizes = [8, 8], strides = [1, 1]} : vector<8x32xf32> to vector<8x8xf32>
    %800 = tpu.transpose %798, [1, 0] : vector<8x8xf32> -> vector<8x8xf32>
    %cst_337 = arith.constant dense<0.000000e+00> : vector<8x8xf32>
    %801 = tpu.matmul %797, %800, %cst_337 {dimension_numbers = #tpu.dot_dimension_numbers<[1], [0], [0], [1], [0, 0, 1, 1], [], []>} : vector<8x8xf32>, vector<8x8xf32>, vector<8x8xf32> -> vector<8x8xf32>
    %cst_338 = arith.constant -1.000000e+10 : f32
    %802 = vector.broadcast %cst_338 : f32 to vector<8x8xf32>
    %803 = arith.select %16, %802, %801 : vector<8x8xi1>, vector<8x8xf32>
    %cst_339 = arith.constant dense<0xFF800000> : vector<8xf32>
    %804 = vector.multi_reduction <maximumf>, %803, %cst_339 [1] : vector<8x8xf32> to vector<8xf32>
    %805 = vector.shape_cast %804 : vector<8xf32> to vector<8x1xf32>
    %806 = vector.broadcast %805 : vector<8x1xf32> to vector<8x8xf32>
    %807 = arith.subf %803, %806 : vector<8x8xf32>
    %808 = math.exp %807 : vector<8x8xf32>
    %cst_340 = arith.constant dense<0.000000e+00> : vector<8xf32>
    %809 = vector.multi_reduction <add>, %808, %cst_340 [1] : vector<8x8xf32> to vector<8xf32>
    %810 = vector.shape_cast %809 : vector<8xf32> to vector<8x1xf32>
    %811 = tpu.reciprocal %810 {approx = true} : vector<8x1xf32> -> vector<8x1xf32>
    %812 = vector.broadcast %811 : vector<8x1xf32> to vector<8x8xf32>
    %813 = arith.mulf %808, %812 : vector<8x8xf32>
    %cst_341 = arith.constant dense<0.000000e+00> : vector<8x8xf32>
    %814 = tpu.matmul %813, %799, %cst_341 {dimension_numbers = #tpu.dot_dimension_numbers<[1], [0], [0], [1], [0, 0, 1, 1], [], []>} : vector<8x8xf32>, vector<8x8xf32>, vector<8x8xf32> -> vector<8x8xf32>
    %815 = vector.extract_strided_slice %745 {offsets = [16, 0], sizes = [8, 32], strides = [1, 1]} : vector<32x32xf32> to vector<8x32xf32>
    %cst_342 = arith.constant dense<0.000000e+00> : vector<8x32xf32>
    %816 = tpu.matmul %814, %815, %cst_342 {dimension_numbers = #tpu.dot_dimension_numbers<[1], [0], [0], [1], [0, 0, 1, 1], [], []>} : vector<8x8xf32>, vector<8x32xf32>, vector<8x32xf32> -> vector<8x32xf32>
    %817 = arith.addf %794, %816 : vector<8x32xf32>
    %818 = vector.extract_strided_slice %741 {offsets = [0, 24], sizes = [8, 8], strides = [1, 1]} : vector<8x32xf32> to vector<8x8xf32>
    %cst_343 = arith.constant 0.353553385 : f32
    %819 = vector.broadcast %cst_343 : f32 to vector<8x8xf32>
    %820 = arith.mulf %818, %819 : vector<8x8xf32>
    %821 = vector.extract_strided_slice %742 {offsets = [0, 24], sizes = [8, 8], strides = [1, 1]} : vector<8x32xf32> to vector<8x8xf32>
    %822 = vector.extract_strided_slice %743 {offsets = [0, 24], sizes = [8, 8], strides = [1, 1]} : vector<8x32xf32> to vector<8x8xf32>
    %823 = tpu.transpose %821, [1, 0] : vector<8x8xf32> -> vector<8x8xf32>
    %cst_344 = arith.constant dense<0.000000e+00> : vector<8x8xf32>
    %824 = tpu.matmul %820, %823, %cst_344 {dimension_numbers = #tpu.dot_dimension_numbers<[1], [0], [0], [1], [0, 0, 1, 1], [], []>} : vector<8x8xf32>, vector<8x8xf32>, vector<8x8xf32> -> vector<8x8xf32>
    %cst_345 = arith.constant -1.000000e+10 : f32
    %825 = vector.broadcast %cst_345 : f32 to vector<8x8xf32>
    %826 = arith.select %16, %825, %824 : vector<8x8xi1>, vector<8x8xf32>
    %cst_346 = arith.constant dense<0xFF800000> : vector<8xf32>
    %827 = vector.multi_reduction <maximumf>, %826, %cst_346 [1] : vector<8x8xf32> to vector<8xf32>
    %828 = vector.shape_cast %827 : vector<8xf32> to vector<8x1xf32>
    %829 = vector.broadcast %828 : vector<8x1xf32> to vector<8x8xf32>
    %830 = arith.subf %826, %829 : vector<8x8xf32>
    %831 = math.exp %830 : vector<8x8xf32>
    %cst_347 = arith.constant dense<0.000000e+00> : vector<8xf32>
    %832 = vector.multi_reduction <add>, %831, %cst_347 [1] : vector<8x8xf32> to vector<8xf32>
    %833 = vector.shape_cast %832 : vector<8xf32> to vector<8x1xf32>
    %834 = tpu.reciprocal %833 {approx = true} : vector<8x1xf32> -> vector<8x1xf32>
    %835 = vector.broadcast %834 : vector<8x1xf32> to vector<8x8xf32>
    %836 = arith.mulf %831, %835 : vector<8x8xf32>
    %cst_348 = arith.constant dense<0.000000e+00> : vector<8x8xf32>
    %837 = tpu.matmul %836, %822, %cst_348 {dimension_numbers = #tpu.dot_dimension_numbers<[1], [0], [0], [1], [0, 0, 1, 1], [], []>} : vector<8x8xf32>, vector<8x8xf32>, vector<8x8xf32> -> vector<8x8xf32>
    %838 = vector.extract_strided_slice %745 {offsets = [24, 0], sizes = [8, 32], strides = [1, 1]} : vector<32x32xf32> to vector<8x32xf32>
    %cst_349 = arith.constant dense<0.000000e+00> : vector<8x32xf32>
    %839 = tpu.matmul %837, %838, %cst_349 {dimension_numbers = #tpu.dot_dimension_numbers<[1], [0], [0], [1], [0, 0, 1, 1], [], []>} : vector<8x8xf32>, vector<8x32xf32>, vector<8x32xf32> -> vector<8x32xf32>
    %840 = arith.addf %817, %839 : vector<8x32xf32>
    %841 = vector.broadcast %747 : vector<1x32xf32> to vector<8x32xf32>
    %842 = arith.addf %840, %841 : vector<8x32xf32>
    %c1_350 = arith.constant 1 : index
    %c0_351 = arith.constant 0 : index
    %c0_352 = arith.constant 0 : index
    %843 = vector.load %arg21[%c1_350, %c0_351, %c0_352] : memref<2x1x32xf32, #tpu.memory_space<vmem>>, vector<1x1x32xf32>
    %844 = vector.shape_cast %843 : vector<1x1x32xf32> to vector<1x32xf32>
    %c1_353 = arith.constant 1 : index
    %c0_354 = arith.constant 0 : index
    %c0_355 = arith.constant 0 : index
    %845 = vector.load %arg22[%c1_353, %c0_354, %c0_355] : memref<2x1x32xf32, #tpu.memory_space<vmem>>, vector<1x1x32xf32>
    %846 = vector.shape_cast %845 : vector<1x1x32xf32> to vector<1x32xf32>
    %847 = arith.addf %733, %842 : vector<8x32xf32>
    %cst_356 = arith.constant dense<0.000000e+00> : vector<8xf32>
    %848 = vector.multi_reduction <add>, %847, %cst_356 [1] : vector<8x32xf32> to vector<8xf32>
    %849 = vector.shape_cast %848 : vector<8xf32> to vector<8x1xf32>
    %cst_357 = arith.constant 3.200000e+01 : f32
    %850 = vector.broadcast %cst_357 : f32 to vector<8x1xf32>
    %851 = arith.divf %849, %850 : vector<8x1xf32>
    %852 = vector.broadcast %851 : vector<8x1xf32> to vector<8x32xf32>
    %853 = arith.subf %847, %852 : vector<8x32xf32>
    %854 = vector.broadcast %851 : vector<8x1xf32> to vector<8x32xf32>
    %855 = arith.subf %847, %854 : vector<8x32xf32>
    %856 = arith.mulf %853, %855 : vector<8x32xf32>
    %cst_358 = arith.constant dense<0.000000e+00> : vector<8xf32>
    %857 = vector.multi_reduction <add>, %856, %cst_358 [1] : vector<8x32xf32> to vector<8xf32>
    %858 = vector.shape_cast %857 : vector<8xf32> to vector<8x1xf32>
    %cst_359 = arith.constant 3.200000e+01 : f32
    %859 = vector.broadcast %cst_359 : f32 to vector<8x1xf32>
    %860 = arith.divf %858, %859 : vector<8x1xf32>
    %861 = vector.broadcast %851 : vector<8x1xf32> to vector<8x32xf32>
    %862 = arith.subf %847, %861 : vector<8x32xf32>
    %cst_360 = arith.constant 9.99999974E-6 : f32
    %863 = vector.broadcast %cst_360 : f32 to vector<8x1xf32>
    %864 = arith.addf %860, %863 : vector<8x1xf32>
    %865 = math.rsqrt %864 : vector<8x1xf32>
    %866 = vector.broadcast %865 : vector<8x1xf32> to vector<8x32xf32>
    %867 = arith.mulf %862, %866 : vector<8x32xf32>
    %868 = vector.broadcast %844 : vector<1x32xf32> to vector<8x32xf32>
    %869 = arith.mulf %867, %868 : vector<8x32xf32>
    %870 = vector.broadcast %846 : vector<1x32xf32> to vector<8x32xf32>
    %871 = arith.addf %869, %870 : vector<8x32xf32>
    %c1_361 = arith.constant 1 : index
    %c0_362 = arith.constant 0 : index
    %c0_363 = arith.constant 0 : index
    %872 = vector.load %arg23[%c1_361, %c0_362, %c0_363] : memref<2x32x32xf32, #tpu.memory_space<vmem>>, vector<1x32x32xf32>
    %873 = vector.shape_cast %872 : vector<1x32x32xf32> to vector<32x32xf32>
    %cst_364 = arith.constant dense<0.000000e+00> : vector<8x32xf32>
    %874 = tpu.matmul %871, %873, %cst_364 {dimension_numbers = #tpu.dot_dimension_numbers<[1], [0], [0], [1], [0, 0, 1, 1], [], []>} : vector<8x32xf32>, vector<32x32xf32>, vector<8x32xf32> -> vector<8x32xf32>
    %c1_365 = arith.constant 1 : index
    %c0_366 = arith.constant 0 : index
    %c0_367 = arith.constant 0 : index
    %875 = vector.load %arg24[%c1_365, %c0_366, %c0_367] : memref<2x1x32xf32, #tpu.memory_space<vmem>>, vector<1x1x32xf32>
    %876 = vector.shape_cast %875 : vector<1x1x32xf32> to vector<1x32xf32>
    %877 = vector.broadcast %876 : vector<1x32xf32> to vector<8x32xf32>
    %878 = arith.addf %874, %877 : vector<8x32xf32>
    %c1_368 = arith.constant 1 : index
    %c0_369 = arith.constant 0 : index
    %c0_370 = arith.constant 0 : index
    %879 = vector.load %arg25[%c1_368, %c0_369, %c0_370] : memref<2x32x64xf32, #tpu.memory_space<vmem>>, vector<1x32x64xf32>
    %880 = vector.shape_cast %879 : vector<1x32x64xf32> to vector<32x64xf32>
    %cst_371 = arith.constant dense<0.000000e+00> : vector<8x64xf32>
    %881 = tpu.matmul %398, %880, %cst_371 {dimension_numbers = #tpu.dot_dimension_numbers<[1], [0], [0], [1], [0, 0, 1, 1], [], []>} : vector<8x32xf32>, vector<32x64xf32>, vector<8x64xf32> -> vector<8x64xf32>
    %c1_372 = arith.constant 1 : index
    %c0_373 = arith.constant 0 : index
    %c0_374 = arith.constant 0 : index
    %882 = vector.load %arg26[%c1_372, %c0_373, %c0_374] : memref<2x1x64xf32, #tpu.memory_space<vmem>>, vector<1x1x64xf32>
    %883 = vector.shape_cast %882 : vector<1x1x64xf32> to vector<1x64xf32>
    %884 = vector.broadcast %883 : vector<1x64xf32> to vector<8x64xf32>
    %885 = arith.addf %881, %884 : vector<8x64xf32>
    %886 = vector.extract_strided_slice %885 {offsets = [0, 0], sizes = [8, 32], strides = [1, 1]} : vector<8x64xf32> to vector<8x32xf32>
    %887 = vector.extract_strided_slice %885 {offsets = [0, 32], sizes = [8, 32], strides = [1, 1]} : vector<8x64xf32> to vector<8x32xf32>
    %c1_375 = arith.constant 1 : index
    %c0_376 = arith.constant 0 : index
    %c0_377 = arith.constant 0 : index
    %888 = vector.load %arg27[%c1_375, %c0_376, %c0_377] : memref<2x32x32xf32, #tpu.memory_space<vmem>>, vector<1x32x32xf32>
    %889 = vector.shape_cast %888 : vector<1x32x32xf32> to vector<32x32xf32>
    %c1_378 = arith.constant 1 : index
    %c0_379 = arith.constant 0 : index
    %c0_380 = arith.constant 0 : index
    %890 = vector.load %arg28[%c1_378, %c0_379, %c0_380] : memref<2x1x32xf32, #tpu.memory_space<vmem>>, vector<1x1x32xf32>
    %891 = vector.shape_cast %890 : vector<1x1x32xf32> to vector<1x32xf32>
    %cst_381 = arith.constant 0.000000e+00 : f32
    %892 = vector.broadcast %cst_381 : f32 to vector<8x32xf32>
    %893 = vector.extract_strided_slice %878 {offsets = [0, 0], sizes = [8, 8], strides = [1, 1]} : vector<8x32xf32> to vector<8x8xf32>
    %cst_382 = arith.constant 0.353553385 : f32
    %894 = vector.broadcast %cst_382 : f32 to vector<8x8xf32>
    %895 = arith.mulf %893, %894 : vector<8x8xf32>
    %896 = vector.extract_strided_slice %886 {offsets = [0, 0], sizes = [8, 8], strides = [1, 1]} : vector<8x32xf32> to vector<8x8xf32>
    %897 = vector.extract_strided_slice %887 {offsets = [0, 0], sizes = [8, 8], strides = [1, 1]} : vector<8x32xf32> to vector<8x8xf32>
    %898 = tpu.transpose %896, [1, 0] : vector<8x8xf32> -> vector<8x8xf32>
    %cst_383 = arith.constant dense<0.000000e+00> : vector<8x8xf32>
    %899 = tpu.matmul %895, %898, %cst_383 {dimension_numbers = #tpu.dot_dimension_numbers<[1], [0], [0], [1], [0, 0, 1, 1], [], []>} : vector<8x8xf32>, vector<8x8xf32>, vector<8x8xf32> -> vector<8x8xf32>
    %cst_384 = arith.constant -1.000000e+10 : f32
    %900 = vector.shape_cast %7 : vector<1x8xi1> to vector<1x8xi1>
    %901 = vector.broadcast %900 : vector<1x8xi1> to vector<8x8xi1>
    %902 = vector.broadcast %cst_384 : f32 to vector<8x8xf32>
    %903 = arith.select %901, %902, %899 : vector<8x8xi1>, vector<8x8xf32>
    %cst_385 = arith.constant dense<0xFF800000> : vector<8xf32>
    %904 = vector.multi_reduction <maximumf>, %903, %cst_385 [1] : vector<8x8xf32> to vector<8xf32>
    %905 = vector.shape_cast %904 : vector<8xf32> to vector<8x1xf32>
    %906 = vector.broadcast %905 : vector<8x1xf32> to vector<8x8xf32>
    %907 = arith.subf %903, %906 : vector<8x8xf32>
    %908 = math.exp %907 : vector<8x8xf32>
    %cst_386 = arith.constant dense<0.000000e+00> : vector<8xf32>
    %909 = vector.multi_reduction <add>, %908, %cst_386 [1] : vector<8x8xf32> to vector<8xf32>
    %910 = vector.shape_cast %909 : vector<8xf32> to vector<8x1xf32>
    %911 = tpu.reciprocal %910 {approx = true} : vector<8x1xf32> -> vector<8x1xf32>
    %912 = vector.broadcast %911 : vector<8x1xf32> to vector<8x8xf32>
    %913 = arith.mulf %908, %912 : vector<8x8xf32>
    %cst_387 = arith.constant dense<0.000000e+00> : vector<8x8xf32>
    %914 = tpu.matmul %913, %897, %cst_387 {dimension_numbers = #tpu.dot_dimension_numbers<[1], [0], [0], [1], [0, 0, 1, 1], [], []>} : vector<8x8xf32>, vector<8x8xf32>, vector<8x8xf32> -> vector<8x8xf32>
    %915 = vector.extract_strided_slice %889 {offsets = [0, 0], sizes = [8, 32], strides = [1, 1]} : vector<32x32xf32> to vector<8x32xf32>
    %cst_388 = arith.constant dense<0.000000e+00> : vector<8x32xf32>
    %916 = tpu.matmul %914, %915, %cst_388 {dimension_numbers = #tpu.dot_dimension_numbers<[1], [0], [0], [1], [0, 0, 1, 1], [], []>} : vector<8x8xf32>, vector<8x32xf32>, vector<8x32xf32> -> vector<8x32xf32>
    %917 = arith.addf %892, %916 : vector<8x32xf32>
    %918 = vector.extract_strided_slice %878 {offsets = [0, 8], sizes = [8, 8], strides = [1, 1]} : vector<8x32xf32> to vector<8x8xf32>
    %cst_389 = arith.constant 0.353553385 : f32
    %919 = vector.broadcast %cst_389 : f32 to vector<8x8xf32>
    %920 = arith.mulf %918, %919 : vector<8x8xf32>
    %921 = vector.extract_strided_slice %886 {offsets = [0, 8], sizes = [8, 8], strides = [1, 1]} : vector<8x32xf32> to vector<8x8xf32>
    %922 = vector.extract_strided_slice %887 {offsets = [0, 8], sizes = [8, 8], strides = [1, 1]} : vector<8x32xf32> to vector<8x8xf32>
    %923 = tpu.transpose %921, [1, 0] : vector<8x8xf32> -> vector<8x8xf32>
    %cst_390 = arith.constant dense<0.000000e+00> : vector<8x8xf32>
    %924 = tpu.matmul %920, %923, %cst_390 {dimension_numbers = #tpu.dot_dimension_numbers<[1], [0], [0], [1], [0, 0, 1, 1], [], []>} : vector<8x8xf32>, vector<8x8xf32>, vector<8x8xf32> -> vector<8x8xf32>
    %cst_391 = arith.constant -1.000000e+10 : f32
    %925 = vector.shape_cast %7 : vector<1x8xi1> to vector<1x8xi1>
    %926 = vector.broadcast %925 : vector<1x8xi1> to vector<8x8xi1>
    %927 = vector.broadcast %cst_391 : f32 to vector<8x8xf32>
    %928 = arith.select %926, %927, %924 : vector<8x8xi1>, vector<8x8xf32>
    %cst_392 = arith.constant dense<0xFF800000> : vector<8xf32>
    %929 = vector.multi_reduction <maximumf>, %928, %cst_392 [1] : vector<8x8xf32> to vector<8xf32>
    %930 = vector.shape_cast %929 : vector<8xf32> to vector<8x1xf32>
    %931 = vector.broadcast %930 : vector<8x1xf32> to vector<8x8xf32>
    %932 = arith.subf %928, %931 : vector<8x8xf32>
    %933 = math.exp %932 : vector<8x8xf32>
    %cst_393 = arith.constant dense<0.000000e+00> : vector<8xf32>
    %934 = vector.multi_reduction <add>, %933, %cst_393 [1] : vector<8x8xf32> to vector<8xf32>
    %935 = vector.shape_cast %934 : vector<8xf32> to vector<8x1xf32>
    %936 = tpu.reciprocal %935 {approx = true} : vector<8x1xf32> -> vector<8x1xf32>
    %937 = vector.broadcast %936 : vector<8x1xf32> to vector<8x8xf32>
    %938 = arith.mulf %933, %937 : vector<8x8xf32>
    %cst_394 = arith.constant dense<0.000000e+00> : vector<8x8xf32>
    %939 = tpu.matmul %938, %922, %cst_394 {dimension_numbers = #tpu.dot_dimension_numbers<[1], [0], [0], [1], [0, 0, 1, 1], [], []>} : vector<8x8xf32>, vector<8x8xf32>, vector<8x8xf32> -> vector<8x8xf32>
    %940 = vector.extract_strided_slice %889 {offsets = [8, 0], sizes = [8, 32], strides = [1, 1]} : vector<32x32xf32> to vector<8x32xf32>
    %cst_395 = arith.constant dense<0.000000e+00> : vector<8x32xf32>
    %941 = tpu.matmul %939, %940, %cst_395 {dimension_numbers = #tpu.dot_dimension_numbers<[1], [0], [0], [1], [0, 0, 1, 1], [], []>} : vector<8x8xf32>, vector<8x32xf32>, vector<8x32xf32> -> vector<8x32xf32>
    %942 = arith.addf %917, %941 : vector<8x32xf32>
    %943 = vector.extract_strided_slice %878 {offsets = [0, 16], sizes = [8, 8], strides = [1, 1]} : vector<8x32xf32> to vector<8x8xf32>
    %cst_396 = arith.constant 0.353553385 : f32
    %944 = vector.broadcast %cst_396 : f32 to vector<8x8xf32>
    %945 = arith.mulf %943, %944 : vector<8x8xf32>
    %946 = vector.extract_strided_slice %886 {offsets = [0, 16], sizes = [8, 8], strides = [1, 1]} : vector<8x32xf32> to vector<8x8xf32>
    %947 = vector.extract_strided_slice %887 {offsets = [0, 16], sizes = [8, 8], strides = [1, 1]} : vector<8x32xf32> to vector<8x8xf32>
    %948 = tpu.transpose %946, [1, 0] : vector<8x8xf32> -> vector<8x8xf32>
    %cst_397 = arith.constant dense<0.000000e+00> : vector<8x8xf32>
    %949 = tpu.matmul %945, %948, %cst_397 {dimension_numbers = #tpu.dot_dimension_numbers<[1], [0], [0], [1], [0, 0, 1, 1], [], []>} : vector<8x8xf32>, vector<8x8xf32>, vector<8x8xf32> -> vector<8x8xf32>
    %cst_398 = arith.constant -1.000000e+10 : f32
    %950 = vector.shape_cast %7 : vector<1x8xi1> to vector<1x8xi1>
    %951 = vector.broadcast %950 : vector<1x8xi1> to vector<8x8xi1>
    %952 = vector.broadcast %cst_398 : f32 to vector<8x8xf32>
    %953 = arith.select %951, %952, %949 : vector<8x8xi1>, vector<8x8xf32>
    %cst_399 = arith.constant dense<0xFF800000> : vector<8xf32>
    %954 = vector.multi_reduction <maximumf>, %953, %cst_399 [1] : vector<8x8xf32> to vector<8xf32>
    %955 = vector.shape_cast %954 : vector<8xf32> to vector<8x1xf32>
    %956 = vector.broadcast %955 : vector<8x1xf32> to vector<8x8xf32>
    %957 = arith.subf %953, %956 : vector<8x8xf32>
    %958 = math.exp %957 : vector<8x8xf32>
    %cst_400 = arith.constant dense<0.000000e+00> : vector<8xf32>
    %959 = vector.multi_reduction <add>, %958, %cst_400 [1] : vector<8x8xf32> to vector<8xf32>
    %960 = vector.shape_cast %959 : vector<8xf32> to vector<8x1xf32>
    %961 = tpu.reciprocal %960 {approx = true} : vector<8x1xf32> -> vector<8x1xf32>
    %962 = vector.broadcast %961 : vector<8x1xf32> to vector<8x8xf32>
    %963 = arith.mulf %958, %962 : vector<8x8xf32>
    %cst_401 = arith.constant dense<0.000000e+00> : vector<8x8xf32>
    %964 = tpu.matmul %963, %947, %cst_401 {dimension_numbers = #tpu.dot_dimension_numbers<[1], [0], [0], [1], [0, 0, 1, 1], [], []>} : vector<8x8xf32>, vector<8x8xf32>, vector<8x8xf32> -> vector<8x8xf32>
    %965 = vector.extract_strided_slice %889 {offsets = [16, 0], sizes = [8, 32], strides = [1, 1]} : vector<32x32xf32> to vector<8x32xf32>
    %cst_402 = arith.constant dense<0.000000e+00> : vector<8x32xf32>
    %966 = tpu.matmul %964, %965, %cst_402 {dimension_numbers = #tpu.dot_dimension_numbers<[1], [0], [0], [1], [0, 0, 1, 1], [], []>} : vector<8x8xf32>, vector<8x32xf32>, vector<8x32xf32> -> vector<8x32xf32>
    %967 = arith.addf %942, %966 : vector<8x32xf32>
    %968 = vector.extract_strided_slice %878 {offsets = [0, 24], sizes = [8, 8], strides = [1, 1]} : vector<8x32xf32> to vector<8x8xf32>
    %cst_403 = arith.constant 0.353553385 : f32
    %969 = vector.broadcast %cst_403 : f32 to vector<8x8xf32>
    %970 = arith.mulf %968, %969 : vector<8x8xf32>
    %971 = vector.extract_strided_slice %886 {offsets = [0, 24], sizes = [8, 8], strides = [1, 1]} : vector<8x32xf32> to vector<8x8xf32>
    %972 = vector.extract_strided_slice %887 {offsets = [0, 24], sizes = [8, 8], strides = [1, 1]} : vector<8x32xf32> to vector<8x8xf32>
    %973 = tpu.transpose %971, [1, 0] : vector<8x8xf32> -> vector<8x8xf32>
    %cst_404 = arith.constant dense<0.000000e+00> : vector<8x8xf32>
    %974 = tpu.matmul %970, %973, %cst_404 {dimension_numbers = #tpu.dot_dimension_numbers<[1], [0], [0], [1], [0, 0, 1, 1], [], []>} : vector<8x8xf32>, vector<8x8xf32>, vector<8x8xf32> -> vector<8x8xf32>
    %cst_405 = arith.constant -1.000000e+10 : f32
    %975 = vector.shape_cast %7 : vector<1x8xi1> to vector<1x8xi1>
    %976 = vector.broadcast %975 : vector<1x8xi1> to vector<8x8xi1>
    %977 = vector.broadcast %cst_405 : f32 to vector<8x8xf32>
    %978 = arith.select %976, %977, %974 : vector<8x8xi1>, vector<8x8xf32>
    %cst_406 = arith.constant dense<0xFF800000> : vector<8xf32>
    %979 = vector.multi_reduction <maximumf>, %978, %cst_406 [1] : vector<8x8xf32> to vector<8xf32>
    %980 = vector.shape_cast %979 : vector<8xf32> to vector<8x1xf32>
    %981 = vector.broadcast %980 : vector<8x1xf32> to vector<8x8xf32>
    %982 = arith.subf %978, %981 : vector<8x8xf32>
    %983 = math.exp %982 : vector<8x8xf32>
    %cst_407 = arith.constant dense<0.000000e+00> : vector<8xf32>
    %984 = vector.multi_reduction <add>, %983, %cst_407 [1] : vector<8x8xf32> to vector<8xf32>
    %985 = vector.shape_cast %984 : vector<8xf32> to vector<8x1xf32>
    %986 = tpu.reciprocal %985 {approx = true} : vector<8x1xf32> -> vector<8x1xf32>
    %987 = vector.broadcast %986 : vector<8x1xf32> to vector<8x8xf32>
    %988 = arith.mulf %983, %987 : vector<8x8xf32>
    %cst_408 = arith.constant dense<0.000000e+00> : vector<8x8xf32>
    %989 = tpu.matmul %988, %972, %cst_408 {dimension_numbers = #tpu.dot_dimension_numbers<[1], [0], [0], [1], [0, 0, 1, 1], [], []>} : vector<8x8xf32>, vector<8x8xf32>, vector<8x8xf32> -> vector<8x8xf32>
    %990 = vector.extract_strided_slice %889 {offsets = [24, 0], sizes = [8, 32], strides = [1, 1]} : vector<32x32xf32> to vector<8x32xf32>
    %cst_409 = arith.constant dense<0.000000e+00> : vector<8x32xf32>
    %991 = tpu.matmul %989, %990, %cst_409 {dimension_numbers = #tpu.dot_dimension_numbers<[1], [0], [0], [1], [0, 0, 1, 1], [], []>} : vector<8x8xf32>, vector<8x32xf32>, vector<8x32xf32> -> vector<8x32xf32>
    %992 = arith.addf %967, %991 : vector<8x32xf32>
    %993 = vector.broadcast %891 : vector<1x32xf32> to vector<8x32xf32>
    %994 = arith.addf %992, %993 : vector<8x32xf32>
    %c1_410 = arith.constant 1 : index
    %c0_411 = arith.constant 0 : index
    %c0_412 = arith.constant 0 : index
    %995 = vector.load %arg29[%c1_410, %c0_411, %c0_412] : memref<2x1x32xf32, #tpu.memory_space<vmem>>, vector<1x1x32xf32>
    %996 = vector.shape_cast %995 : vector<1x1x32xf32> to vector<1x32xf32>
    %c1_413 = arith.constant 1 : index
    %c0_414 = arith.constant 0 : index
    %c0_415 = arith.constant 0 : index
    %997 = vector.load %arg30[%c1_413, %c0_414, %c0_415] : memref<2x1x32xf32, #tpu.memory_space<vmem>>, vector<1x1x32xf32>
    %998 = vector.shape_cast %997 : vector<1x1x32xf32> to vector<1x32xf32>
    %999 = arith.addf %871, %994 : vector<8x32xf32>
    %cst_416 = arith.constant dense<0.000000e+00> : vector<8xf32>
    %1000 = vector.multi_reduction <add>, %999, %cst_416 [1] : vector<8x32xf32> to vector<8xf32>
    %1001 = vector.shape_cast %1000 : vector<8xf32> to vector<8x1xf32>
    %cst_417 = arith.constant 3.200000e+01 : f32
    %1002 = vector.broadcast %cst_417 : f32 to vector<8x1xf32>
    %1003 = arith.divf %1001, %1002 : vector<8x1xf32>
    %1004 = vector.broadcast %1003 : vector<8x1xf32> to vector<8x32xf32>
    %1005 = arith.subf %999, %1004 : vector<8x32xf32>
    %1006 = vector.broadcast %1003 : vector<8x1xf32> to vector<8x32xf32>
    %1007 = arith.subf %999, %1006 : vector<8x32xf32>
    %1008 = arith.mulf %1005, %1007 : vector<8x32xf32>
    %cst_418 = arith.constant dense<0.000000e+00> : vector<8xf32>
    %1009 = vector.multi_reduction <add>, %1008, %cst_418 [1] : vector<8x32xf32> to vector<8xf32>
    %1010 = vector.shape_cast %1009 : vector<8xf32> to vector<8x1xf32>
    %cst_419 = arith.constant 3.200000e+01 : f32
    %1011 = vector.broadcast %cst_419 : f32 to vector<8x1xf32>
    %1012 = arith.divf %1010, %1011 : vector<8x1xf32>
    %1013 = vector.broadcast %1003 : vector<8x1xf32> to vector<8x32xf32>
    %1014 = arith.subf %999, %1013 : vector<8x32xf32>
    %cst_420 = arith.constant 9.99999974E-6 : f32
    %1015 = vector.broadcast %cst_420 : f32 to vector<8x1xf32>
    %1016 = arith.addf %1012, %1015 : vector<8x1xf32>
    %1017 = math.rsqrt %1016 : vector<8x1xf32>
    %1018 = vector.broadcast %1017 : vector<8x1xf32> to vector<8x32xf32>
    %1019 = arith.mulf %1014, %1018 : vector<8x32xf32>
    %1020 = vector.broadcast %996 : vector<1x32xf32> to vector<8x32xf32>
    %1021 = arith.mulf %1019, %1020 : vector<8x32xf32>
    %1022 = vector.broadcast %998 : vector<1x32xf32> to vector<8x32xf32>
    %1023 = arith.addf %1021, %1022 : vector<8x32xf32>
    %c1_421 = arith.constant 1 : index
    %c0_422 = arith.constant 0 : index
    %c0_423 = arith.constant 0 : index
    %1024 = vector.load %arg31[%c1_421, %c0_422, %c0_423] : memref<2x32x64xf32, #tpu.memory_space<vmem>>, vector<1x32x64xf32>
    %1025 = vector.shape_cast %1024 : vector<1x32x64xf32> to vector<32x64xf32>
    %c1_424 = arith.constant 1 : index
    %c0_425 = arith.constant 0 : index
    %c0_426 = arith.constant 0 : index
    %1026 = vector.load %arg32[%c1_424, %c0_425, %c0_426] : memref<2x1x64xf32, #tpu.memory_space<vmem>>, vector<1x1x64xf32>
    %1027 = vector.shape_cast %1026 : vector<1x1x64xf32> to vector<1x64xf32>
    %c1_427 = arith.constant 1 : index
    %c0_428 = arith.constant 0 : index
    %c0_429 = arith.constant 0 : index
    %1028 = vector.load %arg33[%c1_427, %c0_428, %c0_429] : memref<2x64x32xf32, #tpu.memory_space<vmem>>, vector<1x64x32xf32>
    %1029 = vector.shape_cast %1028 : vector<1x64x32xf32> to vector<64x32xf32>
    %c1_430 = arith.constant 1 : index
    %c0_431 = arith.constant 0 : index
    %c0_432 = arith.constant 0 : index
    %1030 = vector.load %arg34[%c1_430, %c0_431, %c0_432] : memref<2x1x32xf32, #tpu.memory_space<vmem>>, vector<1x1x32xf32>
    %1031 = vector.shape_cast %1030 : vector<1x1x32xf32> to vector<1x32xf32>
    %cst_433 = arith.constant dense<0.000000e+00> : vector<8x64xf32>
    %1032 = tpu.matmul %1023, %1025, %cst_433 {dimension_numbers = #tpu.dot_dimension_numbers<[1], [0], [0], [1], [0, 0, 1, 1], [], []>} : vector<8x32xf32>, vector<32x64xf32>, vector<8x64xf32> -> vector<8x64xf32>
    %1033 = vector.broadcast %1027 : vector<1x64xf32> to vector<8x64xf32>
    %1034 = arith.addf %1032, %1033 : vector<8x64xf32>
    %cst_434 = arith.constant 0.000000e+00 : f32
    %1035 = vector.broadcast %cst_434 : f32 to vector<8x64xf32>
    %1036 = arith.maximumf %1034, %1035 : vector<8x64xf32>
    %cst_435 = arith.constant dense<0.000000e+00> : vector<8x32xf32>
    %1037 = tpu.matmul %1036, %1029, %cst_435 {dimension_numbers = #tpu.dot_dimension_numbers<[1], [0], [0], [1], [0, 0, 1, 1], [], []>} : vector<8x64xf32>, vector<64x32xf32>, vector<8x32xf32> -> vector<8x32xf32>
    %1038 = vector.broadcast %1031 : vector<1x32xf32> to vector<8x32xf32>
    %1039 = arith.addf %1037, %1038 : vector<8x32xf32>
    %c1_436 = arith.constant 1 : index
    %c0_437 = arith.constant 0 : index
    %c0_438 = arith.constant 0 : index
    %1040 = vector.load %arg35[%c1_436, %c0_437, %c0_438] : memref<2x1x32xf32, #tpu.memory_space<vmem>>, vector<1x1x32xf32>
    %1041 = vector.shape_cast %1040 : vector<1x1x32xf32> to vector<1x32xf32>
    %c1_439 = arith.constant 1 : index
    %c0_440 = arith.constant 0 : index
    %c0_441 = arith.constant 0 : index
    %1042 = vector.load %arg36[%c1_439, %c0_440, %c0_441] : memref<2x1x32xf32, #tpu.memory_space<vmem>>, vector<1x1x32xf32>
    %1043 = vector.shape_cast %1042 : vector<1x1x32xf32> to vector<1x32xf32>
    %1044 = arith.addf %1023, %1039 : vector<8x32xf32>
    %cst_442 = arith.constant dense<0.000000e+00> : vector<8xf32>
    %1045 = vector.multi_reduction <add>, %1044, %cst_442 [1] : vector<8x32xf32> to vector<8xf32>
    %1046 = vector.shape_cast %1045 : vector<8xf32> to vector<8x1xf32>
    %cst_443 = arith.constant 3.200000e+01 : f32
    %1047 = vector.broadcast %cst_443 : f32 to vector<8x1xf32>
    %1048 = arith.divf %1046, %1047 : vector<8x1xf32>
    %1049 = vector.broadcast %1048 : vector<8x1xf32> to vector<8x32xf32>
    %1050 = arith.subf %1044, %1049 : vector<8x32xf32>
    %1051 = vector.broadcast %1048 : vector<8x1xf32> to vector<8x32xf32>
    %1052 = arith.subf %1044, %1051 : vector<8x32xf32>
    %1053 = arith.mulf %1050, %1052 : vector<8x32xf32>
    %cst_444 = arith.constant dense<0.000000e+00> : vector<8xf32>
    %1054 = vector.multi_reduction <add>, %1053, %cst_444 [1] : vector<8x32xf32> to vector<8xf32>
    %1055 = vector.shape_cast %1054 : vector<8xf32> to vector<8x1xf32>
    %cst_445 = arith.constant 3.200000e+01 : f32
    %1056 = vector.broadcast %cst_445 : f32 to vector<8x1xf32>
    %1057 = arith.divf %1055, %1056 : vector<8x1xf32>
    %1058 = vector.broadcast %1048 : vector<8x1xf32> to vector<8x32xf32>
    %1059 = arith.subf %1044, %1058 : vector<8x32xf32>
    %cst_446 = arith.constant 9.99999974E-6 : f32
    %1060 = vector.broadcast %cst_446 : f32 to vector<8x1xf32>
    %1061 = arith.addf %1057, %1060 : vector<8x1xf32>
    %1062 = math.rsqrt %1061 : vector<8x1xf32>
    %1063 = vector.broadcast %1062 : vector<8x1xf32> to vector<8x32xf32>
    %1064 = arith.mulf %1059, %1063 : vector<8x32xf32>
    %1065 = vector.broadcast %1041 : vector<1x32xf32> to vector<8x32xf32>
    %1066 = arith.mulf %1064, %1065 : vector<8x32xf32>
    %1067 = vector.broadcast %1043 : vector<1x32xf32> to vector<8x32xf32>
    %1068 = arith.addf %1066, %1067 : vector<8x32xf32>
    %c0_447 = arith.constant 0 : index
    %c0_448 = arith.constant 0 : index
    %1069 = vector.load %arg37[%c0_447, %c0_448] : memref<32x128xf32, #tpu.memory_space<vmem>>, vector<32x128xf32>
    %cst_449 = arith.constant dense<0.000000e+00> : vector<8x128xf32>
    %1070 = tpu.matmul %1068, %1069, %cst_449 {dimension_numbers = #tpu.dot_dimension_numbers<[1], [0], [0], [1], [0, 0, 1, 1], [], []>} : vector<8x32xf32>, vector<32x128xf32>, vector<8x128xf32> -> vector<8x128xf32>
    %c0_450 = arith.constant 0 : index
    %c0_451 = arith.constant 0 : index
    %1071 = vector.load %arg38[%c0_450, %c0_451] : memref<1x128xf32, #tpu.memory_space<vmem>>, vector<1x128xf32>
    %1072 = vector.broadcast %1071 : vector<1x128xf32> to vector<8x128xf32>
    %1073 = arith.addf %1070, %1072 : vector<8x128xf32>
    %c0_452 = arith.constant 0 : index
    %c0_453 = arith.constant 0 : index
    %c0_454 = arith.constant 0 : index
    %1074 = vector.load %arg39[%c0_452, %c0_453, %c0_454] : memref<1x8x128xf32, #tpu.memory_space<vmem>>, vector<1x8x128xf32>
    %1075 = vector.shape_cast %1074 : vector<1x8x128xf32> to vector<8x128xf32>
    %1076 = vector.shape_cast %1073 : vector<8x128xf32> to vector<1x8x128xf32>
    tpu.vector_store %arg39[%c0_452, %c0_453, %c0_454], %1076 {strides = array<i32>} : memref<1x8x128xf32, #tpu.memory_space<vmem>>, vector<1x8x128xf32>,
    return
  }
  func.func @transform_0(%arg0: i32) -> (i32, i32, i32) {
    %c0_i32 = arith.constant 0 : i32
    %c0_i32_0 = arith.constant 0 : i32
    %c0_i32_1 = arith.constant 0 : i32
    return %arg0, %c0_i32, %c0_i32_0 : i32, i32, i32
  }
  func.func @transform_1(%arg0: i32) -> (i32, i32, i32) {
    %c0_i32 = arith.constant 0 : i32
    %c0_i32_0 = arith.constant 0 : i32
    %c0_i32_1 = arith.constant 0 : i32
    return %arg0, %c0_i32, %c0_i32_0 : i32, i32, i32
  }
  func.func @transform_2(%arg0: i32) -> (i32, i32, i32) {
    %c0_i32 = arith.constant 0 : i32
    %c0_i32_0 = arith.constant 0 : i32
    %c0_i32_1 = arith.constant 0 : i32
    return %arg0, %c0_i32, %c0_i32_0 : i32, i32, i32
  }
  func.func @transform_3(%arg0: i32) -> (i32, i32, i32) {
    %c0_i32 = arith.constant 0 : i32
    %c0_i32_0 = arith.constant 0 : i32
    %c0_i32_1 = arith.constant 0 : i32
    return %arg0, %c0_i32, %c0_i32_0 : i32, i32, i32
  }
  func.func @transform_4(%arg0: i32) -> (i32, i32, i32) {
    %c0_i32 = arith.constant 0 : i32
    %c0_i32_0 = arith.constant 0 : i32
    %c0_i32_1 = arith.constant 0 : i32
    %c0_i32_2 = arith.constant 0 : i32
    return %c0_i32, %c0_i32_0, %c0_i32_1 : i32, i32, i32
  }
  func.func @transform_5(%arg0: i32) -> (i32, i32, i32) {
    %c0_i32 = arith.constant 0 : i32
    %c0_i32_0 = arith.constant 0 : i32
    %c0_i32_1 = arith.constant 0 : i32
    %c0_i32_2 = arith.constant 0 : i32
    return %c0_i32, %c0_i32_0, %c0_i32_1 : i32, i32, i32
  }
  func.func @transform_6(%arg0: i32) -> (i32, i32, i32) {
    %c0_i32 = arith.constant 0 : i32
    %c0_i32_0 = arith.constant 0 : i32
    %c0_i32_1 = arith.constant 0 : i32
    %c0_i32_2 = arith.constant 0 : i32
    return %c0_i32, %c0_i32_0, %c0_i32_1 : i32, i32, i32
  }
  func.func @transform_7(%arg0: i32) -> (i32, i32, i32) {
    %c0_i32 = arith.constant 0 : i32
    %c0_i32_0 = arith.constant 0 : i32
    %c0_i32_1 = arith.constant 0 : i32
    %c0_i32_2 = arith.constant 0 : i32
    return %c0_i32, %c0_i32_0, %c0_i32_1 : i32, i32, i32
  }
  func.func @transform_8(%arg0: i32) -> (i32, i32, i32) {
    %c0_i32 = arith.constant 0 : i32
    %c0_i32_0 = arith.constant 0 : i32
    %c0_i32_1 = arith.constant 0 : i32
    %c0_i32_2 = arith.constant 0 : i32
    return %c0_i32, %c0_i32_0, %c0_i32_1 : i32, i32, i32
  }
  func.func @transform_9(%arg0: i32) -> (i32, i32, i32) {
    %c0_i32 = arith.constant 0 : i32
    %c0_i32_0 = arith.constant 0 : i32
    %c0_i32_1 = arith.constant 0 : i32
    %c0_i32_2 = arith.constant 0 : i32
    return %c0_i32, %c0_i32_0, %c0_i32_1 : i32, i32, i32
  }
  func.func @transform_10(%arg0: i32) -> (i32, i32, i32) {
    %c0_i32 = arith.constant 0 : i32
    %c0_i32_0 = arith.constant 0 : i32
    %c0_i32_1 = arith.constant 0 : i32
    %c0_i32_2 = arith.constant 0 : i32
    return %c0_i32, %c0_i32_0, %c0_i32_1 : i32, i32, i32
  }
  func.func @transform_11(%arg0: i32) -> (i32, i32, i32) {
    %c0_i32 = arith.constant 0 : i32
    %c0_i32_0 = arith.constant 0 : i32
    %c0_i32_1 = arith.constant 0 : i32
    %c0_i32_2 = arith.constant 0 : i32
    return %c0_i32, %c0_i32_0, %c0_i32_1 : i32, i32, i32
  }
  func.func @transform_12(%arg0: i32) -> (i32, i32, i32) {
    %c0_i32 = arith.constant 0 : i32
    %c0_i32_0 = arith.constant 0 : i32
    %c0_i32_1 = arith.constant 0 : i32
    %c0_i32_2 = arith.constant 0 : i32
    return %c0_i32, %c0_i32_0, %c0_i32_1 : i32, i32, i32
  }
  func.func @transform_13(%arg0: i32) -> (i32, i32, i32) {
    %c0_i32 = arith.constant 0 : i32
    %c0_i32_0 = arith.constant 0 : i32
    %c0_i32_1 = arith.constant 0 : i32
    %c0_i32_2 = arith.constant 0 : i32
    return %c0_i32, %c0_i32_0, %c0_i32_1 : i32, i32, i32
  }
  func.func @transform_14(%arg0: i32) -> (i32, i32, i32) {
    %c0_i32 = arith.constant 0 : i32
    %c0_i32_0 = arith.constant 0 : i32
    %c0_i32_1 = arith.constant 0 : i32
    %c0_i32_2 = arith.constant 0 : i32
    return %c0_i32, %c0_i32_0, %c0_i32_1 : i32, i32, i32
  }
  func.func @transform_15(%arg0: i32) -> (i32, i32, i32) {
    %c0_i32 = arith.constant 0 : i32
    %c0_i32_0 = arith.constant 0 : i32
    %c0_i32_1 = arith.constant 0 : i32
    %c0_i32_2 = arith.constant 0 : i32
    return %c0_i32, %c0_i32_0, %c0_i32_1 : i32, i32, i32
  }
  func.func @transform_16(%arg0: i32) -> (i32, i32, i32) {
    %c0_i32 = arith.constant 0 : i32
    %c0_i32_0 = arith.constant 0 : i32
    %c0_i32_1 = arith.constant 0 : i32
    %c0_i32_2 = arith.constant 0 : i32
    return %c0_i32, %c0_i32_0, %c0_i32_1 : i32, i32, i32
  }
  func.func @transform_17(%arg0: i32) -> (i32, i32, i32) {
    %c0_i32 = arith.constant 0 : i32
    %c0_i32_0 = arith.constant 0 : i32
    %c0_i32_1 = arith.constant 0 : i32
    %c0_i32_2 = arith.constant 0 : i32
    return %c0_i32, %c0_i32_0, %c0_i32_1 : i32, i32, i32
  }
  func.func @transform_18(%arg0: i32) -> (i32, i32, i32) {
    %c0_i32 = arith.constant 0 : i32
    %c0_i32_0 = arith.constant 0 : i32
    %c0_i32_1 = arith.constant 0 : i32
    %c0_i32_2 = arith.constant 0 : i32
    return %c0_i32, %c0_i32_0, %c0_i32_1 : i32, i32, i32
  }
  func.func @transform_19(%arg0: i32) -> (i32, i32, i32) {
    %c0_i32 = arith.constant 0 : i32
    %c0_i32_0 = arith.constant 0 : i32
    %c0_i32_1 = arith.constant 0 : i32
    %c0_i32_2 = arith.constant 0 : i32
    return %c0_i32, %c0_i32_0, %c0_i32_1 : i32, i32, i32
  }
  func.func @transform_20(%arg0: i32) -> (i32, i32, i32) {
    %c0_i32 = arith.constant 0 : i32
    %c0_i32_0 = arith.constant 0 : i32
    %c0_i32_1 = arith.constant 0 : i32
    %c0_i32_2 = arith.constant 0 : i32
    return %c0_i32, %c0_i32_0, %c0_i32_1 : i32, i32, i32
  }
  func.func @transform_21(%arg0: i32) -> (i32, i32, i32) {
    %c0_i32 = arith.constant 0 : i32
    %c0_i32_0 = arith.constant 0 : i32
    %c0_i32_1 = arith.constant 0 : i32
    %c0_i32_2 = arith.constant 0 : i32
    return %c0_i32, %c0_i32_0, %c0_i32_1 : i32, i32, i32
  }
  func.func @transform_22(%arg0: i32) -> (i32, i32, i32) {
    %c0_i32 = arith.constant 0 : i32
    %c0_i32_0 = arith.constant 0 : i32
    %c0_i32_1 = arith.constant 0 : i32
    %c0_i32_2 = arith.constant 0 : i32
    return %c0_i32, %c0_i32_0, %c0_i32_1 : i32, i32, i32
  }
  func.func @transform_23(%arg0: i32) -> (i32, i32, i32) {
    %c0_i32 = arith.constant 0 : i32
    %c0_i32_0 = arith.constant 0 : i32
    %c0_i32_1 = arith.constant 0 : i32
    %c0_i32_2 = arith.constant 0 : i32
    return %c0_i32, %c0_i32_0, %c0_i32_1 : i32, i32, i32
  }
  func.func @transform_24(%arg0: i32) -> (i32, i32, i32) {
    %c0_i32 = arith.constant 0 : i32
    %c0_i32_0 = arith.constant 0 : i32
    %c0_i32_1 = arith.constant 0 : i32
    %c0_i32_2 = arith.constant 0 : i32
    return %c0_i32, %c0_i32_0, %c0_i32_1 : i32, i32, i32
  }
  func.func @transform_25(%arg0: i32) -> (i32, i32, i32) {
    %c0_i32 = arith.constant 0 : i32
    %c0_i32_0 = arith.constant 0 : i32
    %c0_i32_1 = arith.constant 0 : i32
    %c0_i32_2 = arith.constant 0 : i32
    return %c0_i32, %c0_i32_0, %c0_i32_1 : i32, i32, i32
  }
  func.func @transform_26(%arg0: i32) -> (i32, i32, i32) {
    %c0_i32 = arith.constant 0 : i32
    %c0_i32_0 = arith.constant 0 : i32
    %c0_i32_1 = arith.constant 0 : i32
    %c0_i32_2 = arith.constant 0 : i32
    return %c0_i32, %c0_i32_0, %c0_i32_1 : i32, i32, i32
  }
  func.func @transform_27(%arg0: i32) -> (i32, i32, i32) {
    %c0_i32 = arith.constant 0 : i32
    %c0_i32_0 = arith.constant 0 : i32
    %c0_i32_1 = arith.constant 0 : i32
    %c0_i32_2 = arith.constant 0 : i32
    return %c0_i32, %c0_i32_0, %c0_i32_1 : i32, i32, i32
  }
  func.func @transform_28(%arg0: i32) -> (i32, i32, i32) {
    %c0_i32 = arith.constant 0 : i32
    %c0_i32_0 = arith.constant 0 : i32
    %c0_i32_1 = arith.constant 0 : i32
    %c0_i32_2 = arith.constant 0 : i32
    return %c0_i32, %c0_i32_0, %c0_i32_1 : i32, i32, i32
  }
  func.func @transform_29(%arg0: i32) -> (i32, i32, i32) {
    %c0_i32 = arith.constant 0 : i32
    %c0_i32_0 = arith.constant 0 : i32
    %c0_i32_1 = arith.constant 0 : i32
    %c0_i32_2 = arith.constant 0 : i32
    return %c0_i32, %c0_i32_0, %c0_i32_1 : i32, i32, i32
  }
  func.func @transform_30(%arg0: i32) -> (i32, i32, i32) {
    %c0_i32 = arith.constant 0 : i32
    %c0_i32_0 = arith.constant 0 : i32
    %c0_i32_1 = arith.constant 0 : i32
    %c0_i32_2 = arith.constant 0 : i32
    return %c0_i32, %c0_i32_0, %c0_i32_1 : i32, i32, i32
  }
  func.func @transform_31(%arg0: i32) -> (i32, i32, i32) {
    %c0_i32 = arith.constant 0 : i32
    %c0_i32_0 = arith.constant 0 : i32
    %c0_i32_1 = arith.constant 0 : i32
    %c0_i32_2 = arith.constant 0 : i32
    return %c0_i32, %c0_i32_0, %c0_i32_1 : i32, i32, i32
  }
  func.func @transform_32(%arg0: i32) -> (i32, i32, i32) {
    %c0_i32 = arith.constant 0 : i32
    %c0_i32_0 = arith.constant 0 : i32
    %c0_i32_1 = arith.constant 0 : i32
    %c0_i32_2 = arith.constant 0 : i32
    return %c0_i32, %c0_i32_0, %c0_i32_1 : i32, i32, i32
  }
  func.func @transform_33(%arg0: i32) -> (i32, i32, i32) {
    %c0_i32 = arith.constant 0 : i32
    %c0_i32_0 = arith.constant 0 : i32
    %c0_i32_1 = arith.constant 0 : i32
    %c0_i32_2 = arith.constant 0 : i32
    return %c0_i32, %c0_i32_0, %c0_i32_1 : i32, i32, i32
  }
  func.func @transform_34(%arg0: i32) -> (i32, i32, i32) {
    %c0_i32 = arith.constant 0 : i32
    %c0_i32_0 = arith.constant 0 : i32
    %c0_i32_1 = arith.constant 0 : i32
    %c0_i32_2 = arith.constant 0 : i32
    return %c0_i32, %c0_i32_0, %c0_i32_1 : i32, i32, i32
  }
  func.func @transform_35(%arg0: i32) -> (i32, i32, i32) {
    %c0_i32 = arith.constant 0 : i32
    %c0_i32_0 = arith.constant 0 : i32
    %c0_i32_1 = arith.constant 0 : i32
    %c0_i32_2 = arith.constant 0 : i32
    return %c0_i32, %c0_i32_0, %c0_i32_1 : i32, i32, i32
  }
  func.func @transform_36(%arg0: i32) -> (i32, i32) {
    %c0_i32 = arith.constant 0 : i32
    %c0_i32_0 = arith.constant 0 : i32
    %c0_i32_1 = arith.constant 0 : i32
    return %c0_i32, %c0_i32_0 : i32, i32
  }
  func.func @transform_37(%arg0: i32) -> (i32, i32) {
    %c0_i32 = arith.constant 0 : i32
    %c0_i32_0 = arith.constant 0 : i32
    %c0_i32_1 = arith.constant 0 : i32
    return %c0_i32, %c0_i32_0 : i32, i32
  }
  func.func @transform_38(%arg0: i32) -> (i32, i32, i32) {
    %c0_i32 = arith.constant 0 : i32
    %c0_i32_0 = arith.constant 0 : i32
    %c0_i32_1 = arith.constant 0 : i32
    return %arg0, %c0_i32, %c0_i32_0 : i32, i32, i32
  }
}

</mosaic_0001>

<bundles_post_ra>
// kernel: transformer_forward.1
= control target key start
LH: loop header
LB: loop body
LE: loop exit
PB: predicated region body
PF: predicated region fallthrough
CT: control target
= control target key end

     0   :  { %s10297_s6 = smov 1   ;;  %s10298_s10 = smov 2   ;;  %s11582_s0 = inlined_call_operand.smem [shape: u32[39], index: -1, kind: input, shape index: {}] }
   0x1   :  { %s10358_s5 = sld [smem:[%s11582_s0]]   ;;  %s10299_s14 = smov 3  }
   0x2   :  { %s10363_s9 = sld [smem:[%s11582_s0 + %s10297_s6]]   ;;  %s10300_s18 = smov 4  }
   0x3   :  { %s10368_s13 = sld [smem:[%s11582_s0 + %s10298_s10]]   ;;  %s10301_s22 = smov 5  }
   0x4   :  { %s10373_s17 = sld [smem:[%s11582_s0 + %s10299_s14]]   ;;  %s10302_s26 = smov 6  }
   0x5   :  { %s10378_s21 = sld [smem:[%s11582_s0 + %s10300_s18]]   ;;  %s10303_s30 = smov 7  }
   0x6   :  { %s10383_s25 = sld [smem:[%s11582_s0 + %s10301_s22]]   ;;  %s10304_s4 = smov 8  }
   0x7   :  { %11651 = sst [smem:[#allocation5_spill]] %s10358_s5  ;;  %s10305_s10 = smov 9  }
   0x8   :  { %11652 = sst [smem:[#allocation6_spill]] %s10363_s9  ;;  %s10306_s15 = smov 10  }
   0x9   :  { %11653 = sst [smem:[#allocation7_spill]] %s10368_s13  ;;  %s10307_s20 = smov 11  }
   0xa   :  { %11654 = sst [smem:[#allocation8_spill]] %s10373_s17  ;;  %s10309_s1 = smov 13  }
   0xb   :  { %11655 = sst [smem:[#allocation9_spill]] %s10378_s21  ;;  %s10310_s7 = smov 14  }
   0xc   :  { %11656 = sst [smem:[#allocation10_spill]] %s10383_s25  ;;  %s10312_s22 = smov 16  }
   0xd   :  { %s10388_s29 = sld [smem:[%s11582_s0 + %s10302_s26]]   ;;  %s10308_s26 = smov 12  }
   0xe   :  { %s10393_s3 = sld [smem:[%s11582_s0 + %s10303_s30]]   ;;  %s10313_s28 = smov 17  }
   0xf   :  { %s10398_s8 = sld [smem:[%s11582_s0 + %s10304_s4]]  }
  0x10   :  { %s10403_s14 = sld [smem:[%s11582_s0 + %s10305_s10]]  }
  0x11   :  { %s10408_s19 = sld [smem:[%s11582_s0 + %s10306_s15]]   ;;  %s10311_s15 = smov 15  }
  0x12   :  { %s10413_s24 = sld [smem:[%s11582_s0 + %s10307_s20]]  }
  0x13   :  { %11657 = sst [smem:[#allocation11_spill]] %s10388_s29 }
  0x14   :  { %11658 = sst [smem:[#allocation12_spill]] %s10393_s3 }
  0x15   :  { %11659 = sst [smem:[#allocation13_spill]] %s10398_s8 }
  0x16   :  { %11660 = sst [smem:[#allocation14_spill]] %s10403_s14 }
  0x17   :  { %11661 = sst [smem:[#allocation15_spill]] %s10408_s19 }
  0x18   :  { %11662 = sst [smem:[#allocation16_spill]] %s10413_s24 }
  0x19   :  { %s10418_s30 = sld [smem:[%s11582_s0 + %s10308_s26]]  }
  0x1a   :  { %s10423_s6 = sld [smem:[%s11582_s0 + %s10309_s1]]  }
  0x1b   :  { %s10428_s12 = sld [smem:[%s11582_s0 + %s10310_s7]]   ;;  %s10314_s7 = smov 18  }
  0x1c   :  { %s10433_s20 = sld [smem:[%s11582_s0 + %s10311_s15]]   ;;  %s10315_s15 = smov 19  }
  0x1d   :  { %s10438_s27 = sld [smem:[%s11582_s0 + %s10312_s22]]   ;;  %s10316_s22 = smov 20  }
  0x1e   :  { %s10443_s4 = sld [smem:[%s11582_s0 + %s10313_s28]]   ;;  %s10317_s28 = smov 21  }
  0x1f   :  { %11663 = sst [smem:[#allocation17_spill]] %s10418_s30 }
  0x20   :  { %11664 = sst [smem:[#allocation18_spill]] %s10423_s6 }
  0x21   :  { %11665 = sst [smem:[#allocation19_spill]] %s10428_s12 }
  0x22   :  { %11666 = sst [smem:[#allocation20_spill]] %s10433_s20 }
  0x23   :  { %11667 = sst [smem:[#allocation21_spill]] %s10438_s27 }
  0x24   :  { %11668 = sst [smem:[#allocation22_spill]] %s10443_s4 }
  0x25   :  { %s10448_s9 = sld [smem:[%s11582_s0 + %s10314_s7]]   ;;  %s10318_s7 = smov 22  }
  0x26   :  { %s10453_s20 = sld [smem:[%s11582_s0 + %s10315_s15]]   ;;  %s10319_s15 = smov 23  }
  0x27   :  { %s10458_s27 = sld [smem:[%s11582_s0 + %s10316_s22]]   ;;  %s10320_s22 = smov 24  }
  0x28   :  { %s10463_s4 = sld [smem:[%s11582_s0 + %s10317_s28]]   ;;  %s10321_s28 = smov 25  }
  0x2b   :  { %11669 = sst [smem:[#allocation23_spill]] %s10448_s9 }
  0x2c   :  { %11670 = sst [smem:[#allocation24_spill]] %s10453_s20 }
  0x2d   :  { %11671 = sst [smem:[#allocation25_spill]] %s10458_s27 }
  0x2e   :  { %11672 = sst [smem:[#allocation26_spill]] %s10463_s4 }
  0x2f   :  { %s10468_s9 = sld [smem:[%s11582_s0 + %s10318_s7]]   ;;  %s10322_s7 = smov 26  }
  0x30   :  { %s10473_s20 = sld [smem:[%s11582_s0 + %s10319_s15]]   ;;  %s10323_s15 = smov 27  }
  0x31   :  { %s10478_s27 = sld [smem:[%s11582_s0 + %s10320_s22]]   ;;  %s10324_s22 = smov 28  }
  0x32   :  { %s10483_s4 = sld [smem:[%s11582_s0 + %s10321_s28]]   ;;  %s10325_s28 = smov 29  }
  0x35   :  { %11673 = sst [smem:[#allocation27_spill]] %s10468_s9 }
  0x36   :  { %11674 = sst [smem:[#allocation28_spill]] %s10473_s20 }
  0x37   :  { %11675 = sst [smem:[#allocation29_spill]] %s10478_s27 }
  0x38   :  { %11676 = sst [smem:[#allocation30_spill]] %s10483_s4 }
  0x39   :  { %s10488_s9 = sld [smem:[%s11582_s0 + %s10322_s7]]   ;;  %s10326_s7 = smov 30  }
  0x3a   :  { %s10493_s20 = sld [smem:[%s11582_s0 + %s10323_s15]]   ;;  %s10327_s15 = smov 31  }
  0x3b   :  { %s10498_s27 = sld [smem:[%s11582_s0 + %s10324_s22]]   ;;  %s10328_s22 = smov 32  }
  0x3c   :  { %s10503_s4 = sld [smem:[%s11582_s0 + %s10325_s28]]   ;;  %s10329_s28 = smov 33  }
  0x3f   :  { %11677 = sst [smem:[#allocation31_spill]] %s10488_s9 }
  0x40   :  { %11678 = sst [smem:[#allocation32_spill]] %s10493_s20 }
  0x41   :  { %11679 = sst [smem:[#allocation33_spill]] %s10498_s27 }
  0x42   :  { %11680 = sst [smem:[#allocation34_spill]] %s10503_s4 }
  0x43   :  { %s10508_s9 = sld [smem:[%s11582_s0 + %s10326_s7]]   ;;  %s10330_s7 = smov 34  }
  0x44   :  { %s10513_s20 = sld [smem:[%s11582_s0 + %s10327_s15]]   ;;  %s10331_s15 = smov 35  }
  0x45   :  { %s10518_s27 = sld [smem:[%s11582_s0 + %s10328_s22]]   ;;  %s10332_s22 = smov 36  }
  0x46   :  { %s10523_s4 = sld [smem:[%s11582_s0 + %s10329_s28]]   ;;  %s10333_s28 = smov 37  }
  0x49   :  { %11681 = sst [smem:[#allocation35_spill]] %s10508_s9 }
  0x4a   :  { %11682 = sst [smem:[#allocation36_spill]] %s10513_s20 }
  0x4b   :  { %11683 = sst [smem:[#allocation37_spill]] %s10518_s27 }
  0x4c   :  { %11684 = sst [smem:[#allocation38_spill]] %s10523_s4 }
  0x4d   :  { %s10528_s9 = sld [smem:[%s11582_s0 + %s10330_s7]]   ;;  %s10334_s7 = smov 38  }
  0x4e   :  { %s10533_s20 = sld [smem:[%s11582_s0 + %s10331_s15]]  }
  0x4f   :  { %s10538_s27 = sld [smem:[%s11582_s0 + %s10332_s22]]  }
  0x50   :  { %s10543_s4 = sld [smem:[%s11582_s0 + %s10333_s28]]  }
  0x53   :  { %11685 = sst [smem:[#allocation39_spill]] %s10528_s9 }
  0x54   :  { %s10548_s9 = sld [smem:[%s11582_s0 + %s10334_s7]]  }
  0x55   :  { %11686 = sst [smem:[#allocation40_spill]] %s10538_s27 }
  0x56   :  { %11687 = sst [smem:[#allocation41_spill]] %s10543_s4 }
  0x5a   :  { %11688 = sst [smem:[#allocation42_spill]] %s10548_s9 }
  0x5b   :  { %82 = vsyncpa [#allocation3], 0 }
  0x5c   :  { %84 = vsyncpa [#allocation3 + $0x1], 0  ;;  %s10550_s15 = smov 0   ;;  %s10552_s16 = smov 0  }
  0x5d   :  { %s10554_s18 = smov 0   ;;  %s10556_s22 = smov 0  }
  0x5e LB: > { %s11689_s30 = sld [smem:[#allocation17_spill]]  ;;  %s10571_s0 = sadd.s32 4294967295, %s10295_s22   ;;  %s10291_s18 = sphi %s10554_s18, %s11771_s18   ;;  %s10287_s16 = sphi %s10552_s16, %s11770_s16   ;;  %s10283_s15 = sphi %s10550_s15, %s11769_s15   ;;  %s10295_s22 = sphi %s10556_s22, %s11768_s22  }
  0x5f   : > { %s11690_s12 = sld [smem:[#allocation19_spill]]  ;;  %s8964_s23 = sadd.s32 4294967294, %s10295_s22  }
  0x60   : > { %s11691_s24 = sld [smem:[#allocation16_spill]]  ;;  %s10575_s26 = sadd.s32 1, %s10295_s22  }
  0x61   : > { %s11692_s14 = sld [smem:[#allocation14_spill]]  ;;  %s915_s28 = sadd.s32 1, %s10291_s18 }
  0x62   : > { %s11693_s8 = sld [smem:[#allocation13_spill]]  ;;  %s912_s1 = ssub.s32 %s10295_s22, %s10575_s26 }
  0x63   : > { %s11694_s6 = sld [smem:[#allocation18_spill]]  ;;  %p925_p0 = scmp.ne.s32.totalorder %s10291_s18, %s10287_s16 }
  0x64   : > { %s11695_s29 = sld [smem:[#allocation11_spill]]  ;;  %p913_p1 = scmp.eq.s32.totalorder %s912_s1, 0 }
  0x65   : > { %s11696_s19 = sld [smem:[#allocation15_spill]]  ;;  %p926_p2 = scmp.eq.s32.totalorder %s10571_s0, 1 }
  0x66   : > { %s11697_s3 = sld [smem:[#allocation12_spill]]  ;;  %p931_p3 = scmp.ne.s32.totalorder %s10287_s16, %s10283_s15 }
  0x67   : > { %s11698_s25 = sld [smem:[#allocation10_spill]]  ;;  %p932_p4 = scmp.eq.s32.totalorder %s8964_s23, 1 }
  0x68   : > { %s11699_s21 = sld [smem:[#allocation9_spill]]  ;;  %p10588_p5 = por %p926_p2, %p925_p0 }
  0x69   : > { %11700 = sst [smem:[#allocation43_spill]] %s10283_s15  ;;  %p10592_p6 = por %p932_p4, %p931_p3 }
  0x6a   : > { %11701 = sst [smem:[#allocation44_spill]] %s10287_s16  ;;  %p8967_p7 = scmp.ge.s32.totalorder %s10295_s22, 1 }
  0x6b   : > { %11702 = sst [smem:[#allocation45_spill]] %s10291_s18  ;;  %p1078_p8 = scmp.lt.s32.totalorder %s10295_s22, 3 }
  0x6c   : > { %11703 = sst [smem:[#allocation46_spill]] %s10295_s22 }
  0x6d   : > { %11704 = sst [smem:[#allocation47_spill]] %s10571_s0  ;;  %p1079_p9 = pnand %p8967_p7, %p1078_p8 }
  0x6e   : > { %11705 = sst [smem:[#allocation48_spill]] %s10575_s26  ;;  %p1181_p10 = scmp.lt.s32.totalorder (!%p1079_p9), %s10571_s0, 1 }
  0x6f   : > { %s10586_s2 = scalar_select %p913_p1, %s10291_s18, %s915_s28  }
  0x70   : > { %s11707_s7 = scalar_select %p10588_p5, 1, 0 }
  0x71   : > { %11706 = sst [smem:[#allocation49_spill]] %s10586_s2  ;;  %1082 = sbr.rel (%p1079_p9) target bundleno = 18855 (0x49a7), region = 172 }
  0x72   : > { %11708 = sst [smem:[#allocation50_spill]] %s11707_s7  ;;  %s11722_s2 = smov (!%p1079_p9), 48  }
  0x73   : > { %s11709_s10 = scalar_select %p10592_p6, 1, 0 }
  0x74   : > { %s11711_s5 = sld [smem:[#allocation5_spill]] (!%p1079_p9)  ;;  %s11723_s18 = smov (!%p1079_p9), 104  }
  0x75   : > { %11710 = sst [smem:[#allocation51_spill]] %s11709_s10  ;;  %s11724_s26 = smov (!%p1079_p9), 72  }
  0x76   : > { %v1216_v0 = vld [vmem:[%s11699_s21 + $0x18] sm:$0xff]  ;;  %v1199_v1 = vlaneseq  ;;  %v10335_v2 = vmov 0.0   ;;  %v1215_v3 = vld [vmem:[%s11699_s21 + $0x10] sm:$0xff]  ;;  %s11712_s17 = sld [smem:[#allocation8_spill]]  ;;  %vm10336_vm0 = vmmov 0   ;;  %v1214_v4 = vld [vmem:[%s11699_s21 + $0x8] sm:$0xff] }
  0x77   : > { %9449 = vmatprep.subr.mxu0 %v10335_v2  ;;  %9457 = vmatprep.mubr.msk.f32.mxu0 %vm10336_vm0, %v10335_v2  ;;  %s10605_s11 = scalar_select %p1181_p10, %s10571_s0, 1  ;;  %v1213_v6 = vld [vmem:[%s11699_s21] sm:$0xff]  ;;  %vm1224_vm1 = vcmask 261120   ;;  %v10337_v10 = vmov 0   ;;  %vm1307_vm3 = vcmask 64512   ;;  %v1299_v51 = vld [vmem:[%s11695_s29 + $0x8] sm:$0xff] }
  0x78   : > { %9450 = vmatpush3.msra.mxu0 %v1216_v0  ;;  %9460 = vmatprep.subr.mxu1 %v10335_v2  ;;  %v10614_v5 = vshrl.u32 %v1199_v1, 7  ;;  %v8971_v13 = vld [vmem:[%s11698_s25] ss:$0 sm:$0xff]  ;;  %s11713_s13 = sld [smem:[#allocation7_spill]]  ;;  %vm2407_vm6 = vcmask 523264   ;;  %s11725_s10 = smov 40  }
  0x79   : > { %9451 = vmatprep.subr.mxu0 %v10335_v2  ;;  %9462 = vmatprep.mubr.msk.f32.mxu1 %vm10336_vm0, %v10335_v2  ;;  %s11603_s23 = sshll.u32 %s10605_s11, 3  ;;  %v1298_v50 = vld [vmem:[%s11695_s29] sm:$0xff]  ;;  %s11747_s22 = sld [smem:[#allocation35_spill]] }
  0x7a   : > { %9452 = vmatpush3.msra.mxu0 %v1215_v3  ;;  %s1184_s28 = scalar_lea.vmem %s11711_s5, %s11603_s23  ;;  %v1209_v9 = vsub.s32 0, %v10614_v5  ;;  %s11608_s23 = smov 88  }
  0x7b   : > { %9453 = vmatprep.subr.mxu0 %v10335_v2  ;;  %v10623_v7 = vld [vmem:[%s1184_s28] sm:$0xff]  ;;  %s11606_s28 = smov 96   ;;  %s11614_s5 = smov 112  }
  0x7c   : > { %9454 = vmatpush3.msra.mxu0 %v1214_v4  ;;  %s1194_s1 = scalar_lea.vmem %s11712_s17, %s10605_s11  ;;  %s11719_s17 = smov 112  }
  0x7d   : > { %9455 = vmatprep.subr.mxu0 %v10335_v2  ;;  %v1203_v8 = vld [vmem:[%s1194_s1] sm:$0x1]  ;;  %s11604_s1 = smov 120   ;;  %s11749_s0 = sld [smem:[#allocation37_spill]] }
  0x7e   : > { %9456 = vmatpush3.msra.mxu0 %v1213_v6  ;;  %vm1204_vm2 = vcmp.gt.f32.partialorder %v1203_v8, 0.5  ;;  %s11752_s16 = sld [smem:[#allocation36_spill]] }
  0x7f   : > { %v1206_v11 = vsel %vm1204_vm2, 1, %v10337_v10  ;;  %9458 = vmatmul.mubr.msk.f32.vlgmr.msra.gmra.mxu0 %vm1224_vm1, %v10623_v7  ;;  %9470 = vmatprep.subr.mxu0 %v10335_v2  ;;  %s11748_s9 = smov %s11747_s22  ;;  %s11753_s4 = sld [smem:[#allocation38_spill]] }
  0x80   : > { %v10630_v12 = vrot.slane %v1206_v11, %v1209_v9  ;;  %9472 = vmatprep.mubr.msk.f32.mxu0 %vm10336_vm0, %v10335_v2 }
  0x82   : > { %vm1211_vm7 = vcmp.eq.s32.totalorder %v10630_v12, 1 }
 0x13f   : > { %v1294_v14 = vpop.f32.mrf.mxu0 }
 0x140   : > { %v10635_v15 = vadd.f32 %v8971_v13, %v1294_v14 }
 0x141   : > { %v9459_v16 = vpop.f32.mrf.mxu0 }
 0x142   : > { %1305 = vrot.lane.b32.xlu0 %v10635_v15, %s11606_s28  ;;  %v10640_v17 = vmul.f32 0.35355338, %v10635_v15  ;;  %s11612_s28 = smov 64  }
 0x144   : > { %1477 = vrot.lane.b32.xlu1 %v10640_v17, %s11604_s1  ;;  %s1191_s1 = scalar_lea.vmem %s11713_s13, %s10605_s11  ;;  %s11718_s13 = smov 56  }
 0x145   : > { %v1197_v21 = vld [vmem:[%s1191_s1] sm:$0x1]  ;;  %s11624_s1 = smov 56  }
 0x146   : > { %1479 = vrot.lane.b32.xlu0 %v10635_v15, %s11608_s23  ;;  %vm1198_vm4 = vcmp.gt.f32.partialorder %v1197_v21, 0.5  ;;  %s11610_s23 = smov 80  }
 0x147   : > { %v1383_v22 = vsel %vm1198_vm4, 1, %v10337_v10 }
 0x148   : > { %v10659_v23 = vrot.slane %v1383_v22, %v1209_v9 }
 0x14a   : > { %vm1388_vm5 = vcmp.eq.s32.totalorder %v10659_v23, 1 }
 0x1b4   : > { %v1306_v18 = vpop.permute.xlu0 %1305 }
 0x1b5   : > { %9461 = vmatpush3.xpose.msk.msra.mxu1 %vm1307_vm3, %v1306_v18 }
 0x1b6   : > { %9465 = vmatprep.subr.mxu1 %v10335_v2  ;;  %v1478_v20 = vpop.permute.xlu1 %1477 }
 0x1b8   : > { %v1480_v19 = vpop.permute.xlu0 %1479  ;;  %9463 = vmatmul.mubr.msk.f32.vlgmr.msra.gmra.mxu1 %vm1307_vm3, %v10640_v17 }
 0x1b9   : > { %9471 = vmatpush3.xpose.msk.msra.mxu0 %vm1307_vm3, %v1480_v19  ;;  %9467 = vmatprep.mubr.msk.f32.mxu1 %vm10336_vm0, %v10335_v2 }
 0x1ba   : > { %9480 = vmatprep.subr.mxu0 %v10335_v2 }
 0x1bc   : > { %9473 = vmatmul.mubr.msk.f32.vlgmr.msra.gmra.mxu0 %vm1307_vm3, %v1478_v20  ;;  %v1300_v20 = vld [vmem:[%s11695_s29 + $0x10] sm:$0xff] }
 0x1bd   : > { %9482 = vmatprep.mubr.msk.f32.mxu0 %vm10336_vm0, %v10335_v2  ;;  %9481 = vmatpush3.msra.mxu0 %v1299_v51 }
 0x1be   : > { %9490 = vmatprep.subr.mxu0 %v10335_v2 }
 0x278   : > { %v1379_v24 = vpop.f32.mrf.mxu1 }
 0x279   : > { %v1389_v25 = vsel %vm1388_vm5, -1e+10, %v1379_v24 }
 0x27a   : > { %v9464_v26 = vpop.f32.mrf.mxu1  ;;  %v1390_v27 = vsel %vm1307_vm3, %v1389_v25, -inf }
 0x27b   : > { %1391 = vmax.xlane.f32.xlu1 %v1390_v27 }
 0x27c   : > { %v1551_v28 = vpop.f32.mrf.mxu0 }
 0x27d   : > { %v1555_v29 = vsel %vm1388_vm5, -1e+10, %v1551_v28 }
 0x27e   : > { %v9474_v30 = vpop.f32.mrf.mxu0  ;;  %v1556_v31 = vsel %vm1307_vm3, %v1555_v29, -inf }
 0x27f   : > { %1557 = vmax.xlane.f32.xlu0 %v1556_v31 }
 0x304   : > { %v1392_v32 = vpop.xlane.xlu1 %1391 }
 0x305   : > { %v1393_v33 = vsub.f32 %v1389_v25, %v1392_v32 }
 0x307   : > { %v1394_v34 = vmul.f32 1.442695, %v1393_v33 }
 0x308   : > { %v1558_v35 = vpop.xlane.xlu0 %1557 }
 0x309   : > { %10119 = vpow2.f32 %v1394_v34  ;;  %v1559_v36 = vsub.f32 %v1555_v29, %v1558_v35  ;;  %v1301_v34 = vld [vmem:[%s11695_s29 + $0x18] sm:$0xff] }
 0x30b   : > { %v1560_v37 = vmul.f32 1.442695, %v1559_v36 }
 0x30d   : > { %10121 = vpow2.f32 %v1560_v37 }
 0x316   : > { %v10120_v38 = vpop.eup %10119 }
 0x317   : > { %v1396_v39 = vsel %vm1307_vm3, %v10120_v38, 0.0 }
 0x318   : > { %1397 = vadd.xlane.f32.xlu0 %v1396_v39 }
 0x31a   : > { %v10122_v40 = vpop.eup %10121 }
 0x31b   : > { %v1562_v41 = vsel %vm1307_vm3, %v10122_v40, 0.0 }
 0x31c   : > { %1563 = vadd.xlane.f32.xlu1 %v1562_v41 }
 0x32d   : > { %1567 = vrot.lane.b32.xlu1 %v10635_v15, %s11624_s1  ;;  %s11717_s1 = smov 120  }
 0x32e   : > { %1401 = vrot.lane.b32.xlu0 %v10635_v15, %s11612_s28  ;;  %s11620_s28 = smov 104  }
 0x331   : > { %1791 = vrot.lane.b32.xlu1 %v10635_v15, %s11610_s23  ;;  %s11616_s23 = smov 72  }
 0x332   : > { %1789 = vrot.lane.b32.xlu0 %v10640_v17, %s11614_s5  ;;  %s11622_s5 = smov 48  }
 0x3a1   : > { %v1398_v42 = vpop.xlane.xlu0 %1397 }
 0x3a2   : > { %10123 = vrcp.f32 %v1398_v42  ;;  %v8989_v42 = vld [vmem:[%s11697_s3] ss:$0 sm:$0xff] }
 0x3a5   : > { %v1564_v43 = vpop.xlane.xlu1 %1563  ;;  %v1402_v44 = vpop.permute.xlu0 %1401 }
 0x3a6   : > { %10125 = vrcp.f32 %v1564_v43  ;;  %9466 = vmatpush3.msra.mxu1 %v1402_v44 }
 0x3a7   : > { %9475 = vmatprep.subr.mxu1 %v10335_v2 }
 0x3a9   : > { %v1568_v47 = vpop.permute.xlu1 %1567  ;;  %v1790_v57 = vpop.permute.xlu0 %1789 }
 0x3ad   : > { %v1792_v55 = vpop.permute.xlu1 %1791 }
 0x3af   : > { %v10124_v45 = vpop.eup %10123 }
 0x3b0   : > { %v1400_v46 = vmul.f32 %v10124_v45, %v10120_v38 }
 0x3b2   : > { %9468 = vmatmul.mubr.msk.f32.vlgmr.msra.gmra.mxu1 %vm1307_vm3, %v1400_v46 }
 0x3b3   : > { %v10126_v48 = vpop.eup %10125  ;;  %9476 = vmatpush3.msra.mxu1 %v1568_v47  ;;  %9477 = vmatprep.mubr.msk.f32.mxu1 %vm10336_vm0, %v10335_v2 }
 0x3b4   : > { %v1566_v49 = vmul.f32 %v10126_v48, %v10122_v40  ;;  %9485 = vmatprep.subr.mxu1 %v10335_v2 }
 0x3b6   : > { %9478 = vmatmul.mubr.msk.f32.vlgmr.msra.gmra.mxu1 %vm1307_vm3, %v1566_v49 }
 0x3b7   : > { %9487 = vmatprep.mubr.msk.f32.mxu1 %vm10336_vm0, %v10335_v2  ;;  %9486 = vmatpush3.msra.mxu1 %v1298_v50 }
 0x3b8   : > { %9495 = vmatprep.subr.mxu1 %v10335_v2 }
 0x472   : > { %v1473_v52 = vpop.f32.mrf.mxu1 }
 0x473   : > { %9488 = vmatmul.mubr.msk.f32.vlgmr.msra.gmra.mxu1 %vm1307_vm3, %v1473_v52 }
 0x474   : > { %v9469_v53 = vpop.f32.mrf.mxu1  ;;  %9497 = vmatprep.mubr.msk.f32.mxu1 %vm10336_vm0, %v10335_v2 }
 0x476   : > { %v1639_v54 = vpop.f32.mrf.mxu1 }
 0x477   : > { %9483 = vmatmul.mubr.msk.f32.vlgmr.msra.gmra.mxu0 %vm1307_vm3, %v1639_v54  ;;  %v2310_v54 = vld [vmem:[%s11696_s19 + $0x18] sm:$0xff] }
 0x478   : > { %9491 = vmatpush3.xpose.msk.msra.mxu0 %vm1307_vm3, %v1792_v55  ;;  %v9479_v56 = vpop.f32.mrf.mxu1  ;;  %9492 = vmatprep.mubr.msk.f32.mxu0 %vm10336_vm0, %v10335_v2  ;;  %v2309_v55 = vld [vmem:[%s11696_s19 + $0x10] sm:$0xff] }
 0x479   : > { %9500 = vmatprep.subr.mxu0 %v10335_v2  ;;  %v2307_v56 = vld [vmem:[%s11696_s19] sm:$0xff] }
 0x47b   : > { %9493 = vmatmul.mubr.msk.f32.vlgmr.msra.gmra.mxu0 %vm1307_vm3, %v1790_v57  ;;  %v2319_v57 = vld [vmem:[%s11689_s30 + $0x38] sm:$0xff] }
 0x47c   : > { %9502 = vmatprep.mubr.msk.f32.mxu0 %vm10336_vm0, %v10335_v2  ;;  %9501 = vmatpush3.msra.mxu0 %v1300_v20 }
 0x47d   : > { %9510 = vmatprep.subr.mxu0 %v10335_v2 }
 0x533   : > { %v1785_v58 = vpop.f32.mrf.mxu1 }
 0x535   : > { %v9489_v59 = vpop.f32.mrf.mxu1 }
 0x536   : > { %v2317_v59 = vld [vmem:[%s11689_s30 + $0x28] sm:$0xff] }
 0x537   : > { %v1712_v60 = vpop.f32.mrf.mxu0 }
 0x538   : > { %v10701_v61 = vadd.f32 %v1785_v58, %v1712_v60  ;;  %v2318_v58 = vld [vmem:[%s11689_s30 + $0x30] sm:$0xff]  ;;  %v2316_v60 = vld [vmem:[%s11689_s30 + $0x20] sm:$0xff] }
 0x539   : > { %v9484_v62 = vpop.f32.mrf.mxu0 }
 0x53b   : > { %v1863_v63 = vpop.f32.mrf.mxu0 }
 0x53c   : > { %v1867_v0 = vsel %vm1388_vm5, -1e+10, %v1863_v63 }
 0x53d   : > { %v9494_v3 = vpop.f32.mrf.mxu0  ;;  %v1868_v4 = vsel %vm1307_vm3, %v1867_v0, -inf }
 0x53e   : > { %1869 = vmax.xlane.f32.xlu1 %v1868_v4  ;;  %v8990_v4 = vld [vmem:[%s11693_s8] ss:$0 sm:$0xff] }
 0x54f   : > { %2031 = vrot.lane.b32.xlu1 %v10635_v15, %s11616_s23  ;;  %s11618_s23 = smov 40  }
 0x553   : > { %2029 = vrot.lane.b32.xlu1 %v10640_v17, %s11620_s28  ;;  %s11715_s28 = smov 88  }
 0x5c7   : > { %v1870_v6 = vpop.xlane.xlu1 %1869 }
 0x5c8   : > { %v1871_v8 = vsub.f32 %v1867_v0, %v1870_v6 }
 0x5ca   : > { %v1872_v9 = vmul.f32 1.442695, %v1871_v8  ;;  %v8991_v8 = vld [vmem:[%s11692_s14] ss:$0 sm:$0xff] }
 0x5cb   : > { %v2032_v17 = vpop.permute.xlu1 %2031 }
 0x5cc   : > { %10127 = vpow2.f32 %v1872_v9 }
 0x5cf   : > { %v2030_v19 = vpop.permute.xlu1 %2029 }
 0x5d9   : > { %v10128_v10 = vpop.eup %10127 }
 0x5da   : > { %v1874_v11 = vsel %vm1307_vm3, %v10128_v10, 0.0 }
 0x5db   : > { %1875 = vadd.xlane.f32.xlu0 %v1874_v11  ;;  %v2314_v11 = vld [vmem:[%s11689_s30 + $0x10] sm:$0xff] }
 0x5f1   : > { %1879 = vrot.lane.b32.xlu0 %v10635_v15, %s11622_s5  ;;  %s11716_s5 = smov 96  }
 0x664   : > { %v1876_v13 = vpop.xlane.xlu0 %1875 }
 0x665   : > { %10129 = vrcp.f32 %v1876_v13  ;;  %v2313_v13 = vld [vmem:[%s11689_s30 + $0x8] sm:$0xff] }
 0x668   : > { %v1880_v14 = vpop.permute.xlu0 %1879 }
 0x669   : > { %9496 = vmatpush3.msra.mxu1 %v1880_v14  ;;  %v2312_v14 = vld [vmem:[%s11689_s30] sm:$0xff] }
 0x66a   : > { %9505 = vmatprep.subr.mxu1 %v10335_v2 }
 0x672   : > { %v10130_v16 = vpop.eup %10129 }
 0x673   : > { %v1878_v18 = vmul.f32 %v10130_v16, %v10128_v10  ;;  %v8992_v16 = vld [vmem:[%s11691_s24] ss:$0 sm:$0xff] }
 0x675   : > { %9498 = vmatmul.mubr.msk.f32.vlgmr.msra.gmra.mxu1 %vm1307_vm3, %v1878_v18 }
 0x676   : > { %9506 = vmatpush3.xpose.msk.msra.mxu1 %vm1307_vm3, %v2032_v17  ;;  %9507 = vmatprep.mubr.msk.f32.mxu1 %vm10336_vm0, %v10335_v2 }
 0x677   : > { %9515 = vmatprep.subr.mxu1 %v10335_v2 }
 0x679   : > { %9508 = vmatmul.mubr.msk.f32.vlgmr.msra.gmra.mxu1 %vm1307_vm3, %v2030_v19 }
 0x67a   : > { %9517 = vmatprep.mubr.msk.f32.mxu1 %vm10336_vm0, %v10335_v2  ;;  %9516 = vmatpush3.msra.mxu1 %v1301_v34  ;;  %v9000_v34 = vld [vmem:[%s11699_s21 + $0x30] sm:$0xff] }
 0x67b   : > { %9531 = vmatprep.subr.mxu1 %v10335_v2 }
 0x735   : > { %v1951_v21 = vpop.f32.mrf.mxu1 }
 0x736   : > { %9503 = vmatmul.mubr.msk.f32.vlgmr.msra.gmra.mxu0 %vm1307_vm3, %v1951_v21  ;;  %v8994_v21 = vld [vmem:[%s11694_s6] ss:$0 sm:$0xff] }
 0x737   : > { %v9499_v22 = vpop.f32.mrf.mxu1  ;;  %9512 = vmatprep.mubr.msk.f32.mxu0 %vm10336_vm0, %v10335_v2 }
 0x739   : > { %v2103_v24 = vpop.f32.mrf.mxu1 }
 0x73a   : > { %v2107_v25 = vsel %vm1388_vm5, -1e+10, %v2103_v24 }
 0x73b   : > { %v9509_v26 = vpop.f32.mrf.mxu1  ;;  %v2108_v27 = vsel %vm1307_vm3, %v2107_v25, -inf }
 0x73c   : > { %2109 = vmax.xlane.f32.xlu0 %v2108_v27 }
 0x752   : > { %2119 = vrot.lane.b32.xlu0 %v10635_v15, %s11618_s23  ;;  %s11714_s23 = sld [smem:[#allocation20_spill]] }
 0x7c5   : > { %v2110_v28 = vpop.xlane.xlu0 %2109 }
 0x7c6   : > { %v2111_v29 = vsub.f32 %v2107_v25, %v2110_v28 }
 0x7c8   : > { %v2112_v30 = vmul.f32 1.442695, %v2111_v29 }
 0x7c9   : > { %v2120_v31 = vpop.permute.xlu0 %2119 }
 0x7ca   : > { %10131 = vpow2.f32 %v2112_v30  ;;  %9511 = vmatpush3.msra.mxu0 %v2120_v31 }
 0x7cb   : > { %9520 = vmatprep.subr.mxu0 %v10335_v2 }
 0x7d7   : > { %v10132_v32 = vpop.eup %10131 }
 0x7d8   : > { %v2114_v33 = vsel %vm1307_vm3, %v10132_v32, 0.0 }
 0x7d9   : > { %2115 = vadd.xlane.f32.xlu1 %v2114_v33  ;;  %v9001_v33 = vld [vmem:[%s11699_s21 + $0x38] sm:$0xff] }
 0x7f6   : > { %v2024_v35 = vpop.f32.mrf.mxu0 }
 0x7f7   : > { %v2028_v15 = vadd.f32 %v2024_v35, %v10701_v61  ;;  %v2315_v61 = vld [vmem:[%s11689_s30 + $0x18] sm:$0xff]  ;;  %v8999_v35 = vld [vmem:[%s11699_s21 + $0x28] sm:$0xff] }
 0x7f8   : > { %v9504_v36 = vpop.f32.mrf.mxu0 }
 0x862   : > { %v2116_v37 = vpop.xlane.xlu1 %2115 }
 0x863   : > { %10133 = vrcp.f32 %v2116_v37 }
 0x870   : > { %v10134_v38 = vpop.eup %10133 }
 0x871   : > { %v2118_v39 = vmul.f32 %v10134_v38, %v10132_v32 }
 0x873   : > { %9513 = vmatmul.mubr.msk.f32.vlgmr.msra.gmra.mxu0 %vm1307_vm3, %v2118_v39 }
 0x874   : > { %9528 = vmatprep.mubr.msk.f32.mxu0 %vm10336_vm0, %v10335_v2  ;;  %9521 = vmatpush3.msra.mxu0 %v2310_v54 }
 0x875   : > { %9522 = vmatprep.subr.mxu0 %v10335_v2 }
 0x876   : > { %9523 = vmatpush3.msra.mxu0 %v2309_v55 }
 0x877   : > { %9524 = vmatprep.subr.mxu0 %v10335_v2 }
 0x933   : > { %v2191_v40 = vpop.f32.mrf.mxu0 }
 0x934   : > { %9518 = vmatmul.mubr.msk.f32.vlgmr.msra.gmra.mxu1 %vm1307_vm3, %v2191_v40  ;;  %v8996_v40 = vld [vmem:[%s11690_s12] ss:$0 sm:$0xff] }
 0x935   : > { %v9514_v41 = vpop.f32.mrf.mxu0  ;;  %9547 = vmatprep.mubr.msk.f32.mxu1 %vm10336_vm0, %v10335_v2  ;;  %9532 = vmatpush3.msra.mxu1 %v2319_v57 }
 0x936   : > { %9533 = vmatprep.subr.mxu1 %v10335_v2 }
 0x937   : > { %9534 = vmatpush3.msra.mxu1 %v2318_v58 }
 0x938   : > { %9535 = vmatprep.subr.mxu1 %v10335_v2 }
 0x939   : > { %9536 = vmatpush3.msra.mxu1 %v2317_v59 }
 0x93a   : > { %9537 = vmatprep.subr.mxu1 %v10335_v2 }
 0x93b   : > { %9538 = vmatpush3.msra.mxu1 %v2316_v60 }
 0x93c   : > { %9539 = vmatprep.subr.mxu1 %v10335_v2 }
 0x93d   : > { %9540 = vmatpush3.msra.mxu1 %v2315_v61 }
 0x93e   : > { %9541 = vmatprep.subr.mxu1 %v10335_v2 }
 0x93f   : > { %9542 = vmatpush3.msra.mxu1 %v2314_v11 }
 0x940   : > { %9543 = vmatprep.subr.mxu1 %v10335_v2 }
 0x941   : > { %9544 = vmatpush3.msra.mxu1 %v2313_v13 }
 0x942   : > { %9545 = vmatprep.subr.mxu1 %v10335_v2 }
 0x943   : > { %9546 = vmatpush3.msra.mxu1 %v2312_v14 }
 0x944   : > { %9566 = vmatprep.subr.mxu1 %v10335_v2 }
 0x9f4   : > { %v2264_v43 = vpop.f32.mrf.mxu1 }
 0x9f5   : > { %v2268_v44 = vadd.f32 %v2264_v43, %v2028_v15  ;;  %v8998_v15 = vld [vmem:[%s11699_s21 + $0x20] sm:$0xff]  ;;  %s11720_s21 = smov 64  }
 0x9f6   : > { %v9519_v45 = vpop.f32.mrf.mxu1 }
 0x9f7   : > { %v2275_v46 = vadd.f32 %v8989_v42, %v2268_v44  ;;  %v8997_v42 = vld [vmem:[%s11714_s23] ss:$0 sm:$0xff]  ;;  %v9003_v45 = vld [vmem:[%s11698_s25 + $0x1] ss:$0 sm:$0xff]  ;;  %s11721_s25 = smov 80  }
 0x9f9   : > { %v2278_v47 = vadd.f32 %v2275_v46, %v10623_v7  ;;  %v2308_v7 = vld [vmem:[%s11696_s19 + $0x8] sm:$0xff] }
 0x9fa   : > { %9525 = vmatpush3.msra.mxu0 %v2308_v7 }
 0x9fb   : > { %v2279_v48 = vsel %vm1224_vm1, %v2278_v47, 0.0  ;;  %9526 = vmatprep.subr.mxu0 %v10335_v2 }
 0x9fc   : > { %2280 = vadd.xlane.f32.xlu1 %v2279_v48  ;;  %9527 = vmatpush3.msra.mxu0 %v2307_v56 }
 0x9fd   : > { %9550 = vmatprep.subr.mxu0 %v10335_v2 }
 0xa85   : > { %v2281_v49 = vpop.xlane.xlu1 %2280 }
 0xa86   : > { %v2283_v50 = vmul.f32 0.03125, %v2281_v49 }
 0xa88   : > { %v2284_v51 = vsub.f32 %v2278_v47, %v2283_v50 }
 0xa8a   : > { %v2285_v52 = vmul.f32 %v2284_v51, %v2284_v51 }
 0xa8c   : > { %v2286_v53 = vsel %vm1224_vm1, %v2285_v52, 0.0 }
 0xa8d   : > { %2287 = vadd.xlane.f32.xlu1 %v2286_v53 }
 0xb16   : > { %v2288_v62 = vpop.xlane.xlu1 %2287 }
 0xb17   : > { %v2289_v63 = vmul.f32 0.03125, %v2288_v62 }
 0xb19   : > { %v2290_v0 = vadd.f32 1e-05, %v2289_v63 }
 0xb1b   : > { %10135 = vrsqrt.f32 %v2290_v0 }
 0xb28   : > { %v10136_v3 = vpop.eup %10135 }
 0xb29   : > { %v2292_v6 = vmul.f32 %v10136_v3, %v2284_v51 }
 0xb2b   : > { %v2299_v9 = vmul.f32 %v8990_v4, %v2292_v6 }
 0xb2d   : > { %v2306_v10 = vadd.f32 %v8991_v8, %v2299_v9 }
 0xb2f   : > { %9529 = vmatmul.mubr.msk.f32.vlgmr.msra.gmra.mxu0 %vm1224_vm1, %v2306_v10 }
 0xb30   : > { %9558 = vmatprep.mubr.msk.f32.mxu0 %vm10336_vm0, %v10335_v2  ;;  %9551 = vmatpush3.msra.mxu0 %v9001_v33 }
 0xb31   : > { %9552 = vmatprep.subr.mxu0 %v10335_v2 }
 0xb32   : > { %9553 = vmatpush3.msra.mxu0 %v9000_v34 }
 0xb33   : > { %9554 = vmatprep.subr.mxu0 %v10335_v2 }
 0xb34   : > { %9555 = vmatpush3.msra.mxu0 %v8999_v35 }
 0xb35   : > { %9556 = vmatprep.subr.mxu0 %v10335_v2 }
 0xb36   : > { %9557 = vmatpush3.msra.mxu0 %v8998_v15 }
 0xb37   : > { %9561 = vmatprep.subr.mxu0 %v10335_v2 }
 0xbef   : > { %v2396_v17 = vpop.f32.mrf.mxu0 }
 0xbf0   : > { %v2397_v18 = vadd.f32 %v8992_v16, %v2396_v17 }
 0xbf1   : > { %v9530_v19 = vpop.f32.mrf.mxu0 }
 0xbf2   : > { %v2400_v20 = vmax.f32 %v2397_v18, 0.0 }
 0xbf4   : > { %9548 = vmatmul.mubr.msk.f32.vlgmr.msra.gmra.mxu1 %vm2407_vm6, %v2400_v20  ;;  %v9005_v20 = vld [vmem:[%s11695_s29 + $0x20] sm:$0xff] }
 0xbf5   : > { %9568 = vmatprep.mubr.msk.f32.mxu1 %vm10336_vm0, %v10335_v2 }
 0xcb4   : > { %v2477_v22 = vpop.f32.mrf.mxu1 }
 0xcb5   : > { %v2478_v24 = vadd.f32 %v8994_v21, %v2477_v22  ;;  %v9006_v21 = vld [vmem:[%s11695_s29 + $0x28] sm:$0xff] }
 0xcb6   : > { %v9549_v25 = vpop.f32.mrf.mxu1 }
 0xcb7   : > { %v2483_v26 = vadd.f32 %v2478_v24, %v2306_v10 }
 0xcb9   : > { %v2484_v27 = vsel %vm1224_vm1, %v2483_v26, 0.0 }
 0xcba   : > { %2485 = vadd.xlane.f32.xlu1 %v2484_v27 }
 0xd43   : > { %v2486_v28 = vpop.xlane.xlu1 %2485 }
 0xd44   : > { %v2487_v29 = vmul.f32 0.03125, %v2486_v28 }
 0xd46   : > { %v2488_v30 = vsub.f32 %v2483_v26, %v2487_v29 }
 0xd48   : > { %v2489_v31 = vmul.f32 %v2488_v30, %v2488_v30 }
 0xd4a   : > { %v2490_v32 = vsel %vm1224_vm1, %v2489_v31, 0.0 }
 0xd4b   : > { %2491 = vadd.xlane.f32.xlu1 %v2490_v32 }
 0xdd4   : > { %v2492_v36 = vpop.xlane.xlu1 %2491 }
 0xdd5   : > { %v2493_v37 = vmul.f32 0.03125, %v2492_v36 }
 0xdd7   : > { %v2494_v38 = vadd.f32 1e-05, %v2493_v37 }
 0xdd9   : > { %10137 = vrsqrt.f32 %v2494_v38 }
 0xde6   : > { %v10138_v39 = vpop.eup %10137 }
 0xde7   : > { %v2496_v41 = vmul.f32 %v10138_v39, %v2488_v30 }
 0xde9   : > { %v2503_v43 = vmul.f32 %v8996_v40, %v2496_v41 }
 0xdeb   : > { %v10793_v44 = vadd.f32 %v8997_v42, %v2503_v43 }
 0xded   : > { %9559 = vmatmul.mubr.msk.f32.vlgmr.msra.gmra.mxu0 %vm1224_vm1, %v10793_v44 }
 0xdee   : > { %9563 = vmatprep.mubr.msk.f32.mxu0 %vm10336_vm0, %v10335_v2 }
 0xead   : > { %v2593_v46 = vpop.f32.mrf.mxu0 }
 0xeae   : > { %v10800_v47 = vadd.f32 %v9003_v45, %v2593_v46 }
 0xeaf   : > { %v9560_v48 = vpop.f32.mrf.mxu0 }
 0xeb0   : > { %2773 = vrot.lane.b32.xlu0 %v10800_v47, %s11715_s28  ;;  %2606 = vrot.lane.b32.xlu1 %v10800_v47, %s11716_s5  ;;  %v10807_v49 = vmul.f32 0.35355338, %v10800_v47 }
 0xeb4   : > { %2771 = vrot.lane.b32.xlu0 %v10807_v49, %s11717_s1 }
 0xf22   : > { %v2607_v50 = vpop.permute.xlu1 %2606  ;;  %v2774_v51 = vpop.permute.xlu0 %2773 }
 0xf23   : > { %9562 = vmatpush3.xpose.msk.msra.mxu0 %vm1307_vm3, %v2607_v50  ;;  %v9007_v50 = vld [vmem:[%s11695_s29 + $0x30] sm:$0xff] }
 0xf24   : > { %9571 = vmatprep.subr.mxu0 %v10335_v2 }
 0xf26   : > { %9564 = vmatmul.mubr.msk.f32.vlgmr.msra.gmra.mxu0 %vm1307_vm3, %v10807_v49  ;;  %v2772_v52 = vpop.permute.xlu0 %2771 }
 0xf27   : > { %9572 = vmatpush3.xpose.msk.msra.mxu0 %vm1307_vm3, %v2774_v51  ;;  %9573 = vmatprep.mubr.msk.f32.mxu0 %vm10336_vm0, %v10335_v2 }
 0xf28   : > { %9581 = vmatprep.subr.mxu0 %v10335_v2 }
 0xf2a   : > { %9574 = vmatmul.mubr.msk.f32.vlgmr.msra.gmra.mxu0 %vm1307_vm3, %v2772_v52 }
 0xf2b   : > { %9583 = vmatprep.mubr.msk.f32.mxu0 %vm10336_vm0, %v10335_v2  ;;  %9582 = vmatpush3.msra.mxu0 %v9006_v21 }
 0xf2c   : > { %9591 = vmatprep.subr.mxu0 %v10335_v2 }
 0xfe6   : > { %v2679_v53 = vpop.f32.mrf.mxu0 }
 0xfe7   : > { %v2683_v54 = vsel %vm1388_vm5, -1e+10, %v2679_v53 }
 0xfe8   : > { %v9565_v55 = vpop.f32.mrf.mxu0  ;;  %v2684_v7 = vsel %vm1307_vm3, %v2683_v54, -inf }
 0xfe9   : > { %2685 = vmax.xlane.f32.xlu0 %v2684_v7 }
 0xfea   : > { %v2845_v56 = vpop.f32.mrf.mxu0 }
 0xfeb   : > { %v2849_v57 = vsel %vm1388_vm5, -1e+10, %v2845_v56 }
 0xfec   : > { %v9575_v58 = vpop.f32.mrf.mxu0  ;;  %v2850_v59 = vsel %vm1307_vm3, %v2849_v57, -inf }
 0xfed   : > { %2851 = vmax.xlane.f32.xlu1 %v2850_v59 }
 0xffe   : > { %2861 = vrot.lane.b32.xlu1 %v10800_v47, %s11718_s13 }
0x1002   : > { %3083 = vrot.lane.b32.xlu1 %v10807_v49, %s11719_s17 }
0x1072   : > { %v2686_v60 = vpop.xlane.xlu0 %2685 }
0x1073   : > { %v2687_v61 = vsub.f32 %v2683_v54, %v2686_v60 }
0x1075   : > { %v2688_v62 = vmul.f32 1.442695, %v2687_v61  ;;  %v9008_v61 = vld [vmem:[%s11695_s29 + $0x38] sm:$0xff]  ;;  %s11728_s29 = sshll.u32 %s10605_s11, 3 }
0x1076   : > { %v2852_v63 = vpop.xlane.xlu1 %2851 }
0x1077   : > { %10139 = vpow2.f32 %v2688_v62  ;;  %v2853_v0 = vsub.f32 %v2849_v57, %v2852_v63 }
0x1079   : > { %v2854_v3 = vmul.f32 1.442695, %v2853_v0 }
0x107a   : > { %v2862_v17 = vpop.permute.xlu1 %2861 }
0x107b   : > { %10141 = vpow2.f32 %v2854_v3 }
0x107e   : > { %v3084_v28 = vpop.permute.xlu1 %3083 }
0x1084   : > { %v10140_v4 = vpop.eup %10139 }
0x1085   : > { %v2690_v6 = vsel %vm1307_vm3, %v10140_v4, 0.0 }
0x1086   : > { %2691 = vadd.xlane.f32.xlu0 %v2690_v6 }
0x1088   : > { %v10142_v8 = vpop.eup %10141 }
0x1089   : > { %v2856_v9 = vsel %vm1307_vm3, %v10142_v8, 0.0 }
0x108a   : > { %2857 = vadd.xlane.f32.xlu0 %v2856_v9 }
0x10a0   : > { %2695 = vrot.lane.b32.xlu0 %v10800_v47, %s11720_s21 }
0x10a4   : > { %3085 = vrot.lane.b32.xlu0 %v10800_v47, %s11721_s25 }
0x110f   : > { %v2692_v10 = vpop.xlane.xlu0 %2691 }
0x1110   : > { %10143 = vrcp.f32 %v2692_v10  ;;  %v9026_v10 = vld [vmem:[%s11697_s3 + $0x1] ss:$0 sm:$0xff]  ;;  %s11726_s3 = sld [smem:[#allocation21_spill]] }
0x1113   : > { %v2858_v11 = vpop.xlane.xlu0 %2857 }
0x1114   : > { %10145 = vrcp.f32 %v2858_v11 }
0x1117   : > { %v2696_v13 = vpop.permute.xlu0 %2695 }
0x1118   : > { %9567 = vmatpush3.msra.mxu1 %v2696_v13 }
0x1119   : > { %9576 = vmatprep.subr.mxu1 %v10335_v2 }
0x111b   : > { %v3086_v26 = vpop.permute.xlu0 %3085 }
0x111d   : > { %v10144_v14 = vpop.eup %10143 }
0x111e   : > { %v2694_v16 = vmul.f32 %v10144_v14, %v10140_v4 }
0x1120   : > { %9569 = vmatmul.mubr.msk.f32.vlgmr.msra.gmra.mxu1 %vm1307_vm3, %v2694_v16 }
0x1121   : > { %v10146_v18 = vpop.eup %10145  ;;  %9577 = vmatpush3.msra.mxu1 %v2862_v17  ;;  %9578 = vmatprep.mubr.msk.f32.mxu1 %vm10336_vm0, %v10335_v2 }
0x1122   : > { %v2860_v19 = vmul.f32 %v10146_v18, %v10142_v8  ;;  %9586 = vmatprep.subr.mxu1 %v10335_v2 }
0x1124   : > { %9579 = vmatmul.mubr.msk.f32.vlgmr.msra.gmra.mxu1 %vm1307_vm3, %v2860_v19 }
0x1125   : > { %9588 = vmatprep.mubr.msk.f32.mxu1 %vm10336_vm0, %v10335_v2  ;;  %9587 = vmatpush3.msra.mxu1 %v9005_v20 }
0x1126   : > { %9596 = vmatprep.subr.mxu1 %v10335_v2 }
0x11e0   : > { %v2767_v22 = vpop.f32.mrf.mxu1 }
0x11e1   : > { %9589 = vmatmul.mubr.msk.f32.vlgmr.msra.gmra.mxu1 %vm1307_vm3, %v2767_v22 }
0x11e2   : > { %v9570_v24 = vpop.f32.mrf.mxu1  ;;  %9598 = vmatprep.mubr.msk.f32.mxu1 %vm10336_vm0, %v10335_v2 }
0x11e4   : > { %v2933_v25 = vpop.f32.mrf.mxu1 }
0x11e5   : > { %9584 = vmatmul.mubr.msk.f32.vlgmr.msra.gmra.mxu0 %vm1307_vm3, %v2933_v25  ;;  %v9034_v25 = vld [vmem:[%s11696_s19 + $0x38] sm:$0xff] }
0x11e6   : > { %9592 = vmatpush3.xpose.msk.msra.mxu0 %vm1307_vm3, %v3086_v26  ;;  %v9580_v27 = vpop.f32.mrf.mxu1  ;;  %9593 = vmatprep.mubr.msk.f32.mxu0 %vm10336_vm0, %v10335_v2  ;;  %v9033_v26 = vld [vmem:[%s11696_s19 + $0x30] sm:$0xff] }
0x11e7   : > { %9601 = vmatprep.subr.mxu0 %v10335_v2  ;;  %v9031_v27 = vld [vmem:[%s11696_s19 + $0x20] sm:$0xff] }
0x11e9   : > { %9594 = vmatmul.mubr.msk.f32.vlgmr.msra.gmra.mxu0 %vm1307_vm3, %v3084_v28  ;;  %v9043_v28 = vld [vmem:[%s11689_s30 + $0x78] sm:$0xff] }
0x11ea   : > { %9603 = vmatprep.mubr.msk.f32.mxu0 %vm10336_vm0, %v10335_v2  ;;  %9602 = vmatpush3.msra.mxu0 %v9007_v50  ;;  %v9036_v50 = vld [vmem:[%s11689_s30 + $0x40] sm:$0xff] }
0x11eb   : > { %9611 = vmatprep.subr.mxu0 %v10335_v2 }
0x12a1   : > { %v3079_v29 = vpop.f32.mrf.mxu1 }
0x12a3   : > { %v9590_v30 = vpop.f32.mrf.mxu1 }
0x12a4   : > { %v9041_v30 = vld [vmem:[%s11689_s30 + $0x68] sm:$0xff] }
0x12a5   : > { %v3006_v31 = vpop.f32.mrf.mxu0 }
0x12a6   : > { %v3080_v32 = vadd.f32 %v3079_v29, %v3006_v31  ;;  %v9042_v29 = vld [vmem:[%s11689_s30 + $0x70] sm:$0xff]  ;;  %v9040_v31 = vld [vmem:[%s11689_s30 + $0x60] sm:$0xff] }
0x12a7   : > { %v9585_v33 = vpop.f32.mrf.mxu0 }
0x12a9   : > { %v3157_v34 = vpop.f32.mrf.mxu0 }
0x12aa   : > { %v3161_v35 = vsel %vm1388_vm5, -1e+10, %v3157_v34 }
0x12ab   : > { %v9595_v15 = vpop.f32.mrf.mxu0  ;;  %v3162_v36 = vsel %vm1307_vm3, %v3161_v35, -inf }
0x12ac   : > { %3163 = vmax.xlane.f32.xlu0 %v3162_v36  ;;  %v9029_v36 = vld [vmem:[%s11693_s8 + $0x1] ss:$0 sm:$0xff] }
0x12c2   : > { %3173 = vrot.lane.b32.xlu0 %v10800_v47, %s11722_s2 }
0x12c6   : > { %3323 = vrot.lane.b32.xlu0 %v10807_v49, %s11723_s18 }
0x1335   : > { %v3164_v37 = vpop.xlane.xlu0 %3163 }
0x1336   : > { %v3165_v38 = vsub.f32 %v3161_v35, %v3164_v37 }
0x1338   : > { %v3166_v39 = vmul.f32 1.442695, %v3165_v38  ;;  %v9030_v38 = vld [vmem:[%s11692_s14 + $0x1] ss:$0 sm:$0xff]  ;;  %s11738_s14 = sld [smem:[#allocation25_spill]] }
0x1339   : > { %v3174_v40 = vpop.permute.xlu0 %3173 }
0x133a   : > { %10147 = vpow2.f32 %v3166_v39  ;;  %9597 = vmatpush3.msra.mxu1 %v3174_v40 }
0x133b   : > { %9606 = vmatprep.subr.mxu1 %v10335_v2 }
0x133d   : > { %v3324_v49 = vpop.permute.xlu0 %3323 }
0x1347   : > { %v10148_v41 = vpop.eup %10147 }
0x1348   : > { %v3168_v42 = vsel %vm1307_vm3, %v10148_v41, 0.0 }
0x1349   : > { %3169 = vadd.xlane.f32.xlu1 %v3168_v42  ;;  %v3813_v42 = vld [vmem:[%s11726_s3 + $0x10] sm:$0xff] }
0x135a   : > { %3325 = vrot.lane.b32.xlu1 %v10800_v47, %s11724_s26 }
0x13d2   : > { %v3170_v43 = vpop.xlane.xlu1 %3169 }
0x13d3   : > { %10149 = vrcp.f32 %v3170_v43  ;;  %v3812_v43 = vld [vmem:[%s11726_s3 + $0x8] sm:$0xff] }
0x13d6   : > { %v3326_v48 = vpop.permute.xlu1 %3325 }
0x13e0   : > { %v10150_v45 = vpop.eup %10149 }
0x13e1   : > { %v3172_v46 = vmul.f32 %v10150_v45, %v10148_v41  ;;  %v3814_v41 = vld [vmem:[%s11726_s3 + $0x18] sm:$0xff]  ;;  %v3811_v45 = vld [vmem:[%s11726_s3] sm:$0xff] }
0x13e3   : > { %9599 = vmatmul.mubr.msk.f32.vlgmr.msra.gmra.mxu1 %vm1307_vm3, %v3172_v46 }
0x13e4   : > { %9607 = vmatpush3.xpose.msk.msra.mxu1 %vm1307_vm3, %v3326_v48  ;;  %9608 = vmatprep.mubr.msk.f32.mxu1 %vm10336_vm0, %v10335_v2  ;;  %v9038_v48 = vld [vmem:[%s11689_s30 + $0x50] sm:$0xff] }
0x13e5   : > { %9616 = vmatprep.subr.mxu1 %v10335_v2 }
0x13e7   : > { %9609 = vmatmul.mubr.msk.f32.vlgmr.msra.gmra.mxu1 %vm1307_vm3, %v3324_v49  ;;  %v9037_v49 = vld [vmem:[%s11689_s30 + $0x48] sm:$0xff] }
0x13e8   : > { %9618 = vmatprep.mubr.msk.f32.mxu1 %vm10336_vm0, %v10335_v2  ;;  %9617 = vmatpush3.msra.mxu1 %v9008_v61 }
0x13e9   : > { %9632 = vmatprep.subr.mxu1 %v10335_v2 }
0x14a3   : > { %v3245_v51 = vpop.f32.mrf.mxu1 }
0x14a4   : > { %9604 = vmatmul.mubr.msk.f32.vlgmr.msra.gmra.mxu0 %vm1307_vm3, %v3245_v51  ;;  %v9045_v51 = vld [vmem:[%s11691_s24 + $0x1] ss:$0 sm:$0xff]  ;;  %s11739_s24 = sld [smem:[#allocation26_spill]] }
0x14a5   : > { %v9600_v52 = vpop.f32.mrf.mxu1  ;;  %9613 = vmatprep.mubr.msk.f32.mxu0 %vm10336_vm0, %v10335_v2 }
0x14a7   : > { %v3397_v53 = vpop.f32.mrf.mxu1 }
0x14a8   : > { %v3401_v54 = vsel %vm1388_vm5, -1e+10, %v3397_v53 }
0x14a9   : > { %v9610_v55 = vpop.f32.mrf.mxu1  ;;  %v3402_v7 = vsel %vm1307_vm3, %v3401_v54, -inf }
0x14aa   : > { %3403 = vmax.xlane.f32.xlu1 %v3402_v7 }
0x1533   : > { %v3404_v56 = vpop.xlane.xlu1 %3403 }
0x1534   : > { %v3405_v57 = vsub.f32 %v3401_v54, %v3404_v56 }
0x1536   : > { %v3406_v58 = vmul.f32 1.442695, %v3405_v57 }
0x1538   : > { %10151 = vpow2.f32 %v3406_v58 }
0x1545   : > { %v10152_v59 = vpop.eup %10151 }
0x1546   : > { %v3408_v60 = vsel %vm1307_vm3, %v10152_v59, 0.0 }
0x1547   : > { %3409 = vadd.xlane.f32.xlu0 %v3408_v60 }
0x155d   : > { %3413 = vrot.lane.b32.xlu0 %v10800_v47, %s11725_s10 }
0x1564   : > { %v3318_v62 = vpop.f32.mrf.mxu0 }
0x1565   : > { %v3322_v63 = vadd.f32 %v3318_v62, %v3080_v32  ;;  %v9039_v32 = vld [vmem:[%s11689_s30 + $0x58] sm:$0xff] }
0x1566   : > { %v9605_v0 = vpop.f32.mrf.mxu0 }
0x15d0   : > { %v3410_v3 = vpop.xlane.xlu0 %3409 }
0x15d1   : > { %10153 = vrcp.f32 %v3410_v3  ;;  %v1202_v3 = vand.u32 127, %v1199_v1 }
0x15d3   : > { %vm1205_vm8 = vcmp.gt.s32.totalorder %v1202_v3, %v10614_v5 }
0x15d4   : > { %v3414_v4 = vpop.permute.xlu0 %3413  ;;  %vm10985_vm9 = vmor %vm1211_vm7, %vm1205_vm8 }
0x15d5   : > { %9612 = vmatpush3.msra.mxu0 %v3414_v4 }
0x15d6   : > { %9621 = vmatprep.subr.mxu0 %v10335_v2 }
0x15de   : > { %v10154_v6 = vpop.eup %10153 }
0x15df   : > { %v3412_v8 = vmul.f32 %v10154_v6, %v10152_v59 }
0x15e1   : > { %9614 = vmatmul.mubr.msk.f32.vlgmr.msra.gmra.mxu0 %vm1307_vm3, %v3412_v8 }
0x15e2   : > { %9629 = vmatprep.mubr.msk.f32.mxu0 %vm10336_vm0, %v10335_v2  ;;  %9622 = vmatpush3.msra.mxu0 %v9034_v25 }
0x15e3   : > { %9623 = vmatprep.subr.mxu0 %v10335_v2 }
0x15e4   : > { %9624 = vmatpush3.msra.mxu0 %v9033_v26 }
0x15e5   : > { %9625 = vmatprep.subr.mxu0 %v10335_v2 }
0x16a1   : > { %v3485_v47 = vpop.f32.mrf.mxu0 }
0x16a2   : > { %9619 = vmatmul.mubr.msk.f32.vlgmr.msra.gmra.mxu1 %vm1307_vm3, %v3485_v47 }
0x16a3   : > { %v9615_v9 = vpop.f32.mrf.mxu0  ;;  %9648 = vmatprep.mubr.msk.f32.mxu1 %vm10336_vm0, %v10335_v2  ;;  %9633 = vmatpush3.msra.mxu1 %v9043_v28 }
0x16a4   : > { %9634 = vmatprep.subr.mxu1 %v10335_v2 }
0x16a5   : > { %9635 = vmatpush3.msra.mxu1 %v9042_v29 }
0x16a6   : > { %9636 = vmatprep.subr.mxu1 %v10335_v2 }
0x16a7   : > { %9637 = vmatpush3.msra.mxu1 %v9041_v30 }
0x16a8   : > { %9638 = vmatprep.subr.mxu1 %v10335_v2 }
0x16a9   : > { %9639 = vmatpush3.msra.mxu1 %v9040_v31 }
0x16aa   : > { %9640 = vmatprep.subr.mxu1 %v10335_v2 }
0x16ab   : > { %9641 = vmatpush3.msra.mxu1 %v9039_v32 }
0x16ac   : > { %9642 = vmatprep.subr.mxu1 %v10335_v2 }
0x16ad   : > { %9643 = vmatpush3.msra.mxu1 %v9038_v48 }
0x16ae   : > { %9644 = vmatprep.subr.mxu1 %v10335_v2 }
0x16af   : > { %9645 = vmatpush3.msra.mxu1 %v9037_v49 }
0x16b0   : > { %9646 = vmatprep.subr.mxu1 %v10335_v2 }
0x16b1   : > { %9647 = vmatpush3.msra.mxu1 %v9036_v50 }
0x16b2   : > { %9667 = vmatprep.subr.mxu1 %v10335_v2 }
0x1762   : > { %v3558_v11 = vpop.f32.mrf.mxu1 }
0x1763   : > { %v3562_v13 = vadd.f32 %v3558_v11, %v3322_v63 }
0x1764   : > { %v9620_v14 = vpop.f32.mrf.mxu1 }
0x1765   : > { %v3569_v16 = vadd.f32 %v9026_v10, %v3562_v13 }
0x1767   : > { %v3574_v17 = vadd.f32 %v3569_v16, %v10793_v44  ;;  %v9032_v44 = vld [vmem:[%s11696_s19 + $0x28] sm:$0xff]  ;;  %s11727_s19 = sld [smem:[#allocation6_spill]] }
0x1768   : > { %9626 = vmatpush3.msra.mxu0 %v9032_v44 }
0x1769   : > { %v3575_v18 = vsel %vm1224_vm1, %v3574_v17, 0.0  ;;  %9627 = vmatprep.subr.mxu0 %v10335_v2 }
0x176a   : > { %3576 = vadd.xlane.f32.xlu1 %v3575_v18  ;;  %9628 = vmatpush3.msra.mxu0 %v9031_v27 }
0x176b   : > { %9651 = vmatprep.subr.mxu0 %v10335_v2 }
0x176d   : > { %s1188_s15 = scalar_lea.vmem %s11727_s19, %s11728_s29  ;;  %s11729_s29 = sld [smem:[#allocation22_spill]] }
0x176e   : > { %v10939_v46 = vld [vmem:[%s1188_s15] sm:$0xff]  ;;  %s11732_s19 = sld [smem:[#allocation23_spill]] }
0x176f   : > { %s11733_s15 = sld [smem:[#allocation24_spill]] }
0x1773   : > { %v9053_v7 = vld [vmem:[%s11729_s29] ss:$0 sm:$0xff] }
0x1774   : > { %v3895_v31 = vld [vmem:[%s11732_s19] sm:$0xff]  ;;  %v3896_v32 = vld [vmem:[%s11732_s19 + $0x8] sm:$0xff] }
0x1775   : > { %s11734_s11 = smov %s11733_s15 }
0x17f3   : > { %v3577_v19 = vpop.xlane.xlu1 %3576 }
0x17f4   : > { %v3578_v20 = vmul.f32 0.03125, %v3577_v19 }
0x17f6   : > { %v3579_v21 = vsub.f32 %v3574_v17, %v3578_v20 }
0x17f8   : > { %v3580_v22 = vmul.f32 %v3579_v21, %v3579_v21 }
0x17fa   : > { %v3581_v24 = vsel %vm1224_vm1, %v3580_v22, 0.0 }
0x17fb   : > { %3582 = vadd.xlane.f32.xlu1 %v3581_v24 }
0x1884   : > { %v3583_v33 = vpop.xlane.xlu1 %3582 }
0x1885   : > { %v3584_v34 = vmul.f32 0.03125, %v3583_v33 }
0x1887   : > { %v3585_v35 = vadd.f32 1e-05, %v3584_v34 }
0x1889   : > { %10155 = vrsqrt.f32 %v3585_v35 }
0x1896   : > { %v10156_v15 = vpop.eup %10155 }
0x1897   : > { %v3587_v37 = vmul.f32 %v10156_v15, %v3579_v21 }
0x1899   : > { %v3594_v39 = vmul.f32 %v9029_v36, %v3587_v37 }
0x189b   : > { %v10924_v40 = vadd.f32 %v9030_v38, %v3594_v39 }
0x189d   : > { %9630 = vmatmul.mubr.msk.f32.vlgmr.msra.gmra.mxu0 %vm1224_vm1, %v10924_v40 }
0x189e   : > { %9652 = vmatpush3.msra.mxu0 %v3814_v41  ;;  %9659 = vmatprep.mubr.msk.f32.mxu0 %vm10336_vm0, %v10335_v2 }
0x189f   : > { %9653 = vmatprep.subr.mxu0 %v10335_v2 }
0x18a0   : > { %9654 = vmatpush3.msra.mxu0 %v3813_v42 }
0x18a1   : > { %9655 = vmatprep.subr.mxu0 %v10335_v2 }
0x18a2   : > { %9656 = vmatpush3.msra.mxu0 %v3812_v43 }
0x18a3   : > { %9657 = vmatprep.subr.mxu0 %v10335_v2 }
0x18a4   : > { %9658 = vmatpush3.msra.mxu0 %v3811_v45 }
0x18a5   : > { %9660 = vmatmul.mubr.msk.f32.vlgmr.msra.gmra.mxu0 %vm1224_vm1, %v10939_v46  ;;  %9662 = vmatprep.subr.mxu0 %v10335_v2 }
0x18a6   : > { %9664 = vmatprep.mubr.msk.f32.mxu0 %vm10336_vm0, %v10335_v2 }
0x195d   : > { %v3695_v52 = vpop.f32.mrf.mxu0 }
0x195e   : > { %v3696_v53 = vadd.f32 %v9045_v51, %v3695_v52 }
0x195f   : > { %v9631_v54 = vpop.f32.mrf.mxu0 }
0x1960   : > { %v3699_v55 = vmax.f32 %v3696_v53, 0.0 }
0x1962   : > { %9649 = vmatmul.mubr.msk.f32.vlgmr.msra.gmra.mxu1 %vm2407_vm6, %v3699_v55 }
0x1963   : > { %9669 = vmatprep.mubr.msk.f32.mxu1 %vm10336_vm0, %v10335_v2 }
0x1965   : > { %v3891_v56 = vpop.f32.mrf.mxu0 }
0x1966   : > { %v10958_v57 = vadd.f32 %v9053_v7, %v3891_v56 }
0x1967   : > { %v9661_v58 = vpop.f32.mrf.mxu0 }
0x1968   : > { %4069 = vrot.lane.b32.xlu0 %v10958_v57, %s11715_s28  ;;  %3902 = vrot.lane.b32.xlu1 %v10958_v57, %s11716_s5  ;;  %v10965_v59 = vmul.f32 0.35355338, %v10958_v57 }
0x196c   : > { %4067 = vrot.lane.b32.xlu0 %v10965_v59, %s11717_s1 }
0x19da   : > { %v3903_v60 = vpop.permute.xlu1 %3902  ;;  %v4070_v61 = vpop.permute.xlu0 %4069 }
0x19db   : > { %9663 = vmatpush3.xpose.msk.msra.mxu0 %vm1307_vm3, %v3903_v60 }
0x19dc   : > { %9672 = vmatprep.subr.mxu0 %v10335_v2 }
0x19de   : > { %9665 = vmatmul.mubr.msk.f32.vlgmr.msra.gmra.mxu0 %vm1307_vm3, %v10965_v59  ;;  %v4068_v62 = vpop.permute.xlu0 %4067 }
0x19df   : > { %9673 = vmatpush3.xpose.msk.msra.mxu0 %vm1307_vm3, %v4070_v61  ;;  %9674 = vmatprep.mubr.msk.f32.mxu0 %vm10336_vm0, %v10335_v2 }
0x19e0   : > { %9682 = vmatprep.subr.mxu0 %v10335_v2 }
0x19e2   : > { %9675 = vmatmul.mubr.msk.f32.vlgmr.msra.gmra.mxu0 %vm1307_vm3, %v4068_v62  ;;  %v3897_v62 = vld [vmem:[%s11732_s19 + $0x10] sm:$0xff] }
0x19e3   : > { %9684 = vmatprep.mubr.msk.f32.mxu0 %vm10336_vm0, %v10335_v2  ;;  %9683 = vmatpush3.msra.mxu0 %v3896_v32 }
0x19e4   : > { %9692 = vmatprep.subr.mxu0 %v10335_v2 }
0x1a22   : > { %v10980_v63 = vpop.f32.mrf.mxu1 }
0x1a24   : > { %v9650_v0 = vpop.f32.mrf.mxu1 }
0x1a9e   : > { %v3975_v6 = vpop.f32.mrf.mxu0 }
0x1a9f   : > { %v3979_v8 = vsel %vm10985_vm9, -1e+10, %v3975_v6 }
0x1aa0   : > { %v9666_v47 = vpop.f32.mrf.mxu0  ;;  %v3980_v9 = vsel %vm1307_vm3, %v3979_v8, -inf }
0x1aa1   : > { %3981 = vmax.xlane.f32.xlu1 %v3980_v9 }
0x1aa2   : > { %v4141_v10 = vpop.f32.mrf.mxu0 }
0x1aa3   : > { %v4145_v1 = vsel %vm10985_vm9, -1e+10, %v4141_v10 }
0x1aa4   : > { %v9676_v11 = vpop.f32.mrf.mxu0  ;;  %v4146_v12 = vsel %vm1307_vm3, %v4145_v1, -inf }
0x1aa5   : > { %4147 = vmax.xlane.f32.xlu0 %v4146_v12 }
0x1b2a   : > { %v3982_v5 = vpop.xlane.xlu1 %3981 }
0x1b2b   : > { %v3983_v13 = vsub.f32 %v3979_v8, %v3982_v5  ;;  %v9047_v5 = vld [vmem:[%s11694_s6 + $0x1] ss:$0 sm:$0xff]  ;;  %s11735_s6 = sld [smem:[#allocation29_spill]] }
0x1b2d   : > { %v3984_v14 = vmul.f32 1.442695, %v3983_v13  ;;  %v3776_v13 = vadd.f32 %v9047_v5, %v10980_v63 }
0x1b2e   : > { %v4148_v16 = vpop.xlane.xlu0 %4147 }
0x1b2f   : > { %10157 = vpow2.f32 %v3984_v14  ;;  %v4149_v17 = vsub.f32 %v4145_v1, %v4148_v16 }
0x1b31   : > { %v4150_v18 = vmul.f32 1.442695, %v4149_v17  ;;  %v3783_v17 = vadd.f32 %v3776_v13, %v10924_v40 }
0x1b33   : > { %10159 = vpow2.f32 %v4150_v18  ;;  %v3898_v18 = vld [vmem:[%s11732_s19 + $0x18] sm:$0xff] }
0x1b3c   : > { %v10158_v19 = vpop.eup %10157 }
0x1b3d   : > { %v3986_v20 = vsel %vm1307_vm3, %v10158_v19, 0.0 }
0x1b3e   : > { %3987 = vadd.xlane.f32.xlu0 %v3986_v20 }
0x1b40   : > { %v10160_v21 = vpop.eup %10159 }
0x1b41   : > { %v4152_v22 = vsel %vm1307_vm3, %v10160_v21, 0.0 }
0x1b42   : > { %4153 = vadd.xlane.f32.xlu1 %v4152_v22 }
0x1b53   : > { %4157 = vrot.lane.b32.xlu1 %v10958_v57, %s11718_s13 }
0x1b54   : > { %3991 = vrot.lane.b32.xlu0 %v10958_v57, %s11720_s21 }
0x1b57   : > { %4381 = vrot.lane.b32.xlu1 %v10958_v57, %s11721_s25 }
0x1b58   : > { %4379 = vrot.lane.b32.xlu0 %v10965_v59, %s11719_s17 }
0x1bc7   : > { %v3988_v24 = vpop.xlane.xlu0 %3987 }
0x1bc8   : > { %10161 = vrcp.f32 %v3988_v24 }
0x1bcb   : > { %v4154_v25 = vpop.xlane.xlu1 %4153  ;;  %v3992_v26 = vpop.permute.xlu0 %3991 }
0x1bcc   : > { %10163 = vrcp.f32 %v4154_v25  ;;  %9668 = vmatpush3.msra.mxu1 %v3992_v26 }
0x1bcd   : > { %9677 = vmatprep.subr.mxu1 %v10335_v2 }
0x1bcf   : > { %v4158_v28 = vpop.permute.xlu1 %4157  ;;  %v4380_v37 = vpop.permute.xlu0 %4379 }
0x1bd3   : > { %v4382_v15 = vpop.permute.xlu1 %4381 }
0x1bd5   : > { %v10162_v44 = vpop.eup %10161 }
0x1bd6   : > { %v3990_v27 = vmul.f32 %v10162_v44, %v10158_v19 }
0x1bd8   : > { %9670 = vmatmul.mubr.msk.f32.vlgmr.msra.gmra.mxu1 %vm1307_vm3, %v3990_v27  ;;  %v9071_v27 = vld [vmem:[%s11733_s15] ss:$0 sm:$0xff]  ;;  %s11736_s15 = sld [smem:[#allocation27_spill]] }
0x1bd9   : > { %v10164_v29 = vpop.eup %10163  ;;  %9678 = vmatpush3.msra.mxu1 %v4158_v28  ;;  %9679 = vmatprep.mubr.msk.f32.mxu1 %vm10336_vm0, %v10335_v2 }
0x1bda   : > { %v4156_v30 = vmul.f32 %v10164_v29, %v10160_v21  ;;  %9687 = vmatprep.subr.mxu1 %v10335_v2 }
0x1bdc   : > { %9680 = vmatmul.mubr.msk.f32.vlgmr.msra.gmra.mxu1 %vm1307_vm3, %v4156_v30 }
0x1bdd   : > { %9689 = vmatprep.mubr.msk.f32.mxu1 %vm10336_vm0, %v10335_v2  ;;  %9688 = vmatpush3.msra.mxu1 %v3895_v31 }
0x1bde   : > { %9697 = vmatprep.subr.mxu1 %v10335_v2  ;;  %s11737_s8 = smov %s11736_s15 }
0x1c98   : > { %v4063_v33 = vpop.f32.mrf.mxu1 }
0x1c99   : > { %9690 = vmatmul.mubr.msk.f32.vlgmr.msra.gmra.mxu1 %vm1307_vm3, %v4063_v33 }
0x1c9a   : > { %v9671_v34 = vpop.f32.mrf.mxu1  ;;  %9699 = vmatprep.mubr.msk.f32.mxu1 %vm10336_vm0, %v10335_v2 }
0x1c9c   : > { %v4229_v35 = vpop.f32.mrf.mxu1 }
0x1c9d   : > { %9685 = vmatmul.mubr.msk.f32.vlgmr.msra.gmra.mxu0 %vm1307_vm3, %v4229_v35 }
0x1c9e   : > { %9693 = vmatpush3.xpose.msk.msra.mxu0 %vm1307_vm3, %v4382_v15  ;;  %v9681_v36 = vpop.f32.mrf.mxu1  ;;  %9694 = vmatprep.mubr.msk.f32.mxu0 %vm10336_vm0, %v10335_v2 }
0x1c9f   : > { %9702 = vmatprep.subr.mxu0 %v10335_v2  ;;  %v4983_v36 = vld [vmem:[%s11735_s6 + $0x18] sm:$0xff] }
0x1ca1   : > { %9695 = vmatmul.mubr.msk.f32.vlgmr.msra.gmra.mxu0 %vm1307_vm3, %v4380_v37  ;;  %v4982_v37 = vld [vmem:[%s11735_s6 + $0x10] sm:$0xff] }
0x1ca2   : > { %9704 = vmatprep.mubr.msk.f32.mxu0 %vm10336_vm0, %v10335_v2  ;;  %9703 = vmatpush3.msra.mxu0 %v3897_v62 }
0x1ca3   : > { %9712 = vmatprep.subr.mxu0 %v10335_v2 }
0x1d59   : > { %v4375_v38 = vpop.f32.mrf.mxu1 }
0x1d5b   : > { %v9691_v39 = vpop.f32.mrf.mxu1 }
0x1d5c   : > { %v4980_v39 = vld [vmem:[%s11735_s6] sm:$0xff] }
0x1d5d   : > { %v4302_v41 = vpop.f32.mrf.mxu0 }
0x1d5e   : > { %v11028_v42 = vadd.f32 %v4375_v38, %v4302_v41  ;;  %v4981_v38 = vld [vmem:[%s11735_s6 + $0x8] sm:$0xff] }
0x1d5f   : > { %v9686_v43 = vpop.f32.mrf.mxu0 }
0x1d61   : > { %v4453_v45 = vpop.f32.mrf.mxu0 }
0x1d62   : > { %v4457_v48 = vsel %vm10985_vm9, -1e+10, %v4453_v45 }
0x1d63   : > { %v9696_v49 = vpop.f32.mrf.mxu0  ;;  %v4458_v50 = vsel %vm1307_vm3, %v4457_v48, -inf }
0x1d64   : > { %4459 = vmax.xlane.f32.xlu1 %v4458_v50 }
0x1d75   : > { %4621 = vrot.lane.b32.xlu1 %v10958_v57, %s11724_s26 }
0x1d79   : > { %4619 = vrot.lane.b32.xlu1 %v10965_v59, %s11723_s18 }
0x1ded   : > { %v4460_v51 = vpop.xlane.xlu1 %4459 }
0x1dee   : > { %v4461_v52 = vsub.f32 %v4457_v48, %v4460_v51 }
0x1df0   : > { %v4462_v53 = vmul.f32 1.442695, %v4461_v52  ;;  %v9051_v52 = vld [vmem:[%s11690_s12 + $0x1] ss:$0 sm:$0xff]  ;;  %s11740_s12 = sld [smem:[#allocation30_spill]] }
0x1df1   : > { %v4622_v59 = vpop.permute.xlu1 %4621 }
0x1df2   : > { %10165 = vpow2.f32 %v4462_v53 }
0x1df5   : > { %v4620_v61 = vpop.permute.xlu1 %4619 }
0x1dff   : > { %v10166_v54 = vpop.eup %10165 }
0x1e00   : > { %v4464_v55 = vsel %vm1307_vm3, %v10166_v54, 0.0 }
0x1e01   : > { %4465 = vadd.xlane.f32.xlu0 %v4464_v55 }
0x1e17   : > { %4469 = vrot.lane.b32.xlu0 %v10958_v57, %s11722_s2 }
0x1e8a   : > { %v4466_v7 = vpop.xlane.xlu0 %4465 }
0x1e8b   : > { %10167 = vrcp.f32 %v4466_v7 }
0x1e8e   : > { %v4470_v56 = vpop.permute.xlu0 %4469 }
0x1e8f   : > { %9698 = vmatpush3.msra.mxu1 %v4470_v56  ;;  %v4899_v56 = vld [vmem:[%s11736_s15 + $0x18] sm:$0xff]  ;;  %s11741_s15 = sld [smem:[#allocation28_spill]] }
0x1e90   : > { %9707 = vmatprep.subr.mxu1 %v10335_v2 }
0x1e95   : > { %v9074_v13 = vld [vmem:[%s11741_s15] ss:$0 sm:$0xff] }
0x1e98   : > { %v10168_v58 = vpop.eup %10167 }
0x1e99   : > { %v4468_v60 = vmul.f32 %v10168_v58, %v10166_v54  ;;  %v9052_v54 = vld [vmem:[%s11714_s23 + $0x1] ss:$0 sm:$0xff]  ;;  %v4898_v58 = vld [vmem:[%s11737_s8 + $0x10] sm:$0xff]  ;;  %s11742_s23 = smov %s11741_s15  ;;  %s11743_s15 = sld [smem:[#allocation31_spill]] }
0x1e9b   : > { %9700 = vmatmul.mubr.msk.f32.vlgmr.msra.gmra.mxu1 %vm1307_vm3, %v4468_v60  ;;  %v4896_v60 = vld [vmem:[%s11737_s8] sm:$0xff] }
0x1e9c   : > { %9708 = vmatpush3.xpose.msk.msra.mxu1 %vm1307_vm3, %v4622_v59  ;;  %9709 = vmatprep.mubr.msk.f32.mxu1 %vm10336_vm0, %v10335_v2  ;;  %v4897_v59 = vld [vmem:[%s11737_s8 + $0x8] sm:$0xff] }
0x1e9d   : > { %9717 = vmatprep.subr.mxu1 %v10335_v2 }
0x1e9f   : > { %9710 = vmatmul.mubr.msk.f32.vlgmr.msra.gmra.mxu1 %vm1307_vm3, %v4620_v61  ;;  %s11744_s30 = smov %s11743_s15 }
0x1ea0   : > { %9719 = vmatprep.mubr.msk.f32.mxu1 %vm10336_vm0, %v10335_v2  ;;  %9718 = vmatpush3.msra.mxu1 %v3898_v18 }
0x1ea1   : > { %9733 = vmatprep.subr.mxu1 %v10335_v2 }
0x1f5b   : > { %v4541_v0 = vpop.f32.mrf.mxu1 }
0x1f5c   : > { %9705 = vmatmul.mubr.msk.f32.vlgmr.msra.gmra.mxu0 %vm1307_vm3, %v4541_v0 }
0x1f5d   : > { %v9701_v3 = vpop.f32.mrf.mxu1  ;;  %9714 = vmatprep.mubr.msk.f32.mxu0 %vm10336_vm0, %v10335_v2 }
0x1f5f   : > { %v4693_v6 = vpop.f32.mrf.mxu1 }
0x1f60   : > { %v4697_v8 = vsel %vm10985_vm9, -1e+10, %v4693_v6  ;;  %v9072_v6 = vld [vmem:[%s11738_s14] ss:$0 sm:$0xff] }
0x1f61   : > { %v9711_v47 = vpop.f32.mrf.mxu1  ;;  %v4698_v9 = vsel %vm1307_vm3, %v4697_v8, -inf }
0x1f62   : > { %4699 = vmax.xlane.f32.xlu0 %v4698_v9  ;;  %v9073_v47 = vld [vmem:[%s11739_s24] ss:$0 sm:$0xff] }
0x1f78   : > { %4709 = vrot.lane.b32.xlu0 %v10958_v57, %s11725_s10  ;;  %v3784_v57 = vsel %vm1224_vm1, %v3783_v17, 0.0 }
0x1feb   : > { %v4700_v10 = vpop.xlane.xlu0 %4699 }
0x1fec   : > { %v4701_v1 = vsub.f32 %v4697_v8, %v4700_v10 }
0x1fee   : > { %v4702_v11 = vmul.f32 1.442695, %v4701_v1  ;;  %v9076_v1 = vld [vmem:[%s11740_s12] ss:$0 sm:$0xff] }
0x1fef   : > { %v4710_v12 = vpop.permute.xlu0 %4709 }
0x1ff0   : > { %10169 = vpow2.f32 %v4702_v11  ;;  %9713 = vmatpush3.msra.mxu0 %v4710_v12 }
0x1ff1   : > { %9722 = vmatprep.subr.mxu0 %v10335_v2 }
0x1ffd   : > { %v10170_v14 = vpop.eup %10169 }
0x1ffe   : > { %v4704_v16 = vsel %vm1307_vm3, %v10170_v14, 0.0 }
0x1fff   : > { %4705 = vadd.xlane.f32.xlu1 %v4704_v16 }
0x2003   : > { %3785 = vadd.xlane.f32.xlu1 %v3784_v57 }
0x201c   : > { %v4614_v19 = vpop.f32.mrf.mxu0 }
0x201d   : > { %v4618_v20 = vadd.f32 %v4614_v19, %v11028_v42 }
0x201e   : > { %v9706_v21 = vpop.f32.mrf.mxu0 }
0x2088   : > { %v4706_v22 = vpop.xlane.xlu1 %4705 }
0x2089   : > { %10171 = vrcp.f32 %v4706_v22 }
0x208c   : > { %v3786_v26 = vpop.xlane.xlu1 %3785 }
0x208d   : > { %v3787_v44 = vmul.f32 0.03125, %v3786_v26 }
0x208f   : > { %v3788_v31 = vsub.f32 %v3783_v17, %v3787_v44 }
0x2091   : > { %v3789_v35 = vmul.f32 %v3788_v31, %v3788_v31 }
0x2093   : > { %v3790_v15 = vsel %vm1224_vm1, %v3789_v35, 0.0 }
0x2096   : > { %v10172_v63 = vpop.eup %10171 }
0x2097   : > { %v4708_v24 = vmul.f32 %v10172_v63, %v10170_v14 }
0x2099   : > { %9715 = vmatmul.mubr.msk.f32.vlgmr.msra.gmra.mxu0 %vm1307_vm3, %v4708_v24 }
0x209a   : > { %9730 = vmatprep.mubr.msk.f32.mxu0 %vm10336_vm0, %v10335_v2  ;;  %9723 = vmatpush3.msra.mxu0 %v4899_v56 }
0x209b   : > { %9724 = vmatprep.subr.mxu0 %v10335_v2 }
0x209c   : > { %9725 = vmatpush3.msra.mxu0 %v4898_v58 }
0x209d   : > { %9726 = vmatprep.subr.mxu0 %v10335_v2 }
0x209e   : > { %9727 = vmatpush3.msra.mxu0 %v4897_v59 }
0x209f   : > { %9728 = vmatprep.subr.mxu0 %v10335_v2 }
0x20a0   : > { %9729 = vmatpush3.msra.mxu0 %v4896_v60 }
0x20a1   : > { %9744 = vmatprep.subr.mxu0 %v10335_v2 }
0x2159   : > { %v4781_v40 = vpop.f32.mrf.mxu0 }
0x215a   : > { %9720 = vmatmul.mubr.msk.f32.vlgmr.msra.gmra.mxu1 %vm1307_vm3, %v4781_v40 }
0x215b   : > { %v9716_v25 = vpop.f32.mrf.mxu0  ;;  %9741 = vmatprep.mubr.msk.f32.mxu1 %vm10336_vm0, %v10335_v2  ;;  %9734 = vmatpush3.msra.mxu1 %v4983_v36 }
0x215c   : > { %9735 = vmatprep.subr.mxu1 %v10335_v2 }
0x215d   : > { %9736 = vmatpush3.msra.mxu1 %v4982_v37 }
0x215e   : > { %9737 = vmatprep.subr.mxu1 %v10335_v2 }
0x215f   : > { %9738 = vmatpush3.msra.mxu1 %v4981_v38 }
0x2160   : > { %9739 = vmatprep.subr.mxu1 %v10335_v2 }
0x2161   : > { %9740 = vmatpush3.msra.mxu1 %v4980_v39 }
0x2162   : > { %9749 = vmatprep.subr.mxu1 %v10335_v2 }
0x221a   : > { %v4854_v28 = vpop.f32.mrf.mxu1 }
0x221b   : > { %v4858_v29 = vadd.f32 %v4854_v28, %v4618_v20 }
0x221c   : > { %v9721_v30 = vpop.f32.mrf.mxu1 }
0x221d   : > { %v4865_v32 = vadd.f32 %v9071_v27, %v4858_v29 }
0x221f   : > { %v4868_v33 = vadd.f32 %v4865_v32, %v10939_v46 }
0x2221   : > { %v4869_v34 = vsel %vm1224_vm1, %v4868_v33, 0.0 }
0x2222   : > { %4870 = vadd.xlane.f32.xlu1 %v4869_v34 }
0x2226   : > { %3791 = vadd.xlane.f32.xlu1 %v3790_v15 }
0x22ab   : > { %v4871_v46 = vpop.xlane.xlu1 %4870 }
0x22ac   : > { %v4872_v41 = vmul.f32 0.03125, %v4871_v46 }
0x22ae   : > { %v4873_v42 = vsub.f32 %v4868_v33, %v4872_v41 }
0x22af   : > { %v3792_v43 = vpop.xlane.xlu1 %3791 }
0x22b0   : > { %v3793_v45 = vmul.f32 0.03125, %v3792_v43  ;;  %v4874_v48 = vmul.f32 %v4873_v42, %v4873_v42  ;;  %v5064_v43 = vld [vmem:[%s11743_s15] sm:$0xff]  ;;  %s11745_s15 = sld [smem:[#allocation32_spill]] }
0x22b2   : > { %v3794_v49 = vadd.f32 1e-05, %v3793_v45  ;;  %v4875_v50 = vsel %vm1224_vm1, %v4874_v48, 0.0  ;;  %v5065_v45 = vld [vmem:[%s11744_s30 + $0x8] sm:$0xff] }
0x22b3   : > { %4876 = vadd.xlane.f32.xlu1 %v4875_v50 }
0x22b4   : > { %10173 = vrsqrt.f32 %v3794_v49 }
0x22b6   : > { %s11746_s7 = smov %s11745_s15 }
0x22c1   : > { %v10174_v51 = vpop.eup %10173 }
0x22c2   : > { %v3796_v53 = vmul.f32 %v10174_v51, %v3788_v31 }
0x22c4   : > { %v3803_v55 = vmul.f32 %v9051_v52, %v3796_v53 }
0x22c6   : > { %v11089_v7 = vadd.f32 %v9052_v54, %v3803_v55 }
0x22c8   : > { %9742 = vmatmul.mubr.msk.f32.vlgmr.msra.gmra.mxu1 %vm1224_vm1, %v11089_v7 }
0x22c9   : > { %9751 = vmatprep.mubr.msk.f32.mxu1 %vm10336_vm0, %v10335_v2 }
0x233c   : > { %v4877_v61 = vpop.xlane.xlu1 %4876 }
0x233d   : > { %v4878_v62 = vmul.f32 0.03125, %v4877_v61 }
0x233f   : > { %v4879_v0 = vadd.f32 1e-05, %v4878_v62 }
0x2341   : > { %10175 = vrsqrt.f32 %v4879_v0 }
0x234e   : > { %v10176_v3 = vpop.eup %10175 }
0x234f   : > { %v4881_v8 = vmul.f32 %v10176_v3, %v4873_v42 }
0x2351   : > { %v4888_v9 = vmul.f32 %v9072_v6, %v4881_v8 }
0x2353   : > { %v11105_v10 = vadd.f32 %v9073_v47, %v4888_v9 }
0x2355   : > { %9731 = vmatmul.mubr.msk.f32.vlgmr.msra.gmra.mxu0 %vm1224_vm1, %v11105_v10 }
0x2356   : > { %9746 = vmatprep.mubr.msk.f32.mxu0 %vm10336_vm0, %v10335_v2 }
0x2388   : > { %v5060_v11 = vpop.f32.mrf.mxu1 }
0x2389   : > { %v11112_v12 = vadd.f32 %v9076_v1, %v5060_v11 }
0x238a   : > { %v9743_v5 = vpop.f32.mrf.mxu1 }
0x238b   : > { %5236 = vrot.lane.b32.xlu1 %v11112_v12, %s11717_s1  ;;  %9745 = vmatpush3.xpose.msk.msra.mxu0 %vm1307_vm3, %v11112_v12 }
0x238c   : > { %9754 = vmatprep.subr.mxu0 %v10335_v2 }
0x23fd   : > { %v5237_v18 = vpop.permute.xlu1 %5236 }
0x2415   : > { %v4976_v14 = vpop.f32.mrf.mxu0 }
0x2416   : > { %v4977_v16 = vadd.f32 %v9074_v13, %v4976_v14 }
0x2417   : > { %v9732_v17 = vpop.f32.mrf.mxu0 }
0x2418   : > { %v11120_v57 = vmul.f32 0.35355338, %v4977_v16  ;;  %v5066_v17 = vld [vmem:[%s11744_s30 + $0x10] sm:$0xff] }
0x241a   : > { %5234 = vrot.lane.b32.xlu0 %v11120_v57, %s11717_s1  ;;  %9747 = vmatmul.mubr.msk.f32.vlgmr.msra.gmra.mxu0 %vm1307_vm3, %v11120_v57 }
0x241b   : > { %9755 = vmatpush3.xpose.msk.msra.mxu0 %vm1307_vm3, %v5237_v18  ;;  %9756 = vmatprep.mubr.msk.f32.mxu0 %vm10336_vm0, %v10335_v2 }
0x241c   : > { %9764 = vmatprep.subr.mxu0 %v10335_v2 }
0x248c   : > { %v5235_v19 = vpop.permute.xlu0 %5234 }
0x248d   : > { %9757 = vmatmul.mubr.msk.f32.vlgmr.msra.gmra.mxu0 %vm1307_vm3, %v5235_v19 }
0x248e   : > { %9766 = vmatprep.mubr.msk.f32.mxu0 %vm10336_vm0, %v10335_v2  ;;  %9765 = vmatpush3.msra.mxu0 %v5065_v45 }
0x248f   : > { %9774 = vmatprep.subr.mxu0 %v10335_v2 }
0x24da   : > { %v5142_v20 = vpop.f32.mrf.mxu0 }
0x24db   : > { %v5146_v21 = vsel %vm1388_vm5, -1e+10, %v5142_v20 }
0x24dc   : > { %v9748_v22 = vpop.f32.mrf.mxu0  ;;  %v5147_v63 = vsel %vm1307_vm3, %v5146_v21, -inf }
0x24dd   : > { %5148 = vmax.xlane.f32.xlu0 %v5147_v63 }
0x254d   : > { %v5308_v24 = vpop.f32.mrf.mxu0 }
0x254e   : > { %v5312_v40 = vsel %vm1388_vm5, -1e+10, %v5308_v24 }
0x254f   : > { %v9758_v25 = vpop.f32.mrf.mxu0  ;;  %v5313_v26 = vsel %vm1307_vm3, %v5312_v40, -inf }
0x2550   : > { %5314 = vmax.xlane.f32.xlu1 %v5313_v26 }
0x2561   : > { %5324 = vrot.lane.b32.xlu1 %v11112_v12, %s11715_s28 }
0x2566   : > { %v5149_v44 = vpop.xlane.xlu0 %5148 }
0x2567   : > { %v5150_v27 = vsub.f32 %v5146_v21, %v5149_v44 }
0x2569   : > { %v5151_v28 = vmul.f32 1.442695, %v5150_v27  ;;  %v5067_v27 = vld [vmem:[%s11744_s30 + $0x18] sm:$0xff] }
0x256b   : > { %10177 = vpow2.f32 %v5151_v28 }
0x2578   : > { %v10178_v29 = vpop.eup %10177 }
0x2579   : > { %v5153_v30 = vsel %vm1307_vm3, %v10178_v29, 0.0 }
0x257a   : > { %5154 = vadd.xlane.f32.xlu0 %v5153_v30 }
0x25d9   : > { %v5315_v31 = vpop.xlane.xlu1 %5314 }
0x25da   : > { %v5316_v32 = vsub.f32 %v5312_v40, %v5315_v31 }
0x25dc   : > { %v5317_v33 = vmul.f32 1.442695, %v5316_v32 }
0x25dd   : > { %v5325_v46 = vpop.permute.xlu1 %5324 }
0x25de   : > { %10179 = vpow2.f32 %v5317_v33 }
0x25eb   : > { %v10180_v34 = vpop.eup %10179 }
0x25ec   : > { %v5319_v35 = vsel %vm1307_vm3, %v10180_v34, 0.0 }
0x25ed   : > { %5320 = vadd.xlane.f32.xlu0 %v5319_v35  ;;  %v9094_v35 = vld [vmem:[%s11745_s15] ss:$0 sm:$0xff]  ;;  %s11751_s15 = sld [smem:[#allocation34_spill]] }
0x2603   : > { %5158 = vrot.lane.b32.xlu0 %v11112_v12, %s11716_s5  ;;  %v5155_v15 = vpop.xlane.xlu0 %5154 }
0x2604   : > { %10181 = vrcp.f32 %v5155_v15 }
0x2607   : > { %5548 = vrot.lane.b32.xlu0 %v11112_v12, %s11719_s17 }
0x260b   : > { %5546 = vrot.lane.b32.xlu0 %v11120_v57, %s11719_s17 }
0x2611   : > { %v10182_v37 = vpop.eup %10181 }
0x2612   : > { %v5157_v39 = vmul.f32 %v10182_v37, %v10178_v29 }
0x2676   : > { %v5321_v36 = vpop.xlane.xlu0 %5320 }
0x2677   : > { %10183 = vrcp.f32 %v5321_v36 }
0x267a   : > { %v5159_v38 = vpop.permute.xlu0 %5158 }
0x267b   : > { %9750 = vmatpush3.msra.mxu1 %v5159_v38 }
0x267c   : > { %9752 = vmatmul.mubr.msk.f32.vlgmr.msra.gmra.mxu1 %vm1307_vm3, %v5157_v39  ;;  %9759 = vmatprep.subr.mxu1 %v10335_v2 }
0x267d   : > { %9760 = vmatpush3.msra.mxu1 %v5325_v46  ;;  %9761 = vmatprep.mubr.msk.f32.mxu1 %vm10336_vm0, %v10335_v2 }
0x267e   : > { %9769 = vmatprep.subr.mxu1 %v10335_v2  ;;  %v5549_v50 = vpop.permute.xlu0 %5548 }
0x2682   : > { %v5547_v53 = vpop.permute.xlu0 %5546 }
0x2684   : > { %v10184_v41 = vpop.eup %10183 }
0x2685   : > { %v5323_v42 = vmul.f32 %v10184_v41, %v10180_v34 }
0x2687   : > { %9762 = vmatmul.mubr.msk.f32.vlgmr.msra.gmra.mxu1 %vm1307_vm3, %v5323_v42 }
0x2688   : > { %9771 = vmatprep.mubr.msk.f32.mxu1 %vm10336_vm0, %v10335_v2  ;;  %9770 = vmatpush3.msra.mxu1 %v5064_v43 }
0x2689   : > { %9779 = vmatprep.subr.mxu1 %v10335_v2 }
0x273c   : > { %v5230_v48 = vpop.f32.mrf.mxu1 }
0x273d   : > { %9772 = vmatmul.mubr.msk.f32.vlgmr.msra.gmra.mxu1 %vm1307_vm3, %v5230_v48 }
0x273e   : > { %v9753_v49 = vpop.f32.mrf.mxu1  ;;  %9781 = vmatprep.mubr.msk.f32.mxu1 %vm10336_vm0, %v10335_v2 }
0x273f   : > { %v6066_v49 = vld [vmem:[%s11747_s22 + $0x18] sm:$0xff]  ;;  %s11750_s22 = sld [smem:[#allocation33_spill]] }
0x2747   : > { %v5396_v51 = vpop.f32.mrf.mxu1 }
0x2748   : > { %9767 = vmatmul.mubr.msk.f32.vlgmr.msra.gmra.mxu0 %vm1307_vm3, %v5396_v51  ;;  %v6063_v51 = vld [vmem:[%s11748_s9] sm:$0xff] }
0x2749   : > { %9775 = vmatpush3.xpose.msk.msra.mxu0 %vm1307_vm3, %v5549_v50  ;;  %v9763_v52 = vpop.f32.mrf.mxu1  ;;  %9776 = vmatprep.mubr.msk.f32.mxu0 %vm10336_vm0, %v10335_v2  ;;  %v6065_v50 = vld [vmem:[%s11748_s9 + $0x10] sm:$0xff] }
0x274a   : > { %9784 = vmatprep.subr.mxu0 %v10335_v2  ;;  %v6075_v52 = vld [vmem:[%s11749_s0 + $0x38] sm:$0xff] }
0x274c   : > { %9777 = vmatmul.mubr.msk.f32.vlgmr.msra.gmra.mxu0 %vm1307_vm3, %v5547_v53  ;;  %v6074_v53 = vld [vmem:[%s11749_s0 + $0x30] sm:$0xff] }
0x274d   : > { %9786 = vmatprep.mubr.msk.f32.mxu0 %vm10336_vm0, %v10335_v2  ;;  %9785 = vmatpush3.msra.mxu0 %v5066_v17  ;;  %v9099_v17 = vld [vmem:[%s11753_s4] ss:$0 sm:$0xff] }
0x274e   : > { %9794 = vmatprep.subr.mxu0 %v10335_v2 }
0x27fd   : > { %v5542_v54 = vpop.f32.mrf.mxu1 }
0x27ff   : > { %v9773_v55 = vpop.f32.mrf.mxu1 }
0x2800   : > { %v6072_v55 = vld [vmem:[%s11749_s0 + $0x20] sm:$0xff] }
0x2808   : > { %v5469_v56 = vpop.f32.mrf.mxu0 }
0x2809   : > { %v5543_v58 = vadd.f32 %v5542_v54, %v5469_v56  ;;  %v6073_v54 = vld [vmem:[%s11749_s0 + $0x28] sm:$0xff]  ;;  %v6071_v56 = vld [vmem:[%s11749_s0 + $0x18] sm:$0xff] }
0x280a   : > { %v9768_v59 = vpop.f32.mrf.mxu0 }
0x280c   : > { %v5620_v60 = vpop.f32.mrf.mxu0 }
0x280d   : > { %v5624_v61 = vsel %vm1388_vm5, -1e+10, %v5620_v60 }
0x280e   : > { %v9778_v62 = vpop.f32.mrf.mxu0  ;;  %v5625_v0 = vsel %vm1307_vm3, %v5624_v61, -inf }
0x280f   : > { %5626 = vmax.xlane.f32.xlu1 %v5625_v0  ;;  %v9095_v62 = vld [vmem:[%s11750_s22] ss:$0 sm:$0xff] }
0x2820   : > { %5788 = vrot.lane.b32.xlu1 %v11112_v12, %s11723_s18 }
0x2824   : > { %5786 = vrot.lane.b32.xlu1 %v11120_v57, %s11723_s18 }
0x2898   : > { %v5627_v3 = vpop.xlane.xlu1 %5626 }
0x2899   : > { %v5628_v6 = vsub.f32 %v5624_v61, %v5627_v3  ;;  %v9096_v3 = vld [vmem:[%s11751_s15] ss:$0 sm:$0xff] }
0x289b   : > { %v5629_v8 = vmul.f32 1.442695, %v5628_v6 }
0x289c   : > { %v5789_v13 = vpop.permute.xlu1 %5788 }
0x289d   : > { %10185 = vpow2.f32 %v5629_v8 }
0x28a0   : > { %v5787_v16 = vpop.permute.xlu1 %5786 }
0x28aa   : > { %v10186_v47 = vpop.eup %10185 }
0x28ab   : > { %v5631_v9 = vsel %vm1307_vm3, %v10186_v47, 0.0 }
0x28ac   : > { %5632 = vadd.xlane.f32.xlu0 %v5631_v9  ;;  %v6069_v9 = vld [vmem:[%s11749_s0 + $0x8] sm:$0xff] }
0x28c2   : > { %5636 = vrot.lane.b32.xlu0 %v11112_v12, %s11721_s25 }
0x2935   : > { %v5633_v1 = vpop.xlane.xlu0 %5632 }
0x2936   : > { %10187 = vrcp.f32 %v5633_v1  ;;  %v6068_v1 = vld [vmem:[%s11749_s0] sm:$0xff] }
0x2939   : > { %v5637_v11 = vpop.permute.xlu0 %5636 }
0x293a   : > { %9780 = vmatpush3.msra.mxu1 %v5637_v11  ;;  %v9097_v11 = vld [vmem:[%s11752_s16] ss:$0 sm:$0xff]  ;;  %s11754_s16 = sld [smem:[#allocation39_spill]] }
0x293b   : > { %9789 = vmatprep.subr.mxu1 %v10335_v2 }
0x2940   : > { %s11755_s27 = smov %s11754_s16 }
0x2943   : > { %v10188_v5 = vpop.eup %10187 }
0x2944   : > { %v5635_v14 = vmul.f32 %v10188_v5, %v10186_v47  ;;  %v6070_v47 = vld [vmem:[%s11749_s0 + $0x10] sm:$0xff] }
0x2946   : > { %9782 = vmatmul.mubr.msk.f32.vlgmr.msra.gmra.mxu1 %vm1307_vm3, %v5635_v14 }
0x2947   : > { %9790 = vmatpush3.xpose.msk.msra.mxu1 %vm1307_vm3, %v5789_v13  ;;  %9791 = vmatprep.mubr.msk.f32.mxu1 %vm10336_vm0, %v10335_v2 }
0x2948   : > { %9799 = vmatprep.subr.mxu1 %v10335_v2 }
0x294a   : > { %9792 = vmatmul.mubr.msk.f32.vlgmr.msra.gmra.mxu1 %vm1307_vm3, %v5787_v16 }
0x294b   : > { %9801 = vmatprep.mubr.msk.f32.mxu1 %vm10336_vm0, %v10335_v2  ;;  %9800 = vmatpush3.msra.mxu1 %v5067_v27  ;;  %v9104_v27 = vld [vmem:[%s11726_s3 + $0x28] sm:$0xff] }
0x294c   : > { %9815 = vmatprep.subr.mxu1 %v10335_v2 }
0x2a06   : > { %v5708_v57 = vpop.f32.mrf.mxu1 }
0x2a07   : > { %9787 = vmatmul.mubr.msk.f32.vlgmr.msra.gmra.mxu0 %vm1307_vm3, %v5708_v57 }
0x2a08   : > { %v9783_v18 = vpop.f32.mrf.mxu1  ;;  %9796 = vmatprep.mubr.msk.f32.mxu0 %vm10336_vm0, %v10335_v2 }
0x2a0a   : > { %v5860_v19 = vpop.f32.mrf.mxu1 }
0x2a0b   : > { %v5864_v20 = vsel %vm1388_vm5, -1e+10, %v5860_v19 }
0x2a0c   : > { %v9793_v21 = vpop.f32.mrf.mxu1  ;;  %v5865_v22 = vsel %vm1307_vm3, %v5864_v20, -inf }
0x2a0d   : > { %5866 = vmax.xlane.f32.xlu0 %v5865_v22 }
0x2a23   : > { %5876 = vrot.lane.b32.xlu0 %v11112_v12, %s11724_s26 }
0x2a96   : > { %v5867_v63 = vpop.xlane.xlu0 %5866 }
0x2a97   : > { %v5868_v24 = vsub.f32 %v5864_v20, %v5867_v63 }
0x2a99   : > { %v5869_v40 = vmul.f32 1.442695, %v5868_v24 }
0x2a9a   : > { %v5877_v25 = vpop.permute.xlu0 %5876 }
0x2a9b   : > { %10189 = vpow2.f32 %v5869_v40  ;;  %9795 = vmatpush3.msra.mxu0 %v5877_v25 }
0x2a9c   : > { %9804 = vmatprep.subr.mxu0 %v10335_v2 }
0x2aa8   : > { %v10190_v26 = vpop.eup %10189 }
0x2aa9   : > { %v5871_v44 = vsel %vm1307_vm3, %v10190_v26, 0.0 }
0x2aaa   : > { %5872 = vadd.xlane.f32.xlu1 %v5871_v44  ;;  %v9105_v44 = vld [vmem:[%s11726_s3 + $0x30] sm:$0xff] }
0x2ac7   : > { %v5781_v28 = vpop.f32.mrf.mxu0 }
0x2ac8   : > { %v5785_v29 = vadd.f32 %v5781_v28, %v5543_v58  ;;  %v9103_v28 = vld [vmem:[%s11726_s3 + $0x20] sm:$0xff] }
0x2ac9   : > { %v9788_v12 = vpop.f32.mrf.mxu0 }
0x2b33   : > { %v5873_v30 = vpop.xlane.xlu1 %5872 }
0x2b34   : > { %10191 = vrcp.f32 %v5873_v30 }
0x2b41   : > { %v10192_v31 = vpop.eup %10191 }
0x2b42   : > { %v5875_v32 = vmul.f32 %v10192_v31, %v10190_v26  ;;  %v9106_v26 = vld [vmem:[%s11726_s3 + $0x38] sm:$0xff] }
0x2b44   : > { %9797 = vmatmul.mubr.msk.f32.vlgmr.msra.gmra.mxu0 %vm1307_vm3, %v5875_v32  ;;  %v9101_v32 = vld [vmem:[%s11754_s16] ss:$0 sm:$0xff] }
0x2b45   : > { %9812 = vmatprep.mubr.msk.f32.mxu0 %vm10336_vm0, %v10335_v2  ;;  %9805 = vmatpush3.msra.mxu0 %v6066_v49 }
0x2b46   : > { %9806 = vmatprep.subr.mxu0 %v10335_v2 }
0x2b47   : > { %9807 = vmatpush3.msra.mxu0 %v6065_v50 }
0x2b48   : > { %9808 = vmatprep.subr.mxu0 %v10335_v2 }
0x2c04   : > { %v5948_v33 = vpop.f32.mrf.mxu0 }
0x2c05   : > { %9802 = vmatmul.mubr.msk.f32.vlgmr.msra.gmra.mxu1 %vm1307_vm3, %v5948_v33 }
0x2c06   : > { %v9798_v34 = vpop.f32.mrf.mxu0  ;;  %9831 = vmatprep.mubr.msk.f32.mxu1 %vm10336_vm0, %v10335_v2  ;;  %9816 = vmatpush3.msra.mxu1 %v6075_v52 }
0x2c07   : > { %9817 = vmatprep.subr.mxu1 %v10335_v2  ;;  %v9102_v34 = vld [vmem:[%s10533_s20] ss:$0 sm:$0xff] }
0x2c08   : > { %9818 = vmatpush3.msra.mxu1 %v6074_v53 }
0x2c09   : > { %9819 = vmatprep.subr.mxu1 %v10335_v2 }
0x2c0a   : > { %9820 = vmatpush3.msra.mxu1 %v6073_v54 }
0x2c0b   : > { %9821 = vmatprep.subr.mxu1 %v10335_v2 }
0x2c0c   : > { %9822 = vmatpush3.msra.mxu1 %v6072_v55 }
0x2c0d   : > { %9823 = vmatprep.subr.mxu1 %v10335_v2 }
0x2c0e   : > { %9824 = vmatpush3.msra.mxu1 %v6071_v56 }
0x2c0f   : > { %9825 = vmatprep.subr.mxu1 %v10335_v2 }
0x2c10   : > { %9826 = vmatpush3.msra.mxu1 %v6070_v47 }
0x2c11   : > { %9827 = vmatprep.subr.mxu1 %v10335_v2 }
0x2c12   : > { %9828 = vmatpush3.msra.mxu1 %v6069_v9 }
0x2c13   : > { %9829 = vmatprep.subr.mxu1 %v10335_v2 }
0x2c14   : > { %9830 = vmatpush3.msra.mxu1 %v6068_v1 }
0x2c15   : > { %9850 = vmatprep.subr.mxu1 %v10335_v2 }
0x2cc5   : > { %v6021_v15 = vpop.f32.mrf.mxu1 }
0x2cc6   : > { %v6025_v36 = vadd.f32 %v6021_v15, %v5785_v29 }
0x2cc7   : > { %v9803_v37 = vpop.f32.mrf.mxu1 }
0x2cc8   : > { %v6032_v38 = vadd.f32 %v9094_v35, %v6025_v36  ;;  %v9108_v36 = vld [vmem:[%s11729_s29 + $0x1] ss:$0 sm:$0xff] }
0x2cca   : > { %v6035_v39 = vadd.f32 %v6032_v38, %v11105_v10  ;;  %v6064_v10 = vld [vmem:[%s11748_s9 + $0x8] sm:$0xff] }
0x2ccb   : > { %9809 = vmatpush3.msra.mxu0 %v6064_v10 }
0x2ccc   : > { %v6036_v46 = vsel %vm1224_vm1, %v6035_v39, 0.0  ;;  %9810 = vmatprep.subr.mxu0 %v10335_v2 }
0x2ccd   : > { %6037 = vadd.xlane.f32.xlu1 %v6036_v46  ;;  %9811 = vmatpush3.msra.mxu0 %v6063_v51 }
0x2cce   : > { %9834 = vmatprep.subr.mxu0 %v10335_v2 }
0x2d56   : > { %v6038_v41 = vpop.xlane.xlu1 %6037 }
0x2d57   : > { %v6039_v42 = vmul.f32 0.03125, %v6038_v41 }
0x2d59   : > { %v6040_v43 = vsub.f32 %v6035_v39, %v6039_v42 }
0x2d5b   : > { %v6041_v45 = vmul.f32 %v6040_v43, %v6040_v43 }
0x2d5d   : > { %v6042_v48 = vsel %vm1224_vm1, %v6041_v45, 0.0 }
0x2d5e   : > { %6043 = vadd.xlane.f32.xlu1 %v6042_v48 }
0x2de7   : > { %v6044_v58 = vpop.xlane.xlu1 %6043 }
0x2de8   : > { %v6045_v59 = vmul.f32 0.03125, %v6044_v58 }
0x2dea   : > { %v6046_v60 = vadd.f32 1e-05, %v6045_v59 }
0x2dec   : > { %10193 = vrsqrt.f32 %v6046_v60 }
0x2df9   : > { %v10194_v61 = vpop.eup %10193 }
0x2dfa   : > { %v6048_v0 = vmul.f32 %v10194_v61, %v6040_v43 }
0x2dfc   : > { %v6055_v6 = vmul.f32 %v9095_v62, %v6048_v0 }
0x2dfe   : > { %v6062_v8 = vadd.f32 %v9096_v3, %v6055_v6 }
0x2e00   : > { %9813 = vmatmul.mubr.msk.f32.vlgmr.msra.gmra.mxu0 %vm1224_vm1, %v6062_v8 }
0x2e01   : > { %9842 = vmatprep.mubr.msk.f32.mxu0 %vm10336_vm0, %v10335_v2  ;;  %9835 = vmatpush3.msra.mxu0 %v9106_v26 }
0x2e02   : > { %9836 = vmatprep.subr.mxu0 %v10335_v2 }
0x2e03   : > { %9837 = vmatpush3.msra.mxu0 %v9105_v44 }
0x2e04   : > { %9838 = vmatprep.subr.mxu0 %v10335_v2 }
0x2e05   : > { %9839 = vmatpush3.msra.mxu0 %v9104_v27 }
0x2e06   : > { %9840 = vmatprep.subr.mxu0 %v10335_v2 }
0x2e07   : > { %9841 = vmatpush3.msra.mxu0 %v9103_v28 }
0x2e08   : > { %9845 = vmatprep.subr.mxu0 %v10335_v2 }
0x2ec0   : > { %v6152_v5 = vpop.f32.mrf.mxu0 }
0x2ec1   : > { %v6153_v13 = vadd.f32 %v9097_v11, %v6152_v5 }
0x2ec2   : > { %v9814_v14 = vpop.f32.mrf.mxu0 }
0x2ec3   : > { %v6156_v16 = vmax.f32 %v6153_v13, 0.0  ;;  %v9110_v14 = vld [vmem:[%s11732_s19 + $0x20] sm:$0xff] }
0x2ec5   : > { %9832 = vmatmul.mubr.msk.f32.vlgmr.msra.gmra.mxu1 %vm2407_vm6, %v6156_v16  ;;  %v9111_v16 = vld [vmem:[%s11732_s19 + $0x28] sm:$0xff] }
0x2ec6   : > { %9852 = vmatprep.mubr.msk.f32.mxu1 %vm10336_vm0, %v10335_v2 }
0x2f85   : > { %v6232_v57 = vpop.f32.mrf.mxu1 }
0x2f86   : > { %v6233_v18 = vadd.f32 %v9099_v17, %v6232_v57 }
0x2f87   : > { %v9833_v19 = vpop.f32.mrf.mxu1 }
0x2f88   : > { %v6238_v20 = vadd.f32 %v6233_v18, %v6062_v8 }
0x2f8a   : > { %v6239_v21 = vsel %vm1224_vm1, %v6238_v20, 0.0 }
0x2f8b   : > { %6240 = vadd.xlane.f32.xlu1 %v6239_v21 }
0x3014   : > { %v6241_v22 = vpop.xlane.xlu1 %6240 }
0x3015   : > { %v6242_v63 = vmul.f32 0.03125, %v6241_v22 }
0x3017   : > { %v6243_v24 = vsub.f32 %v6238_v20, %v6242_v63 }
0x3019   : > { %v6244_v40 = vmul.f32 %v6243_v24, %v6243_v24 }
0x301b   : > { %v6245_v25 = vsel %vm1224_vm1, %v6244_v40, 0.0 }
0x301c   : > { %6246 = vadd.xlane.f32.xlu1 %v6245_v25 }
0x30a5   : > { %v6247_v29 = vpop.xlane.xlu1 %6246 }
0x30a6   : > { %v6248_v12 = vmul.f32 0.03125, %v6247_v29 }
0x30a8   : > { %v6249_v30 = vadd.f32 1e-05, %v6248_v12 }
0x30aa   : > { %10195 = vrsqrt.f32 %v6249_v30 }
0x30b7   : > { %v10196_v31 = vpop.eup %10195 }
0x30b8   : > { %v6251_v33 = vmul.f32 %v10196_v31, %v6243_v24 }
0x30ba   : > { %v6258_v35 = vmul.f32 %v9101_v32, %v6251_v33 }
0x30bc   : > { %v11261_v15 = vadd.f32 %v9102_v34, %v6258_v35 }
0x30be   : > { %9843 = vmatmul.mubr.msk.f32.vlgmr.msra.gmra.mxu0 %vm1224_vm1, %v11261_v15 }
0x30bf   : > { %9847 = vmatprep.mubr.msk.f32.mxu0 %vm10336_vm0, %v10335_v2 }
0x317e   : > { %v6348_v37 = vpop.f32.mrf.mxu0 }
0x317f   : > { %v11268_v38 = vadd.f32 %v9108_v36, %v6348_v37 }
0x3180   : > { %v9844_v39 = vpop.f32.mrf.mxu0 }
0x3181   : > { %6528 = vrot.lane.b32.xlu0 %v11268_v38, %s11715_s28  ;;  %6361 = vrot.lane.b32.xlu1 %v11268_v38, %s11716_s5  ;;  %v11275_v46 = vmul.f32 0.35355338, %v11268_v38 }
0x3185   : > { %6526 = vrot.lane.b32.xlu0 %v11275_v46, %s11717_s1 }
0x31f3   : > { %v6362_v41 = vpop.permute.xlu1 %6361  ;;  %v6529_v42 = vpop.permute.xlu0 %6528 }
0x31f4   : > { %9846 = vmatpush3.xpose.msk.msra.mxu0 %vm1307_vm3, %v6362_v41 }
0x31f5   : > { %9855 = vmatprep.subr.mxu0 %v10335_v2 }
0x31f7   : > { %9848 = vmatmul.mubr.msk.f32.vlgmr.msra.gmra.mxu0 %vm1307_vm3, %v11275_v46  ;;  %v6527_v43 = vpop.permute.xlu0 %6526 }
0x31f8   : > { %9856 = vmatpush3.xpose.msk.msra.mxu0 %vm1307_vm3, %v6529_v42  ;;  %9857 = vmatprep.mubr.msk.f32.mxu0 %vm10336_vm0, %v10335_v2 }
0x31f9   : > { %9865 = vmatprep.subr.mxu0 %v10335_v2 }
0x31fb   : > { %9858 = vmatmul.mubr.msk.f32.vlgmr.msra.gmra.mxu0 %vm1307_vm3, %v6527_v43 }
0x31fc   : > { %9867 = vmatprep.mubr.msk.f32.mxu0 %vm10336_vm0, %v10335_v2  ;;  %9866 = vmatpush3.msra.mxu0 %v9111_v16 }
0x31fd   : > { %9875 = vmatprep.subr.mxu0 %v10335_v2 }
0x32b7   : > { %v6434_v45 = vpop.f32.mrf.mxu0 }
0x32b8   : > { %v6438_v48 = vsel %vm10985_vm9, -1e+10, %v6434_v45 }
0x32b9   : > { %v9849_v49 = vpop.f32.mrf.mxu0  ;;  %v6439_v50 = vsel %vm1307_vm3, %v6438_v48, -inf }
0x32ba   : > { %6440 = vmax.xlane.f32.xlu0 %v6439_v50 }
0x32bb   : > { %v6600_v10 = vpop.f32.mrf.mxu0 }
0x32bc   : > { %v6604_v51 = vsel %vm10985_vm9, -1e+10, %v6600_v10 }
0x32bd   : > { %v9859_v52 = vpop.f32.mrf.mxu0  ;;  %v6605_v53 = vsel %vm1307_vm3, %v6604_v51, -inf }
0x32be   : > { %6606 = vmax.xlane.f32.xlu1 %v6605_v53 }
0x32cf   : > { %6616 = vrot.lane.b32.xlu1 %v11268_v38, %s11718_s13  ;;  %s11757_s13 = smov %s11751_s15 }
0x32d3   : > { %6838 = vrot.lane.b32.xlu1 %v11275_v46, %s11719_s17 }
0x3343   : > { %v6441_v54 = vpop.xlane.xlu0 %6440 }
0x3344   : > { %v6442_v55 = vsub.f32 %v6438_v48, %v6441_v54  ;;  %v9113_v54 = vld [vmem:[%s11732_s19 + $0x38] sm:$0xff] }
0x3346   : > { %v6443_v56 = vmul.f32 1.442695, %v6442_v55 }
0x3347   : > { %v6607_v58 = vpop.xlane.xlu1 %6606 }
0x3348   : > { %10197 = vpow2.f32 %v6443_v56  ;;  %v6608_v59 = vsub.f32 %v6604_v51, %v6607_v58 }
0x334a   : > { %v6609_v60 = vmul.f32 1.442695, %v6608_v59 }
0x334b   : > { %v6617_v11 = vpop.permute.xlu1 %6616 }
0x334c   : > { %10199 = vpow2.f32 %v6609_v60 }
0x334f   : > { %v6839_v21 = vpop.permute.xlu1 %6838 }
0x3355   : > { %v10198_v61 = vpop.eup %10197 }
0x3356   : > { %v6445_v62 = vsel %vm1307_vm3, %v10198_v61, 0.0 }
0x3357   : > { %6446 = vadd.xlane.f32.xlu0 %v6445_v62 }
0x3359   : > { %v10200_v0 = vpop.eup %10199 }
0x335a   : > { %v6611_v3 = vsel %vm1307_vm3, %v10200_v0, 0.0 }
0x335b   : > { %6612 = vadd.xlane.f32.xlu0 %v6611_v3 }
0x3371   : > { %6450 = vrot.lane.b32.xlu0 %v11268_v38, %s11720_s21  ;;  %s11759_s21 = sld [smem:[#allocation40_spill]] }
0x3375   : > { %6840 = vrot.lane.b32.xlu0 %v11268_v38, %s11721_s25 }
0x33e0   : > { %v6447_v6 = vpop.xlane.xlu0 %6446 }
0x33e1   : > { %10201 = vrcp.f32 %v6447_v6  ;;  %v9144_v6 = vld [vmem:[%s11735_s6 + $0x28] sm:$0xff] }
0x33e4   : > { %v6613_v8 = vpop.xlane.xlu0 %6612 }
0x33e5   : > { %10203 = vrcp.f32 %v6613_v8  ;;  %v9143_v8 = vld [vmem:[%s11735_s6 + $0x20] sm:$0xff] }
0x33e8   : > { %v6451_v47 = vpop.permute.xlu0 %6450 }
0x33e9   : > { %9851 = vmatpush3.msra.mxu1 %v6451_v47  ;;  %v9131_v47 = vld [vmem:[%s11734_s11 + $0x1] ss:$0 sm:$0xff] }
0x33ea   : > { %9860 = vmatprep.subr.mxu1 %v10335_v2 }
0x33ec   : > { %v6841_v19 = vpop.permute.xlu0 %6840 }
0x33ee   : > { %v10202_v9 = vpop.eup %10201 }
0x33ef   : > { %v6449_v1 = vmul.f32 %v10202_v9, %v10198_v61 }
0x33f1   : > { %9853 = vmatmul.mubr.msk.f32.vlgmr.msra.gmra.mxu1 %vm1307_vm3, %v6449_v1 }
0x33f2   : > { %v10204_v5 = vpop.eup %10203  ;;  %9861 = vmatpush3.msra.mxu1 %v6617_v11  ;;  %9862 = vmatprep.mubr.msk.f32.mxu1 %vm10336_vm0, %v10335_v2 }
0x33f3   : > { %v6615_v13 = vmul.f32 %v10204_v5, %v10200_v0  ;;  %9870 = vmatprep.subr.mxu1 %v10335_v2  ;;  %v9145_v0 = vld [vmem:[%s11735_s6 + $0x30] sm:$0xff] }
0x33f5   : > { %9863 = vmatmul.mubr.msk.f32.vlgmr.msra.gmra.mxu1 %vm1307_vm3, %v6615_v13 }
0x33f6   : > { %9872 = vmatprep.mubr.msk.f32.mxu1 %vm10336_vm0, %v10335_v2  ;;  %9871 = vmatpush3.msra.mxu1 %v9110_v14 }
0x33f7   : > { %9880 = vmatprep.subr.mxu1 %v10335_v2 }
0x34b1   : > { %v6522_v17 = vpop.f32.mrf.mxu1 }
0x34b2   : > { %9873 = vmatmul.mubr.msk.f32.vlgmr.msra.gmra.mxu1 %vm1307_vm3, %v6522_v17 }
0x34b3   : > { %v9854_v57 = vpop.f32.mrf.mxu1  ;;  %9882 = vmatprep.mubr.msk.f32.mxu1 %vm10336_vm0, %v10335_v2 }
0x34b5   : > { %v6688_v18 = vpop.f32.mrf.mxu1 }
0x34b6   : > { %9868 = vmatmul.mubr.msk.f32.vlgmr.msra.gmra.mxu0 %vm1307_vm3, %v6688_v18 }
0x34b7   : > { %9876 = vmatpush3.xpose.msk.msra.mxu0 %vm1307_vm3, %v6841_v19  ;;  %v9864_v20 = vpop.f32.mrf.mxu1  ;;  %9877 = vmatprep.mubr.msk.f32.mxu0 %vm10336_vm0, %v10335_v2 }
0x34b8   : > { %9885 = vmatprep.subr.mxu0 %v10335_v2 }
0x34ba   : > { %9878 = vmatmul.mubr.msk.f32.vlgmr.msra.gmra.mxu0 %vm1307_vm3, %v6839_v21  ;;  %v9148_v21 = vld [vmem:[%s11740_s12 + $0x1] ss:$0 sm:$0xff] }
0x34bb   : > { %9887 = vmatprep.mubr.msk.f32.mxu0 %vm10336_vm0, %v10335_v2 }
0x3572   : > { %v6834_v22 = vpop.f32.mrf.mxu1 }
0x3574   : > { %v9874_v63 = vpop.f32.mrf.mxu1 }
0x3575   : > { %v9138_v63 = vld [vmem:[%s11737_s8 + $0x30] sm:$0xff] }
0x3576   : > { %v6761_v24 = vpop.f32.mrf.mxu0 }
0x3577   : > { %v6835_v40 = vadd.f32 %v6834_v22, %v6761_v24  ;;  %v9137_v24 = vld [vmem:[%s11737_s8 + $0x28] sm:$0xff] }
0x3578   : > { %v9869_v25 = vpop.f32.mrf.mxu0 }
0x357a   : > { %v6912_v26 = vpop.f32.mrf.mxu0 }
0x357b   : > { %v6916_v44 = vsel %vm10985_vm9, -1e+10, %v6912_v26 }
0x357c   : > { %v6917_v27 = vsel %vm1307_vm3, %v6916_v44, -inf  ;;  %v9879_v28 = vpop.f32.mrf.mxu0 }
0x357d   : > { %6918 = vmax.xlane.f32.xlu0 %v6917_v27  ;;  %v9134_v28 = vld [vmem:[%s11738_s14 + $0x1] ss:$0 sm:$0xff] }
0x3593   : > { %6928 = vrot.lane.b32.xlu0 %v11268_v38, %s11722_s2  ;;  %s11763_s2 = sld [smem:[#allocation42_spill]] }
0x3597   : > { %7078 = vrot.lane.b32.xlu0 %v11275_v46, %s11723_s18  ;;  %v9112_v46 = vld [vmem:[%s11732_s19 + $0x30] sm:$0xff] }
0x3598   : > { %9886 = vmatpush3.msra.mxu0 %v9112_v46 }
0x3599   : > { %9895 = vmatprep.subr.mxu0 %v10335_v2 }
0x3606   : > { %v6919_v29 = vpop.xlane.xlu0 %6918 }
0x3607   : > { %v6920_v12 = vsub.f32 %v6916_v44, %v6919_v29 }
0x3609   : > { %v6921_v30 = vmul.f32 1.442695, %v6920_v12  ;;  %v9135_v12 = vld [vmem:[%s11739_s24 + $0x1] ss:$0 sm:$0xff] }
0x360a   : > { %v6929_v31 = vpop.permute.xlu0 %6928 }
0x360b   : > { %10205 = vpow2.f32 %v6921_v30  ;;  %9881 = vmatpush3.msra.mxu1 %v6929_v31 }
0x360c   : > { %9890 = vmatprep.subr.mxu1 %v10335_v2 }
0x360e   : > { %v7079_v39 = vpop.permute.xlu0 %7078 }
0x3618   : > { %v10206_v32 = vpop.eup %10205 }
0x3619   : > { %v6923_v33 = vsel %vm1307_vm3, %v10206_v32, 0.0 }
0x361a   : > { %6924 = vadd.xlane.f32.xlu1 %v6923_v33 }
0x362b   : > { %7080 = vrot.lane.b32.xlu1 %v11268_v38, %s11724_s26 }
0x36a3   : > { %v6925_v34 = vpop.xlane.xlu1 %6924 }
0x36a4   : > { %10207 = vrcp.f32 %v6925_v34 }
0x36a7   : > { %v7081_v37 = vpop.permute.xlu1 %7080 }
0x36b1   : > { %v10208_v35 = vpop.eup %10207 }
0x36b2   : > { %v6927_v36 = vmul.f32 %v10208_v35, %v10206_v32  ;;  %v9141_v32 = vld [vmem:[%s11742_s23 + $0x1] ss:$0 sm:$0xff] }
0x36b4   : > { %9883 = vmatmul.mubr.msk.f32.vlgmr.msra.gmra.mxu1 %vm1307_vm3, %v6927_v36 }
0x36b5   : > { %9891 = vmatpush3.xpose.msk.msra.mxu1 %vm1307_vm3, %v7081_v37  ;;  %9892 = vmatprep.mubr.msk.f32.mxu1 %vm10336_vm0, %v10335_v2 }
0x36b6   : > { %9900 = vmatprep.subr.mxu1 %v10335_v2 }
0x36b8   : > { %9893 = vmatmul.mubr.msk.f32.vlgmr.msra.gmra.mxu1 %vm1307_vm3, %v7079_v39 }
0x36b9   : > { %9902 = vmatprep.mubr.msk.f32.mxu1 %vm10336_vm0, %v10335_v2  ;;  %9901 = vmatpush3.msra.mxu1 %v9113_v54 }
0x36ba   : > { %9916 = vmatprep.subr.mxu1 %v10335_v2 }
0x3774   : > { %v7000_v41 = vpop.f32.mrf.mxu1 }
0x3775   : > { %9888 = vmatmul.mubr.msk.f32.vlgmr.msra.gmra.mxu0 %vm1307_vm3, %v7000_v41 }
0x3776   : > { %v9884_v42 = vpop.f32.mrf.mxu1  ;;  %9897 = vmatprep.mubr.msk.f32.mxu0 %vm10336_vm0, %v10335_v2 }
0x3778   : > { %v7152_v43 = vpop.f32.mrf.mxu1 }
0x3779   : > { %v7156_v45 = vsel %vm10985_vm9, -1e+10, %v7152_v43 }
0x377a   : > { %v7157_v48 = vsel %vm1307_vm3, %v7156_v45, -inf  ;;  %v9894_v49 = vpop.f32.mrf.mxu1 }
0x377b   : > { %7158 = vmax.xlane.f32.xlu1 %v7157_v48 }
0x3804   : > { %v7159_v50 = vpop.xlane.xlu1 %7158 }
0x3805   : > { %v7160_v10 = vsub.f32 %v7156_v45, %v7159_v50 }
0x3807   : > { %v7161_v51 = vmul.f32 1.442695, %v7160_v10 }
0x3809   : > { %10209 = vpow2.f32 %v7161_v51 }
0x3816   : > { %v10210_v52 = vpop.eup %10209 }
0x3817   : > { %v7163_v53 = vsel %vm1307_vm3, %v10210_v52, 0.0 }
0x3818   : > { %7164 = vadd.xlane.f32.xlu0 %v7163_v53 }
0x382e   : > { %7168 = vrot.lane.b32.xlu0 %v11268_v38, %s11725_s10  ;;  %v9146_v38 = vld [vmem:[%s11735_s6 + $0x38] sm:$0xff] }
0x3835   : > { %v7073_v4 = vpop.f32.mrf.mxu0 }
0x3836   : > { %v7077_v55 = vadd.f32 %v7073_v4, %v6835_v40  ;;  %v9136_v40 = vld [vmem:[%s11737_s8 + $0x20] sm:$0xff] }
0x3837   : > { %v9889_v56 = vpop.f32.mrf.mxu0 }
0x38a1   : > { %v7165_v58 = vpop.xlane.xlu0 %7164 }
0x38a2   : > { %10211 = vrcp.f32 %v7165_v58 }
0x38a5   : > { %v7169_v59 = vpop.permute.xlu0 %7168 }
0x38a6   : > { %9896 = vmatpush3.msra.mxu0 %v7169_v59 }
0x38a7   : > { %9905 = vmatprep.subr.mxu0 %v10335_v2 }
0x38af   : > { %v10212_v60 = vpop.eup %10211 }
0x38b0   : > { %v7167_v61 = vmul.f32 %v10212_v60, %v10210_v52 }
0x38b2   : > { %9898 = vmatmul.mubr.msk.f32.vlgmr.msra.gmra.mxu0 %vm1307_vm3, %v7167_v61 }
0x38b3   : > { %9913 = vmatprep.mubr.msk.f32.mxu0 %vm10336_vm0, %v10335_v2 }
0x3972   : > { %v7240_v62 = vpop.f32.mrf.mxu0 }
0x3973   : > { %9903 = vmatmul.mubr.msk.f32.vlgmr.msra.gmra.mxu1 %vm1307_vm3, %v7240_v62 }
0x3974   : > { %9917 = vmatpush3.msra.mxu1 %v9146_v38  ;;  %v9899_v3 = vpop.f32.mrf.mxu0  ;;  %9924 = vmatprep.mubr.msk.f32.mxu1 %vm10336_vm0, %v10335_v2 }
0x3975   : > { %9918 = vmatprep.subr.mxu1 %v10335_v2 }
0x3976   : > { %9919 = vmatpush3.msra.mxu1 %v9145_v0  ;;  %v9151_v0 = vld [vmem:[%s11744_s30 + $0x28] sm:$0xff] }
0x3977   : > { %9920 = vmatprep.subr.mxu1 %v10335_v2 }
0x3978   : > { %9921 = vmatpush3.msra.mxu1 %v9144_v6 }
0x3979   : > { %9922 = vmatprep.subr.mxu1 %v10335_v2 }
0x397a   : > { %9923 = vmatpush3.msra.mxu1 %v9143_v8 }
0x397b   : > { %9925 = vmatmul.mubr.msk.f32.vlgmr.msra.gmra.mxu1 %vm1224_vm1, %v11089_v7  ;;  %9932 = vmatprep.subr.mxu1 %v10335_v2 }
0x397c   : > { %9934 = vmatprep.mubr.msk.f32.mxu1 %vm10336_vm0, %v10335_v2 }
0x3a33   : > { %v7313_v9 = vpop.f32.mrf.mxu1 }
0x3a34   : > { %v7317_v1 = vadd.f32 %v7313_v9, %v7077_v55  ;;  %v9150_v9 = vld [vmem:[%s11744_s30 + $0x20] sm:$0xff] }
0x3a35   : > { %v9904_v11 = vpop.f32.mrf.mxu1 }
0x3a36   : > { %v7324_v5 = vadd.f32 %v9131_v47, %v7317_v1 }
0x3a38   : > { %v7329_v13 = vadd.f32 %v7324_v5, %v11261_v15  ;;  %v9139_v15 = vld [vmem:[%s11737_s8 + $0x38] sm:$0xff] }
0x3a39   : > { %9906 = vmatpush3.msra.mxu0 %v9139_v15 }
0x3a3a   : > { %v7330_v14 = vsel %vm1224_vm1, %v7329_v13, 0.0  ;;  %9907 = vmatprep.subr.mxu0 %v10335_v2 }
0x3a3b   : > { %v7522_v16 = vpop.f32.mrf.mxu1  ;;  %7331 = vadd.xlane.f32.xlu1 %v7330_v14  ;;  %9908 = vmatpush3.msra.mxu0 %v9138_v63 }
0x3a3c   : > { %v11385_v22 = vadd.f32 %v9148_v21, %v7522_v16  ;;  %9909 = vmatprep.subr.mxu0 %v10335_v2 }
0x3a3d   : > { %v9926_v7 = vpop.f32.mrf.mxu1  ;;  %9910 = vmatpush3.msra.mxu0 %v9137_v24 }
0x3a3e   : > { %9911 = vmatprep.subr.mxu0 %v10335_v2 }
0x3a3f   : > { %9912 = vmatpush3.msra.mxu0 %v9136_v40 }
0x3a40   : > { %9927 = vmatprep.subr.mxu0 %v10335_v2 }
0x3ac4   : > { %v7332_v17 = vpop.xlane.xlu1 %7331 }
0x3ac5   : > { %v7333_v57 = vmul.f32 0.03125, %v7332_v17 }
0x3ac7   : > { %v7334_v18 = vsub.f32 %v7329_v13, %v7333_v57 }
0x3ac9   : > { %v7335_v19 = vmul.f32 %v7334_v18, %v7334_v18 }
0x3acb   : > { %v7336_v20 = vsel %vm1224_vm1, %v7335_v19, 0.0 }
0x3acc   : > { %7337 = vadd.xlane.f32.xlu1 %v7336_v20 }
0x3add   : > { %7700 = vrot.lane.b32.xlu1 %v11385_v22, %s11717_s1 }
0x3b55   : > { %v7338_v25 = vpop.xlane.xlu1 %7337 }
0x3b56   : > { %v7339_v26 = vmul.f32 0.03125, %v7338_v25 }
0x3b58   : > { %v7340_v44 = vadd.f32 1e-05, %v7339_v26 }
0x3b59   : > { %v7701_v37 = vpop.permute.xlu1 %7700 }
0x3b5a   : > { %10213 = vrsqrt.f32 %v7340_v44 }
0x3b67   : > { %v10214_v27 = vpop.eup %10213 }
0x3b68   : > { %v7342_v29 = vmul.f32 %v10214_v27, %v7334_v18 }
0x3b6a   : > { %v7349_v30 = vmul.f32 %v9134_v28, %v7342_v29 }
0x3b6c   : > { %v11399_v31 = vadd.f32 %v9135_v12, %v7349_v30 }
0x3b6e   : > { %9914 = vmatmul.mubr.msk.f32.vlgmr.msra.gmra.mxu0 %vm1224_vm1, %v11399_v31 }
0x3b6f   : > { %9928 = vmatpush3.xpose.msk.msra.mxu0 %vm1307_vm3, %v11385_v22  ;;  %9929 = vmatprep.mubr.msk.f32.mxu0 %vm10336_vm0, %v10335_v2 }
0x3b70   : > { %9937 = vmatprep.subr.mxu0 %v10335_v2 }
0x3c2e   : > { %v7439_v33 = vpop.f32.mrf.mxu0 }
0x3c2f   : > { %v7440_v34 = vadd.f32 %v9141_v32, %v7439_v33  ;;  %v9152_v32 = vld [vmem:[%s11744_s30 + $0x30] sm:$0xff] }
0x3c30   : > { %v9915_v35 = vpop.f32.mrf.mxu0 }
0x3c31   : > { %v11409_v36 = vmul.f32 0.35355338, %v7440_v34 }
0x3c33   : > { %7698 = vrot.lane.b32.xlu0 %v11409_v36, %s11717_s1  ;;  %9930 = vmatmul.mubr.msk.f32.vlgmr.msra.gmra.mxu0 %vm1307_vm3, %v11409_v36 }
0x3c34   : > { %9938 = vmatpush3.xpose.msk.msra.mxu0 %vm1307_vm3, %v7701_v37  ;;  %9939 = vmatprep.mubr.msk.f32.mxu0 %vm10336_vm0, %v10335_v2 }
0x3c35   : > { %9947 = vmatprep.subr.mxu0 %v10335_v2 }
0x3ca5   : > { %v7699_v39 = vpop.permute.xlu0 %7698 }
0x3ca6   : > { %9940 = vmatmul.mubr.msk.f32.vlgmr.msra.gmra.mxu0 %vm1307_vm3, %v7699_v39 }
0x3ca7   : > { %9949 = vmatprep.mubr.msk.f32.mxu0 %vm10336_vm0, %v10335_v2  ;;  %9948 = vmatpush3.msra.mxu0 %v9151_v0 }
0x3ca8   : > { %9957 = vmatprep.subr.mxu0 %v10335_v2 }
0x3cf3   : > { %v7606_v46 = vpop.f32.mrf.mxu0 }
0x3cf4   : > { %v7610_v41 = vsel %vm1388_vm5, -1e+10, %v7606_v46 }
0x3cf5   : > { %v7611_v42 = vsel %vm1307_vm3, %v7610_v41, -inf  ;;  %v9931_v43 = vpop.f32.mrf.mxu0 }
0x3cf6   : > { %7612 = vmax.xlane.f32.xlu0 %v7611_v42 }
0x3d66   : > { %v7772_v45 = vpop.f32.mrf.mxu0 }
0x3d67   : > { %v7776_v48 = vsel %vm1388_vm5, -1e+10, %v7772_v45 }
0x3d68   : > { %v7777_v49 = vsel %vm1307_vm3, %v7776_v48, -inf  ;;  %v9941_v50 = vpop.f32.mrf.mxu0 }
0x3d69   : > { %7778 = vmax.xlane.f32.xlu1 %v7777_v49 }
0x3d7a   : > { %7622 = vrot.lane.b32.xlu1 %v11385_v22, %s11716_s5  ;;  %s11756_s5 = smov %s11750_s22 }
0x3d7e   : > { %8012 = vrot.lane.b32.xlu1 %v11385_v22, %s11719_s17 }
0x3d7f   : > { %v7613_v10 = vpop.xlane.xlu0 %7612 }
0x3d80   : > { %v7614_v51 = vsub.f32 %v7610_v41, %v7613_v10 }
0x3d82   : > { %v7615_v52 = vmul.f32 1.442695, %v7614_v51  ;;  %8010 = vrot.lane.b32.xlu1 %v11409_v36, %s11719_s17  ;;  %s11758_s17 = sld [smem:[#allocation36_spill]] }
0x3d84   : > { %10215 = vpow2.f32 %v7615_v52 }
0x3d91   : > { %v10216_v53 = vpop.eup %10215 }
0x3d92   : > { %v7617_v54 = vsel %vm1307_vm3, %v10216_v53, 0.0 }
0x3d93   : > { %7618 = vadd.xlane.f32.xlu0 %v7617_v54 }
0x3df2   : > { %v7779_v4 = vpop.xlane.xlu1 %7778 }
0x3df3   : > { %v7780_v55 = vsub.f32 %v7776_v48, %v7779_v4  ;;  %v9153_v48 = vld [vmem:[%s11744_s30 + $0x38] sm:$0xff] }
0x3df5   : > { %v7781_v56 = vmul.f32 1.442695, %v7780_v55  ;;  %v9171_v55 = vld [vmem:[%s11746_s7 + $0x1] ss:$0 sm:$0xff] }
0x3df6   : > { %v7623_v58 = vpop.permute.xlu1 %7622 }
0x3df7   : > { %10217 = vpow2.f32 %v7781_v56  ;;  %9933 = vmatpush3.msra.mxu1 %v7623_v58 }
0x3df8   : > { %9942 = vmatprep.subr.mxu1 %v10335_v2 }
0x3dfa   : > { %v8013_v5 = vpop.permute.xlu1 %8012 }
0x3dfe   : > { %v8011_v16 = vpop.permute.xlu1 %8010 }
0x3e04   : > { %v10218_v59 = vpop.eup %10217 }
0x3e05   : > { %v7783_v60 = vsel %vm1307_vm3, %v10218_v59, 0.0 }
0x3e06   : > { %7784 = vadd.xlane.f32.xlu0 %v7783_v60 }
0x3e1c   : > { %v7619_v61 = vpop.xlane.xlu0 %7618  ;;  %7788 = vrot.lane.b32.xlu0 %v11385_v22, %s11715_s28 }
0x3e1d   : > { %10219 = vrcp.f32 %v7619_v61 }
0x3e2a   : > { %v10220_v38 = vpop.eup %10219 }
0x3e2b   : > { %v7621_v62 = vmul.f32 %v10220_v38, %v10216_v53 }
0x3e2d   : > { %9935 = vmatmul.mubr.msk.f32.vlgmr.msra.gmra.mxu1 %vm1307_vm3, %v7621_v62 }
0x3e2e   : > { %9944 = vmatprep.mubr.msk.f32.mxu1 %vm10336_vm0, %v10335_v2 }
0x3e8f   : > { %v7785_v3 = vpop.xlane.xlu0 %7784 }
0x3e90   : > { %10221 = vrcp.f32 %v7785_v3 }
0x3e93   : > { %v7789_v6 = vpop.permute.xlu0 %7788 }
0x3e94   : > { %9943 = vmatpush3.msra.mxu1 %v7789_v6 }
0x3e95   : > { %9952 = vmatprep.subr.mxu1 %v10335_v2 }
0x3e9d   : > { %v10222_v8 = vpop.eup %10221 }
0x3e9e   : > { %v7787_v47 = vmul.f32 %v10222_v8, %v10218_v59 }
0x3ea0   : > { %9945 = vmatmul.mubr.msk.f32.vlgmr.msra.gmra.mxu1 %vm1307_vm3, %v7787_v47  ;;  %v9179_v47 = vld [vmem:[%s11748_s9 + $0x38] sm:$0xff] }
0x3ea1   : > { %9953 = vmatpush3.msra.mxu1 %v9150_v9  ;;  %9954 = vmatprep.mubr.msk.f32.mxu1 %vm10336_vm0, %v10335_v2  ;;  %v9178_v9 = vld [vmem:[%s11748_s9 + $0x30] sm:$0xff] }
0x3ea2   : > { %9962 = vmatprep.subr.mxu1 %v10335_v2 }
0x3eed   : > { %v7694_v1 = vpop.f32.mrf.mxu1 }
0x3eee   : > { %9955 = vmatmul.mubr.msk.f32.vlgmr.msra.gmra.mxu1 %vm1307_vm3, %v7694_v1  ;;  %v9176_v1 = vld [vmem:[%s11748_s9 + $0x20] sm:$0xff] }
0x3eef   : > { %v9936_v11 = vpop.f32.mrf.mxu1  ;;  %9964 = vmatprep.mubr.msk.f32.mxu1 %vm10336_vm0, %v10335_v2 }
0x3ef0   : > { %v9188_v11 = vld [vmem:[%s11749_s0 + $0x78] sm:$0xff] }
0x3f60   : > { %v7860_v13 = vpop.f32.mrf.mxu1 }
0x3f61   : > { %9950 = vmatmul.mubr.msk.f32.vlgmr.msra.gmra.mxu0 %vm1307_vm3, %v7860_v13  ;;  %v9186_v13 = vld [vmem:[%s11749_s0 + $0x68] sm:$0xff] }
0x3f62   : > { %9958 = vmatpush3.xpose.msk.msra.mxu0 %vm1307_vm3, %v8013_v5  ;;  %v9946_v14 = vpop.f32.mrf.mxu1  ;;  %9959 = vmatprep.mubr.msk.f32.mxu0 %vm10336_vm0, %v10335_v2  ;;  %v9187_v5 = vld [vmem:[%s11749_s0 + $0x70] sm:$0xff] }
0x3f63   : > { %9967 = vmatprep.subr.mxu0 %v10335_v2  ;;  %v9185_v14 = vld [vmem:[%s11749_s0 + $0x60] sm:$0xff] }
0x3f65   : > { %9960 = vmatmul.mubr.msk.f32.vlgmr.msra.gmra.mxu0 %vm1307_vm3, %v8011_v16  ;;  %v9184_v16 = vld [vmem:[%s11749_s0 + $0x58] sm:$0xff] }
0x3f66   : > { %9969 = vmatprep.mubr.msk.f32.mxu0 %vm10336_vm0, %v10335_v2  ;;  %9968 = vmatpush3.msra.mxu0 %v9152_v32 }
0x3f67   : > { %9977 = vmatprep.subr.mxu0 %v10335_v2 }
0x3fae   : > { %v8006_v7 = vpop.f32.mrf.mxu1 }
0x3fb0   : > { %v9956_v17 = vpop.f32.mrf.mxu1 }
0x4021   : > { %v7933_v57 = vpop.f32.mrf.mxu0 }
0x4022   : > { %v8007_v49 = vadd.f32 %v8006_v7, %v7933_v57 }
0x4023   : > { %v9951_v18 = vpop.f32.mrf.mxu0 }
0x4025   : > { %v8084_v19 = vpop.f32.mrf.mxu0 }
0x4026   : > { %v8088_v20 = vsel %vm1388_vm5, -1e+10, %v8084_v19  ;;  %v9174_v19 = vld [vmem:[%s11756_s5 + $0x1] ss:$0 sm:$0xff] }
0x4027   : > { %v8089_v21 = vsel %vm1307_vm3, %v8088_v20, -inf  ;;  %v9961_v15 = vpop.f32.mrf.mxu0 }
0x4028   : > { %8090 = vmax.xlane.f32.xlu0 %v8089_v21  ;;  %v9175_v21 = vld [vmem:[%s11757_s13 + $0x1] ss:$0 sm:$0xff] }
0x403e   : > { %8100 = vrot.lane.b32.xlu0 %v11385_v22, %s11721_s25  ;;  %s11760_s25 = sld [smem:[#allocation44_spill]] }
0x4042   : > { %8250 = vrot.lane.b32.xlu0 %v11409_v36, %s11723_s18 }
0x4044   : > { %s1178_s28 = sand.u32 1, %s11760_s25  }
0x4045   : > { %s8968_s1 = sshll.u32 %s1178_s28, 3  ;;  %s8824_s13 = scalar_lea.sflag [#allocation3], %s1178_s28 }
0x4046   : > { %s1180_s15 = scalar_lea.vmem [#allocation2], %s8968_s1 }
0x4047   : > { %s8837_s16 = sshll.u32 %s1180_s15, 4  ;;  %s8838_s16 = int_to_ptr.vmem [resolvable:$true] %s8837_s16 }
0x40b1   : > { %v8091_v63 = vpop.xlane.xlu0 %8090 }
0x40b2   : > { %v8092_v24 = vsub.f32 %v8088_v20, %v8091_v63 }
0x40b4   : > { %v8093_v40 = vmul.f32 1.442695, %v8092_v24  ;;  %v9183_v24 = vld [vmem:[%s11749_s0 + $0x50] sm:$0xff] }
0x40b5   : > { %v8101_v25 = vpop.permute.xlu0 %8100 }
0x40b6   : > { %10223 = vpow2.f32 %v8093_v40  ;;  %9963 = vmatpush3.msra.mxu1 %v8101_v25  ;;  %v9182_v40 = vld [vmem:[%s11749_s0 + $0x48] sm:$0xff]  ;;  %v9181_v25 = vld [vmem:[%s11749_s0 + $0x40] sm:$0xff]  ;;  %s10349_s0 = smov [#allocation2]  }
0x40b7   : > { %9972 = vmatprep.subr.mxu1 %v10335_v2  ;;  %s10239_s25 = sshll.u32 %s10349_s0, 4  ;;  %s10240_s25 = int_to_ptr.vmem [resolvable:$false] %s10239_s25 }
0x40b8   : > { %p10242_p0 = scmp.lt.s32.totalorder %s8838_s16, %s10240_s25 }
0x40b9   : > { %v8251_v30 = vpop.permute.xlu0 %8250 }
0x40c3   : > { %v10224_v26 = vpop.eup %10223 }
0x40c4   : > { %v8095_v44 = vsel %vm1307_vm3, %v10224_v26, 0.0 }
0x40c5   : > { %8096 = vadd.xlane.f32.xlu1 %v8095_v44 }
0x40d6   : > { %8252 = vrot.lane.b32.xlu1 %v11385_v22, %s11723_s18  ;;  %s11761_s18 = sld [smem:[#allocation41_spill]] }
0x414e   : > { %v8097_v27 = vpop.xlane.xlu1 %8096 }
0x414f   : > { %10225 = vrcp.f32 %v8097_v27 }
0x4152   : > { %v8253_v12 = vpop.permute.xlu1 %8252 }
0x415c   : > { %v10226_v28 = vpop.eup %10225 }
0x415d   : > { %v8099_v29 = vmul.f32 %v10226_v28, %v10224_v26  ;;  %v9190_v26 = vld [vmem:[%s11758_s17 + $0x1] ss:$0 sm:$0xff]  ;;  %s10235_s17 = scalar_lea.vmem %s8838_s16, 128 }
0x415e   : > { %p10236_p11 = scmp.ne.s32.totalorder %s8838_s16, %s10235_s17 }
0x415f   : > { %9965 = vmatmul.mubr.msk.f32.vlgmr.msra.gmra.mxu1 %vm1307_vm3, %v8099_v29 }
0x4160   : > { %9973 = vmatpush3.xpose.msk.msra.mxu1 %vm1307_vm3, %v8253_v12  ;;  %9974 = vmatprep.mubr.msk.f32.mxu1 %vm10336_vm0, %v10335_v2  ;;  %v9192_v12 = vld [vmem:[%s11753_s4 + $0x1] ss:$0 sm:$0xff]  ;;  %p10237_p12 = pnand %p10236_p11, %p10588_p5 }
0x4161   : > { %9982 = vmatprep.subr.mxu1 %v10335_v2 }
0x4162   : > { %p10238_p13 = pneg %p10237_p12 }
0x4163   : > { %9975 = vmatmul.mubr.msk.f32.vlgmr.msra.gmra.mxu1 %vm1307_vm3, %v8251_v30 }
0x4164   : > { %9984 = vmatprep.mubr.msk.f32.mxu1 %vm10336_vm0, %v10335_v2  ;;  %9983 = vmatpush3.msra.mxu1 %v9153_v48  ;;  %v8738_v48 = vld [vmem:[%s11759_s21] sm:$0xff] }
0x4165   : > { %9998 = vmatprep.subr.mxu1 %v10335_v2 }
0x421f   : > { %v8172_v33 = vpop.f32.mrf.mxu1 }
0x4220   : > { %9970 = vmatmul.mubr.msk.f32.vlgmr.msra.gmra.mxu0 %vm1307_vm3, %v8172_v33 }
0x4221   : > { %v9966_v34 = vpop.f32.mrf.mxu1  ;;  %9979 = vmatprep.mubr.msk.f32.mxu0 %vm10336_vm0, %v10335_v2 }
0x4223   : > { %v8324_v35 = vpop.f32.mrf.mxu1 }
0x4224   : > { %v8328_v36 = vsel %vm1388_vm5, -1e+10, %v8324_v35 }
0x4225   : > { %v8329_v37 = vsel %vm1307_vm3, %v8328_v36, -inf  ;;  %v9976_v39 = vpop.f32.mrf.mxu1 }
0x4226   : > { %8330 = vmax.xlane.f32.xlu1 %v8329_v37 }
0x42af   : > { %v8331_v46 = vpop.xlane.xlu1 %8330 }
0x42b0   : > { %v8332_v41 = vsub.f32 %v8328_v36, %v8331_v46 }
0x42b2   : > { %v8333_v42 = vmul.f32 1.442695, %v8332_v41 }
0x42b4   : > { %10227 = vpow2.f32 %v8333_v42  ;;  %v8741_v42 = vld [vmem:[%s11759_s21 + $0x18] sm:$0xff] }
0x42c1   : > { %v10228_v43 = vpop.eup %10227 }
0x42c2   : > { %v8335_v45 = vsel %vm1307_vm3, %v10228_v43, 0.0 }
0x42c3   : > { %8336 = vadd.xlane.f32.xlu0 %v8335_v45  ;;  %v8739_v45 = vld [vmem:[%s11759_s21 + $0x8] sm:$0xff] }
0x42d9   : > { %8340 = vrot.lane.b32.xlu0 %v11385_v22, %s11724_s26  ;;  %s11762_s26 = sld [smem:[#allocation47_spill]] }
0x42df   : > { %s9201_s22 = sshll.u32 %s11762_s26, 7 }
0x42e0   : > { %v8245_v23 = vpop.f32.mrf.mxu0  ;;  %s11551_s5 = scalar_lea.hbm %s11763_s2, %s9201_s22 }
0x42e1   : > { %v8249_v50 = vadd.f32 %v8245_v23, %v8007_v49 }
0x42e2   : > { %v9971_v10 = vpop.f32.mrf.mxu0 }
0x434c   : > { %v8337_v51 = vpop.xlane.xlu0 %8336 }
0x434d   : > { %10229 = vrcp.f32 %v8337_v51  ;;  %v9196_v51 = vld [vmem:[%s11755_s27 + $0x1] ss:$0 sm:$0xff] }
0x4350   : > { %v8341_v52 = vpop.permute.xlu0 %8340 }
0x4351   : > { %9978 = vmatpush3.msra.mxu0 %v8341_v52 }
0x4352   : > { %9987 = vmatprep.subr.mxu0 %v10335_v2 }
0x435a   : > { %v10230_v53 = vpop.eup %10229 }
0x435b   : > { %v8339_v54 = vmul.f32 %v10230_v53, %v10228_v43  ;;  %v8740_v43 = vld [vmem:[%s11759_s21 + $0x10] sm:$0xff]  ;;  %v9197_v53 = vld [vmem:[%s10533_s20 + $0x1] ss:$0 sm:$0xff] }
0x435d   : > { %9980 = vmatmul.mubr.msk.f32.vlgmr.msra.gmra.mxu0 %vm1307_vm3, %v8339_v54 }
0x435e   : > { %9995 = vmatprep.mubr.msk.f32.mxu0 %vm10336_vm0, %v10335_v2  ;;  %9988 = vmatpush3.msra.mxu0 %v9179_v47 }
0x435f   : > { %9989 = vmatprep.subr.mxu0 %v10335_v2 }
0x4360   : > { %9990 = vmatpush3.msra.mxu0 %v9178_v9 }
0x4361   : > { %9991 = vmatprep.subr.mxu0 %v10335_v2 }
0x441d   : > { %v8412_v22 = vpop.f32.mrf.mxu0 }
0x441e   : > { %9985 = vmatmul.mubr.msk.f32.vlgmr.msra.gmra.mxu1 %vm1307_vm3, %v8412_v22 }
0x441f   : > { %v9981_v4 = vpop.f32.mrf.mxu0  ;;  %10014 = vmatprep.mubr.msk.f32.mxu1 %vm10336_vm0, %v10335_v2  ;;  %9999 = vmatpush3.msra.mxu1 %v9188_v11 }
0x4420   : > { %10000 = vmatprep.subr.mxu1 %v10335_v2  ;;  %v9198_v4 = vld [vmem:[%s11761_s18] ss:$0 sm:$0xff]  ;;  %s10241_s18 = scalar_lea.vmem %s10240_s25, 256 }
0x4421   : > { %10001 = vmatpush3.msra.mxu1 %v9187_v5  ;;  %p10243_p1 = scmp.lt.s32.totalorder %s10241_s18, %s10235_s17 }
0x4422   : > { %10002 = vmatprep.subr.mxu1 %v10335_v2 }
0x4423   : > { %10003 = vmatpush3.msra.mxu1 %v9186_v13  ;;  %p10244_p2 = por %p10243_p1, %p10242_p0 }
0x4424   : > { %10004 = vmatprep.subr.mxu1 %v10335_v2 }
0x4425   : > { %10005 = vmatpush3.msra.mxu1 %v9185_v14  ;;  %p10245_p3 = pnand %p10244_p2, %p10238_p13 }
0x4426   : > { %10006 = vmatprep.subr.mxu1 %v10335_v2 }
0x4427   : > { %10007 = vmatpush3.msra.mxu1 %v9184_v16 }
0x4428   : > { %10008 = vmatprep.subr.mxu1 %v10335_v2 }
0x4429   : > { %10009 = vmatpush3.msra.mxu1 %v9183_v24 }
0x442a   : > { %10010 = vmatprep.subr.mxu1 %v10335_v2 }
0x442b   : > { %10011 = vmatpush3.msra.mxu1 %v9182_v40 }
0x442c   : > { %10012 = vmatprep.subr.mxu1 %v10335_v2 }
0x442d   : > { %10013 = vmatpush3.msra.mxu1 %v9181_v25 }
0x44de   : > { %v8485_v56 = vpop.f32.mrf.mxu1 }
0x44df   : > { %v8489_v58 = vadd.f32 %v8485_v56, %v8249_v50 }
0x44e0   : > { %v9986_v59 = vpop.f32.mrf.mxu1 }
0x44e1   : > { %v8496_v60 = vadd.f32 %v9171_v55, %v8489_v58 }
0x44e3   : > { %v8501_v61 = vadd.f32 %v8496_v60, %v11399_v31  ;;  %v9177_v31 = vld [vmem:[%s11748_s9 + $0x28] sm:$0xff] }
0x44e4   : > { %9992 = vmatpush3.msra.mxu0 %v9177_v31 }
0x44e5   : > { %v8502_v38 = vsel %vm1224_vm1, %v8501_v61, 0.0  ;;  %9993 = vmatprep.subr.mxu0 %v10335_v2 }
0x44e6   : > { %8503 = vadd.xlane.f32.xlu1 %v8502_v38  ;;  %9994 = vmatpush3.msra.mxu0 %v9176_v1 }
0x44e7   : > { %10017 = vmatprep.subr.mxu0 %v10335_v2 }
0x456f   : > { %v8504_v62 = vpop.xlane.xlu1 %8503 }
0x4570   : > { %v8505_v0 = vmul.f32 0.03125, %v8504_v62 }
0x4572   : > { %v8506_v3 = vsub.f32 %v8501_v61, %v8505_v0 }
0x4574   : > { %v8507_v6 = vmul.f32 %v8506_v3, %v8506_v3 }
0x4576   : > { %v8508_v8 = vsel %vm1224_vm1, %v8507_v6, 0.0 }
0x4577   : > { %8509 = vadd.xlane.f32.xlu1 %v8508_v8 }
0x4600   : > { %v8510_v7 = vpop.xlane.xlu1 %8509 }
0x4601   : > { %v8511_v17 = vmul.f32 0.03125, %v8510_v7 }
0x4603   : > { %v8512_v57 = vadd.f32 1e-05, %v8511_v17 }
0x4605   : > { %10231 = vrsqrt.f32 %v8512_v57 }
0x4612   : > { %v10232_v18 = vpop.eup %10231 }
0x4613   : > { %v8514_v20 = vmul.f32 %v10232_v18, %v8506_v3 }
0x4615   : > { %v8521_v15 = vmul.f32 %v9174_v19, %v8514_v20 }
0x4617   : > { %v8528_v63 = vadd.f32 %v9175_v21, %v8521_v15 }
0x4619   : > { %9996 = vmatmul.mubr.msk.f32.vlgmr.msra.gmra.mxu0 %vm1224_vm1, %v8528_v63 }
0x461a   : > { %10025 = vmatprep.mubr.msk.f32.mxu0 %vm10336_vm0, %v10335_v2  ;;  %10018 = vmatpush3.msra.mxu0 %v8741_v42 }
0x461b   : > { %10019 = vmatprep.subr.mxu0 %v10335_v2 }
0x461c   : > { %10020 = vmatpush3.msra.mxu0 %v8740_v43 }
0x461d   : > { %10021 = vmatprep.subr.mxu0 %v10335_v2 }
0x461e   : > { %10022 = vmatpush3.msra.mxu0 %v8739_v45 }
0x461f   : > { %10023 = vmatprep.subr.mxu0 %v10335_v2 }
0x4620   : > { %10024 = vmatpush3.msra.mxu0 %v8738_v48 }
0x46d9   : > { %v8622_v44 = vpop.f32.mrf.mxu0 }
0x46da   : > { %v8623_v27 = vadd.f32 %v9190_v26, %v8622_v44 }
0x46db   : > { %v9997_v28 = vpop.f32.mrf.mxu0 }
0x46dc   : > { %v8626_v29 = vmax.f32 %v8623_v27, 0.0 }
0x46de   : > { %10015 = vmatmul.mubr.msk.f32.vlgmr.msra.gmra.mxu1 %vm2407_vm6, %v8626_v29 }
0x479e   : > { %v8702_v30 = vpop.f32.mrf.mxu1 }
0x479f   : > { %v8703_v32 = vadd.f32 %v9192_v12, %v8702_v30 }
0x47a0   : > { %v10016_v33 = vpop.f32.mrf.mxu1 }
0x47a1   : > { %v8710_v34 = vadd.f32 %v8703_v32, %v8528_v63 }
0x47a3   : > { %v8711_v35 = vsel %vm1224_vm1, %v8710_v34, 0.0 }
0x47a4   : > { %8712 = vadd.xlane.f32.xlu1 %v8711_v35 }
0x482d   : > { %v8713_v36 = vpop.xlane.xlu1 %8712 }
0x482e   : > { %v8714_v37 = vmul.f32 0.03125, %v8713_v36 }
0x4830   : > { %v8715_v39 = vsub.f32 %v8710_v34, %v8714_v37 }
0x4832   : > { %v8716_v46 = vmul.f32 %v8715_v39, %v8715_v39 }
0x4834   : > { %v8717_v41 = vsel %vm1224_vm1, %v8716_v46, 0.0 }
0x4835   : > { %8718 = vadd.xlane.f32.xlu1 %v8717_v41 }
0x48be   : > { %v8719_v49 = vpop.xlane.xlu1 %8718 }
0x48bf   : > { %v8720_v23 = vmul.f32 0.03125, %v8719_v49 }
0x48c1   : > { %v8721_v50 = vadd.f32 1e-05, %v8720_v23 }
0x48c3   : > { %10233 = vrsqrt.f32 %v8721_v50 }
0x48d0   : > { %v10234_v10 = vpop.eup %10233 }
0x48d1   : > { %v8723_v52 = vmul.f32 %v10234_v10, %v8715_v39 }
0x48d3   : > { %v8730_v54 = vmul.f32 %v9196_v51, %v8723_v52 }
0x48d5   : > { %v8737_v22 = vadd.f32 %v9197_v53, %v8730_v54 }
0x48d7   : > { %10026 = vmatmul.mubr.msk.f32.vlgmr.msra.gmra.mxu0 %vm1224_vm1, %v8737_v22 }
0x4997   : > { %v8818_v2 = vpop.f32.mrf.mxu0 }
0x4998   : > { %v8819_v55 = vadd.f32 %v9198_v4, %v8818_v2 }
0x4999   : > { %v10027_v56 = vpop.f32.mrf.mxu0 }
0x499a   : > { %8822 = vst [vmem:[%s1180_s15] sm:$0xff] %v8819_v55 }
0x499b   : > { %10248 = shalt.err (!%p10245_p3)
}
0x499c   : > { %s10249_s26 = scalar_lea.hbm %s11551_s5, 128  ;;  %s10253_s28 = scalar_lea.hbm %s11763_s2, 256 }
0x499d   : > { %p10250_p4 = scmp.ne.s32.totalorder %s11551_s5, %s10249_s26  ;;  %p10254_p9 = scmp.lt.s32.totalorder %s11551_s5, %s11763_s2 }
0x499e   : > { %p10255_p10 = scmp.lt.s32.totalorder %s10253_s28, %s10249_s26 }
0x499f   : > { %p10251_p7 = pnand %p10250_p4, %p10588_p5 }
0x49a0   : > { %p10256_p11 = por %p10255_p10, %p10254_p9 }
0x49a1   : > { %p10252_p8 = pneg %p10251_p7 }
0x49a3   : > { %p10257_p12 = pnand %p10256_p11, %p10252_p8 }
0x49a5   : > { %10260 = shalt.err (!%p10257_p12)
}
0x49a6   : > { %10028 = dma.vmem_to_hbm [thread:$0]  (%p10588_p5), %s8838_s16, 128, %s11551_s5, %s8824_s13  }
0x49a7 PF: > { %s11765_s0 = sld [smem:[#allocation46_spill]] }
0x49a8   : > { %s11766_s1 = sld [smem:[#allocation43_spill]] }
0x49ad   : > { %p10034_p13 = scmp.ge.s32.totalorder %s11765_s0, 2 }
0x49ae   : > { %s8849_s15 = sand.u32 1, %s11766_s1  }
0x49af   : > { %p10031_p0 = pnand %p10034_p13, %p10592_p6  ;;  %s8850_s17 = scalar_lea.sflag [#allocation3], %s8849_s15 }
0x49b1   : > { %p10032_p1 = pneg %p10031_p0 }
0x49b3   : > { %10278 = dma.done.wait (%p10032_p1), %s8850_s17, 128  }
0x49b4   : > { %10280 = vsyncadd (%p10032_p1), %s8850_s17, 4294967168  ;;  %s11768_s22 = sld [smem:[#allocation48_spill]] }
0x49b5   : > { %s11769_s15 = sld [smem:[#allocation44_spill]] }
0x49b6   : > { %s11770_s16 = sld [smem:[#allocation45_spill]] }
0x49b7   : > { %s11771_s18 = sld [smem:[#allocation49_spill]] }
0x49ba   : > { %p87_p2 = scmp.ge.s32.totalorder %s11768_s22, 4  }
0x49bc   :  { %89 = sbr.rel (!%p87_p2) target bundleno = 94 (0x5e), region = 286 }
0x49c1   :  { %8855 = vsyncpa [#allocation3], 1 }
0x49c2   :  { %8857 = vsyncpa [#allocation3 + $0x1], 1 }

</bundles_post_ra>
